<compile_context>
chip_gen: v7x
topology: tpu7x:2x2x1
jax: 0.10.0
libtpu: 0.0.40
codegen_flags: <defaults>
</compile_context>

<pallas_src>
import math

import jax
import jax.numpy as jnp
from jax import lax
from jax.experimental import pallas as pl
from jax.experimental.pallas import tpu as pltpu


_C0 = math.sqrt(2.0 / math.pi)
_C1 = _C0 * 0.044715
_LN_EPS = 1e-5  # PyTorch nn.LayerNorm default


def _gelu(h):
    # TODO(synk): PyTorch nn.GELU() defaults to the exact erf form; the tanh
    # approximation is used here (guaranteed Mosaic lowering, |diff| ~1e-3).
    # Constants are folded so only two VALU muls feed the EUP tanh.
    u = h * h
    return 0.5 * h * (1.0 + jnp.tanh(h * (_C0 + _C1 * u)))


def _ln_gelu(h_f32, gamma, beta, ep_dtype):
    """LayerNorm with f32 statistics, affine + GELU in `ep_dtype`, bf16 out.

    gamma/beta are (1, D) rows already cast to `ep_dtype`.  The bf16 result
    feeds the next MXU matmul directly (no extra pack step).
    """
    mean = jnp.mean(h_f32, axis=-1, keepdims=True)
    c = h_f32 - mean
    var = jnp.mean(c * c, axis=-1, keepdims=True)
    xn = (c * lax.rsqrt(var + _LN_EPS)).astype(ep_dtype)
    y = _gelu(xn * gamma + beta)
    return y.astype(jnp.bfloat16)


def _make_mlp_kernel(num_inner: int, pre_norm: bool, ep_dtype):
    """Kernel closure over the static module config."""

    def kernel(*refs):
        it = iter(refs)
        x_ref = next(it)

        if pre_norm:
            pg = next(it)[...]
            pb = next(it)[...]
            # x tile is f32 here (LN on full-precision input).
            xb = _ln_gelu(x_ref[...].astype(jnp.float32), pg, pb, ep_dtype)
        else:
            xb = x_ref[...]                               # bf16 (TM, D_in)

        # fc1: (TM, D_in) @ (D_in, H) -> f32 accumulate, f32 bias add.
        w1_ref = next(it)
        b1_ref = next(it)
        h = jnp.dot(xb, w1_ref[...],
                    preferred_element_type=jnp.float32) + b1_ref[...]

        # Residual inner blocks: x = x + Linear(GELU(LayerNorm(x)))
        for _ in range(num_inner):
            g = next(it)[...]
            be = next(it)[...]
            wb_ref = next(it)
            bb_ref = next(it)
            r = _ln_gelu(h, g, be, ep_dtype)
            h = h + (jnp.dot(r, wb_ref[...],
                             preferred_element_type=jnp.float32) + bb_ref[...])

        # final: LayerNorm -> GELU -> Linear(H -> D_out)
        fg = next(it)[...]
        fb = next(it)[...]
        fw_ref = next(it)
        fbias_ref = next(it)
        o_ref = next(it)
        y = _ln_gelu(h, fg, fb, ep_dtype)
        y = jnp.dot(y, fw_ref[...],
                    preferred_element_type=jnp.float32) + fbias_ref[...]
        o_ref[...] = y.astype(o_ref.dtype)

    return kernel


def default_epilogue_dtype():
    """bf16 epilogue on chips with a bf16 VPU/EUP (v6e/v7x); f32 otherwise."""
    try:
        kind = jax.devices()[0].device_kind.lower()
    except Exception:
        return jnp.float32
    return jnp.bfloat16 if ("v6" in kind or "v7" in kind) else jnp.float32


def prepare_params(params, epilogue_dtype=None):
    """One-time parameter formatting (hoisted out of the per-call path).

    params (PyTorch layouts, f32):
      "pre"    : None or (ln_weight (D_in,), ln_bias (D_in,))
      "fc1"    : (weight (H, D_in), bias (H,))
      "blocks" : list of (ln_w (H,), ln_b (H,), weight (H, H), bias (H,))
      "final"  : (ln_w (H,), ln_b (H,), weight (D_out, H), bias (D_out,))
    """
    ep = epilogue_dtype if epilogue_dtype is not None else default_epilogue_dtype()
    f32, bf16 = jnp.float32, jnp.bfloat16
    row = lambda v, dt: jnp.asarray(v).astype(dt).reshape(1, -1)
    wt = lambda w: jnp.asarray(w).T.astype(bf16)          # (in, out) bf16

    pre = params.get("pre")
    prepared = {
        "epilogue_dtype": ep,
        "pre": None if pre is None else (row(pre[0], ep), row(pre[1], ep)),
        "fc1": (wt(params["fc1"][0]), row(params["fc1"][1], f32)),
        "blocks": [(row(g, ep), row(b, ep), wt(w), row(bias, f32))
                   for (g, b, w, bias) in params["blocks"]],
    }
    fg, fb, fw, fbias = params["final"]
    prepared["final"] = (row(fg, ep), row(fb, ep), wt(fw), row(fbias, f32))
    return prepared


def mlp_forward(x, prepared, *, tm=256, out_dtype=None):
    """Batch-tiled fused Pallas forward pass. `prepared` = prepare_params(...)."""
    B, d_in = x.shape
    ep = prepared["epilogue_dtype"]
    pre = prepared["pre"]
    pre_norm = pre is not None
    w1t, b1 = prepared["fc1"]
    hdim = w1t.shape[1]
    blocks = prepared["blocks"]
    num_inner = len(blocks)
    fg, fb, fwt, fbias = prepared["final"]
    d_out = fwt.shape[1]
    out_dtype = out_dtype if out_dtype is not None else x.dtype

    # Keep >= 2 batch tiles when the batch allows (both v7x TCs get work);
    # otherwise prefer the largest tile to amortize per-grid-step overhead.
    while tm > 128 and pl.cdiv(B, tm) < 2:
        tm //= 2
    nb = pl.cdiv(B, tm)
    b_pad = nb * tm

    # pre_norm -> LayerNorm runs on the full-precision input (matches PyTorch);
    # otherwise x is only an MXU operand, so ship it as bf16.
    x_op = x.astype(jnp.float32 if pre_norm else jnp.bfloat16)
    if b_pad != B:
        x_op = jnp.pad(x_op, ((0, b_pad - B), (0, 0)))

    operands = [x_op]
    if pre_norm:
        operands += [pre[0], pre[1]]
    operands += [w1t, b1]
    for blk in blocks:
        operands += list(blk)
    operands += [fg, fb, fwt, fbias]

    resident_bytes = sum(int(o.size) * o.dtype.itemsize for o in operands[1:])
    x_tile_bytes = tm * d_in * x_op.dtype.itemsize
    out_tile_bytes = tm * d_out * jnp.dtype(out_dtype).itemsize

    try:
        vmem_cap = int(getattr(pltpu.get_tpu_info(), "vmem_capacity_bytes",
                               64 << 20))
    except Exception:
        vmem_cap = 64 << 20

    flops = 2 * b_pad * (d_in * hdim + num_inner * hdim * hdim + hdim * d_out)
    transcendentals = b_pad * (hdim * (num_inner + 1)
                               + (d_in if pre_norm else 0))
    bytes_accessed = (resident_bytes
                      + int(x_op.size) * x_op.dtype.itemsize
                      + b_pad * d_out * jnp.dtype(out_dtype).itemsize)

    kernel = _make_mlp_kernel(num_inner, pre_norm, ep)

    def run(single_buffer: bool):
        def resident_spec(shape):
            # Constant index_map -> loaded once, stays VMEM-resident across
            # batch tiles; Buffered(1) avoids paying 2x for the weights.
            if single_buffer:
                return pl.BlockSpec(shape, lambda i: (0, 0),
                                    pipeline_mode=pl.Buffered(1))
            return pl.BlockSpec(shape, lambda i: (0, 0))

        in_specs = ([pl.BlockSpec((tm, d_in), lambda i: (i, 0))]
                    + [resident_spec(o.shape) for o in operands[1:]])

        weight_mult = 1 if single_buffer else 2
        vmem_needed = (weight_mult * resident_bytes
                       + 2 * (x_tile_bytes + out_tile_bytes)
                       + (8 << 20))                        # epilogue + scratch
        vmem_limit = int(min(max(vmem_needed, 32 << 20), vmem_cap))

        return pl.pallas_call(
            kernel,
            out_shape=jax.ShapeDtypeStruct((b_pad, d_out), out_dtype),
            grid_spec=pltpu.PrefetchScalarGridSpec(
                num_scalar_prefetch=0,
                grid=(nb,),
                in_specs=in_specs,
                out_specs=pl.BlockSpec((tm, d_out), lambda i: (i, 0)),
            ),
            compiler_params=pltpu.CompilerParams(
                dimension_semantics=("parallel",),
                vmem_limit_bytes=vmem_limit),
            cost_estimate=pl.CostEstimate(
                flops=flops,
                transcendentals=transcendentals,
                bytes_accessed=bytes_accessed),
        )(*operands)

    # TODO(synk): add a streamed-weight fallback (double-buffered per-block
    # (H,H) DMA via pltpu.emit_pipeline) for v7x when bf16 weights exceed
    # ~40 MiB; all shapes exercised here fit fully resident.
    try:
        out = run(single_buffer=True)
    except Exception:
        # pipeline_mode=pl.Buffered(1) unsupported on this jax/Mosaic build:
        # fall back to default double-buffered resident weights.
        out = run(single_buffer=False)
    return out[:B]


def mlp_reference(x, prepared):
    """Pure-JAX reference with identical dtype strategy (bf16 dots, f32 stats)."""
    f32, bf16 = jnp.float32, jnp.bfloat16
    ep = prepared["epilogue_dtype"]
    pre = prepared["pre"]
    if pre is not None:
        xb = _ln_gelu(x.astype(f32), pre[0], pre[1], ep)
    else:
        xb = x.astype(bf16)
    w1t, b1 = prepared["fc1"]
    h = jnp.dot(xb, w1t, preferred_element_type=f32) + b1
    for (g, be, wt, bias) in prepared["blocks"]:
        r = _ln_gelu(h, g, be, ep)
        h = h + (jnp.dot(r, wt, preferred_element_type=f32) + bias)
    fg, fb, fwt, fbias = prepared["final"]
    y = _ln_gelu(h, fg, fb, ep)
    y = jnp.dot(y, fwt, preferred_element_type=f32) + fbias
    return y.astype(x.dtype)


def _linear_init(key, fan_in, fan_out):
    kw, kb = jax.random.split(key)
    bound = 1.0 / math.sqrt(fan_in)
    w = jax.random.uniform(kw, (fan_out, fan_in), jnp.float32, -bound, bound)
    b = jax.random.uniform(kb, (fan_out,), jnp.float32, -bound, bound)
    return w, b


def _ln_init(key, dim):
    kg, kb = jax.random.split(key)
    # PyTorch inits gamma=1, beta=0; perturb so the affine path is exercised.
    g = 1.0 + 0.1 * jax.random.normal(kg, (dim,), jnp.float32)
    b = 0.1 * jax.random.normal(kb, (dim,), jnp.float32)
    return g, b


def make_params(key, d_in, h, d_out, num_inner, pre_norm):
    total = 1 + 2 * num_inner + 2 + (1 if pre_norm else 0)
    keys = list(jax.random.split(key, total))
    params = {"pre": _ln_init(keys.pop(), d_in) if pre_norm else None}
    params["fc1"] = _linear_init(keys.pop(), d_in, h)
    blocks = []
    for _ in range(num_inner):
        g, be = _ln_init(keys.pop(), h)
        wb, bb = _linear_init(keys.pop(), h, h)
        blocks.append((g, be, wb, bb))
    params["blocks"] = blocks
    fg, fb = _ln_init(keys.pop(), h)
    fw, fbias = _linear_init(keys.pop(), h, d_out)
    params["final"] = (fg, fb, fw, fbias)
    return params


if __name__ == "__main__":
    # Lane-dense feature dims (multiples of 128); batch 200 exercises the
    # pad-to-tile path and, with the tm auto-halving, a grid of 2 tiles.
    B, D_IN, H, D_OUT = 200, 128, 256, 128
    key = jax.random.PRNGKey(0)
    kx, kp = jax.random.split(key)
    x = jax.random.normal(kx, (B, D_IN), dtype=jnp.float32)

    ep = default_epilogue_dtype()
    # Config 1: module defaults (num_inner=0, pre_norm=False).
    # Config 2: residual blocks + pre_norm exercised.
    for num_inner, pre_norm in [(0, False), (2, True)]:
        params = make_params(jax.random.fold_in(kp, num_inner),
                             D_IN, H, D_OUT, num_inner, pre_norm)
        prepared = prepare_params(params, ep)   # one-time weight formatting
        out = mlp_forward(x, prepared, tm=256)
        out = jax.block_until_ready(out)
        ref = mlp_reference(x, prepared)
        assert out.shape == (B, D_OUT)
        err = float(jnp.max(jnp.abs(out - ref)))
        assert jnp.allclose(out, ref, atol=5e-2, rtol=5e-2), err

    print("KERNEL_OK")
</pallas_src>

<mosaic_0001>
module attributes {stable_mosaic.version = 11 : i64} {
  func.func @kernel(%arg0: i32, %arg1: memref<128x128xbf16, #tpu.memory_space<vmem>>, %arg2: memref<128x256xbf16, #tpu.memory_space<vmem>>, %arg3: memref<1x256xf32, #tpu.memory_space<vmem>>, %arg4: memref<1x256xf32, #tpu.memory_space<vmem>>, %arg5: memref<1x256xf32, #tpu.memory_space<vmem>>, %arg6: memref<256x128xbf16, #tpu.memory_space<vmem>>, %arg7: memref<1x128xf32, #tpu.memory_space<vmem>>, %arg8: memref<128x128xf32, #tpu.memory_space<vmem>>) attributes {dimension_semantics = [#tpu.dimension_semantics<parallel>], iteration_bounds = array<i64: 2>, scalar_prefetch = 0 : i64, scratch_operands = 0 : i64, tpu.core_type = #tpu.core_type<tc>, window_params = [{transform_indices = @transform_0, window_bounds = array<i64: 128, 128>}, {pipeline_mode = #tpu.pipeline_mode<synchronous>, transform_indices = @transform_1, window_bounds = array<i64: 128, 256>}, {pipeline_mode = #tpu.pipeline_mode<synchronous>, transform_indices = @transform_2, window_bounds = array<i64: 1, 256>}, {pipeline_mode = #tpu.pipeline_mode<synchronous>, transform_indices = @transform_3, window_bounds = array<i64: 1, 256>}, {pipeline_mode = #tpu.pipeline_mode<synchronous>, transform_indices = @transform_4, window_bounds = array<i64: 1, 256>}, {pipeline_mode = #tpu.pipeline_mode<synchronous>, transform_indices = @transform_5, window_bounds = array<i64: 256, 128>}, {pipeline_mode = #tpu.pipeline_mode<synchronous>, transform_indices = @transform_6, window_bounds = array<i64: 1, 128>}, {transform_indices = @transform_7, window_bounds = array<i64: 128, 128>}]} {
    %c0 = arith.constant 0 : index
    %c0_0 = arith.constant 0 : index
    %0 = vector.load %arg1[%c0, %c0_0] : memref<128x128xbf16, #tpu.memory_space<vmem>>, vector<128x128xbf16>
    %c0_1 = arith.constant 0 : index
    %c0_2 = arith.constant 0 : index
    %1 = vector.load %arg2[%c0_1, %c0_2] : memref<128x256xbf16, #tpu.memory_space<vmem>>, vector<128x256xbf16>
    %cst = arith.constant dense<0.000000e+00> : vector<128x256xf32>
    %2 = tpu.matmul %0, %1, %cst {dimension_numbers = #tpu.dot_dimension_numbers<[1], [0], [0], [1], [0, 0, 1, 1], [], []>} : vector<128x128xbf16>, vector<128x256xbf16>, vector<128x256xf32> -> vector<128x256xf32>
    %c0_3 = arith.constant 0 : index
    %c0_4 = arith.constant 0 : index
    %3 = vector.load %arg3[%c0_3, %c0_4] : memref<1x256xf32, #tpu.memory_space<vmem>>, vector<1x256xf32>
    %4 = vector.broadcast %3 : vector<1x256xf32> to vector<128x256xf32>
    %5 = arith.addf %2, %4 : vector<128x256xf32>
    %c0_5 = arith.constant 0 : index
    %c0_6 = arith.constant 0 : index
    %6 = vector.load %arg4[%c0_5, %c0_6] : memref<1x256xf32, #tpu.memory_space<vmem>>, vector<1x256xf32>
    %c0_7 = arith.constant 0 : index
    %c0_8 = arith.constant 0 : index
    %7 = vector.load %arg5[%c0_7, %c0_8] : memref<1x256xf32, #tpu.memory_space<vmem>>, vector<1x256xf32>
    %cst_9 = arith.constant dense<0.000000e+00> : vector<128xf32>
    %8 = vector.multi_reduction <add>, %5, %cst_9 [1] : vector<128x256xf32> to vector<128xf32>
    %9 = vector.shape_cast %8 : vector<128xf32> to vector<128x1xf32>
    %cst_10 = arith.constant 2.560000e+02 : f32
    %10 = vector.broadcast %cst_10 : f32 to vector<128x1xf32>
    %11 = arith.divf %9, %10 : vector<128x1xf32>
    %12 = vector.broadcast %11 : vector<128x1xf32> to vector<128x256xf32>
    %13 = arith.subf %5, %12 : vector<128x256xf32>
    %14 = arith.mulf %13, %13 : vector<128x256xf32>
    %cst_11 = arith.constant dense<0.000000e+00> : vector<128xf32>
    %15 = vector.multi_reduction <add>, %14, %cst_11 [1] : vector<128x256xf32> to vector<128xf32>
    %16 = vector.shape_cast %15 : vector<128xf32> to vector<128x1xf32>
    %cst_12 = arith.constant 2.560000e+02 : f32
    %17 = vector.broadcast %cst_12 : f32 to vector<128x1xf32>
    %18 = arith.divf %16, %17 : vector<128x1xf32>
    %cst_13 = arith.constant 9.99999974E-6 : f32
    %19 = vector.broadcast %cst_13 : f32 to vector<128x1xf32>
    %20 = arith.addf %18, %19 : vector<128x1xf32>
    %21 = math.rsqrt %20 : vector<128x1xf32>
    %22 = vector.broadcast %21 : vector<128x1xf32> to vector<128x256xf32>
    %23 = arith.mulf %13, %22 : vector<128x256xf32>
    %24 = vector.broadcast %6 : vector<1x256xf32> to vector<128x256xf32>
    %25 = arith.mulf %23, %24 : vector<128x256xf32>
    %26 = vector.broadcast %7 : vector<1x256xf32> to vector<128x256xf32>
    %27 = arith.addf %25, %26 : vector<128x256xf32>
    %28 = arith.mulf %27, %27 : vector<128x256xf32>
    %cst_14 = arith.constant 5.000000e-01 : f32
    %29 = vector.broadcast %cst_14 : f32 to vector<128x256xf32>
    %30 = arith.mulf %29, %27 : vector<128x256xf32>
    %cst_15 = arith.constant 0.0356774069 : f32
    %31 = vector.broadcast %cst_15 : f32 to vector<128x256xf32>
    %32 = arith.mulf %31, %28 : vector<128x256xf32>
    %cst_16 = arith.constant 0.797884583 : f32
    %33 = vector.broadcast %cst_16 : f32 to vector<128x256xf32>
    %34 = arith.addf %33, %32 : vector<128x256xf32>
    %35 = arith.mulf %27, %34 : vector<128x256xf32>
    %36 = math.tanh %35 : vector<128x256xf32>
    %cst_17 = arith.constant 1.000000e+00 : f32
    %37 = vector.broadcast %cst_17 : f32 to vector<128x256xf32>
    %38 = arith.addf %37, %36 : vector<128x256xf32>
    %39 = arith.mulf %30, %38 : vector<128x256xf32>
    %40 = arith.truncf %39 : vector<128x256xf32> to vector<128x256xbf16>
    %c0_18 = arith.constant 0 : index
    %c0_19 = arith.constant 0 : index
    %41 = vector.load %arg6[%c0_18, %c0_19] : memref<256x128xbf16, #tpu.memory_space<vmem>>, vector<256x128xbf16>
    %cst_20 = arith.constant dense<0.000000e+00> : vector<128x128xf32>
    %42 = tpu.matmul %40, %41, %cst_20 {dimension_numbers = #tpu.dot_dimension_numbers<[1], [0], [0], [1], [0, 0, 1, 1], [], []>} : vector<128x256xbf16>, vector<256x128xbf16>, vector<128x128xf32> -> vector<128x128xf32>
    %c0_21 = arith.constant 0 : index
    %c0_22 = arith.constant 0 : index
    %43 = vector.load %arg7[%c0_21, %c0_22] : memref<1x128xf32, #tpu.memory_space<vmem>>, vector<1x128xf32>
    %44 = vector.broadcast %43 : vector<1x128xf32> to vector<128x128xf32>
    %45 = arith.addf %42, %44 : vector<128x128xf32>
    %c0_23 = arith.constant 0 : index
    %c0_24 = arith.constant 0 : index
    %46 = vector.load %arg8[%c0_23, %c0_24] : memref<128x128xf32, #tpu.memory_space<vmem>>, vector<128x128xf32>
    tpu.vector_store %arg8[%c0_23, %c0_24], %45 {strides = array<i32>} : memref<128x128xf32, #tpu.memory_space<vmem>>, vector<128x128xf32>,
    return
  }
  func.func @transform_0(%arg0: i32) -> (i32, i32) {
    %c0_i32 = arith.constant 0 : i32
    %c0_i32_0 = arith.constant 0 : i32
    return %arg0, %c0_i32 : i32, i32
  }
  func.func @transform_1(%arg0: i32) -> (i32, i32) {
    %c0_i32 = arith.constant 0 : i32
    %c0_i32_0 = arith.constant 0 : i32
    %c0_i32_1 = arith.constant 0 : i32
    return %c0_i32, %c0_i32_0 : i32, i32
  }
  func.func @transform_2(%arg0: i32) -> (i32, i32) {
    %c0_i32 = arith.constant 0 : i32
    %c0_i32_0 = arith.constant 0 : i32
    %c0_i32_1 = arith.constant 0 : i32
    return %c0_i32, %c0_i32_0 : i32, i32
  }
  func.func @transform_3(%arg0: i32) -> (i32, i32) {
    %c0_i32 = arith.constant 0 : i32
    %c0_i32_0 = arith.constant 0 : i32
    %c0_i32_1 = arith.constant 0 : i32
    return %c0_i32, %c0_i32_0 : i32, i32
  }
  func.func @transform_4(%arg0: i32) -> (i32, i32) {
    %c0_i32 = arith.constant 0 : i32
    %c0_i32_0 = arith.constant 0 : i32
    %c0_i32_1 = arith.constant 0 : i32
    return %c0_i32, %c0_i32_0 : i32, i32
  }
  func.func @transform_5(%arg0: i32) -> (i32, i32) {
    %c0_i32 = arith.constant 0 : i32
    %c0_i32_0 = arith.constant 0 : i32
    %c0_i32_1 = arith.constant 0 : i32
    return %c0_i32, %c0_i32_0 : i32, i32
  }
  func.func @transform_6(%arg0: i32) -> (i32, i32) {
    %c0_i32 = arith.constant 0 : i32
    %c0_i32_0 = arith.constant 0 : i32
    %c0_i32_1 = arith.constant 0 : i32
    return %c0_i32, %c0_i32_0 : i32, i32
  }
  func.func @transform_7(%arg0: i32) -> (i32, i32) {
    %c0_i32 = arith.constant 0 : i32
    %c0_i32_0 = arith.constant 0 : i32
    return %arg0, %c0_i32 : i32, i32
  }
}

module attributes {stable_mosaic.version = 11 : i64} {
  func.func @kernel(%arg0: i32, %arg1: memref<128x128xbf16, #tpu.memory_space<vmem>>, %arg2: memref<128x256xbf16, #tpu.memory_space<vmem>>, %arg3: memref<1x256xf32, #tpu.memory_space<vmem>>, %arg4: memref<1x256xf32, #tpu.memory_space<vmem>>, %arg5: memref<1x256xf32, #tpu.memory_space<vmem>>, %arg6: memref<256x128xbf16, #tpu.memory_space<vmem>>, %arg7: memref<1x128xf32, #tpu.memory_space<vmem>>, %arg8: memref<128x128xf32, #tpu.memory_space<vmem>>) attributes {dimension_semantics = [#tpu.dimension_semantics<parallel>], iteration_bounds = array<i64: 2>, scalar_prefetch = 0 : i64, scratch_operands = 0 : i64, tpu.core_type = #tpu.core_type<tc>, window_params = [{transform_indices = @transform_0, window_bounds = array<i64: 128, 128>}, {pipeline_mode = #tpu.pipeline_mode<synchronous>, transform_indices = @transform_1, window_bounds = array<i64: 128, 256>}, {pipeline_mode = #tpu.pipeline_mode<synchronous>, transform_indices = @transform_2, window_bounds = array<i64: 1, 256>}, {pipeline_mode = #tpu.pipeline_mode<synchronous>, transform_indices = @transform_3, window_bounds = array<i64: 1, 256>}, {pipeline_mode = #tpu.pipeline_mode<synchronous>, transform_indices = @transform_4, window_bounds = array<i64: 1, 256>}, {pipeline_mode = #tpu.pipeline_mode<synchronous>, transform_indices = @transform_5, window_bounds = array<i64: 256, 128>}, {pipeline_mode = #tpu.pipeline_mode<synchronous>, transform_indices = @transform_6, window_bounds = array<i64: 1, 128>}, {transform_indices = @transform_7, window_bounds = array<i64: 128, 128>}]} {
    %c0 = arith.constant 0 : index
    %c0_0 = arith.constant 0 : index
    %0 = vector.load %arg1[%c0, %c0_0] : memref<128x128xbf16, #tpu.memory_space<vmem>>, vector<128x128xbf16>
    %c0_1 = arith.constant 0 : index
    %c0_2 = arith.constant 0 : index
    %1 = vector.load %arg2[%c0_1, %c0_2] : memref<128x256xbf16, #tpu.memory_space<vmem>>, vector<128x256xbf16>
    %cst = arith.constant dense<0.000000e+00> : vector<128x256xf32>
    %2 = tpu.matmul %0, %1, %cst {dimension_numbers = #tpu.dot_dimension_numbers<[1], [0], [0], [1], [0, 0, 1, 1], [], []>} : vector<128x128xbf16>, vector<128x256xbf16>, vector<128x256xf32> -> vector<128x256xf32>
    %c0_3 = arith.constant 0 : index
    %c0_4 = arith.constant 0 : index
    %3 = vector.load %arg3[%c0_3, %c0_4] : memref<1x256xf32, #tpu.memory_space<vmem>>, vector<1x256xf32>
    %4 = vector.broadcast %3 : vector<1x256xf32> to vector<128x256xf32>
    %5 = arith.addf %2, %4 : vector<128x256xf32>
    %c0_5 = arith.constant 0 : index
    %c0_6 = arith.constant 0 : index
    %6 = vector.load %arg4[%c0_5, %c0_6] : memref<1x256xf32, #tpu.memory_space<vmem>>, vector<1x256xf32>
    %c0_7 = arith.constant 0 : index
    %c0_8 = arith.constant 0 : index
    %7 = vector.load %arg5[%c0_7, %c0_8] : memref<1x256xf32, #tpu.memory_space<vmem>>, vector<1x256xf32>
    %cst_9 = arith.constant dense<0.000000e+00> : vector<128xf32>
    %8 = vector.multi_reduction <add>, %5, %cst_9 [1] : vector<128x256xf32> to vector<128xf32>
    %9 = vector.shape_cast %8 : vector<128xf32> to vector<128x1xf32>
    %cst_10 = arith.constant 2.560000e+02 : f32
    %10 = vector.broadcast %cst_10 : f32 to vector<128x1xf32>
    %11 = arith.divf %9, %10 : vector<128x1xf32>
    %12 = vector.broadcast %11 : vector<128x1xf32> to vector<128x256xf32>
    %13 = arith.subf %5, %12 : vector<128x256xf32>
    %14 = arith.mulf %13, %13 : vector<128x256xf32>
    %cst_11 = arith.constant dense<0.000000e+00> : vector<128xf32>
    %15 = vector.multi_reduction <add>, %14, %cst_11 [1] : vector<128x256xf32> to vector<128xf32>
    %16 = vector.shape_cast %15 : vector<128xf32> to vector<128x1xf32>
    %cst_12 = arith.constant 2.560000e+02 : f32
    %17 = vector.broadcast %cst_12 : f32 to vector<128x1xf32>
    %18 = arith.divf %16, %17 : vector<128x1xf32>
    %cst_13 = arith.constant 9.99999974E-6 : f32
    %19 = vector.broadcast %cst_13 : f32 to vector<128x1xf32>
    %20 = arith.addf %18, %19 : vector<128x1xf32>
    %21 = math.rsqrt %20 : vector<128x1xf32>
    %22 = vector.broadcast %21 : vector<128x1xf32> to vector<128x256xf32>
    %23 = arith.mulf %13, %22 : vector<128x256xf32>
    %24 = vector.broadcast %6 : vector<1x256xf32> to vector<128x256xf32>
    %25 = arith.mulf %23, %24 : vector<128x256xf32>
    %26 = vector.broadcast %7 : vector<1x256xf32> to vector<128x256xf32>
    %27 = arith.addf %25, %26 : vector<128x256xf32>
    %28 = arith.mulf %27, %27 : vector<128x256xf32>
    %cst_14 = arith.constant 5.000000e-01 : f32
    %29 = vector.broadcast %cst_14 : f32 to vector<128x256xf32>
    %30 = arith.mulf %29, %27 : vector<128x256xf32>
    %cst_15 = arith.constant 0.0356774069 : f32
    %31 = vector.broadcast %cst_15 : f32 to vector<128x256xf32>
    %32 = arith.mulf %31, %28 : vector<128x256xf32>
    %cst_16 = arith.constant 0.797884583 : f32
    %33 = vector.broadcast %cst_16 : f32 to vector<128x256xf32>
    %34 = arith.addf %33, %32 : vector<128x256xf32>
    %35 = arith.mulf %27, %34 : vector<128x256xf32>
    %36 = math.tanh %35 : vector<128x256xf32>
    %cst_17 = arith.constant 1.000000e+00 : f32
    %37 = vector.broadcast %cst_17 : f32 to vector<128x256xf32>
    %38 = arith.addf %37, %36 : vector<128x256xf32>
    %39 = arith.mulf %30, %38 : vector<128x256xf32>
    %40 = arith.truncf %39 : vector<128x256xf32> to vector<128x256xbf16>
    %c0_18 = arith.constant 0 : index
    %c0_19 = arith.constant 0 : index
    %41 = vector.load %arg6[%c0_18, %c0_19] : memref<256x128xbf16, #tpu.memory_space<vmem>>, vector<256x128xbf16>
    %cst_20 = arith.constant dense<0.000000e+00> : vector<128x128xf32>
    %42 = tpu.matmul %40, %41, %cst_20 {dimension_numbers = #tpu.dot_dimension_numbers<[1], [0], [0], [1], [0, 0, 1, 1], [], []>} : vector<128x256xbf16>, vector<256x128xbf16>, vector<128x128xf32> -> vector<128x128xf32>
    %c0_21 = arith.constant 0 : index
    %c0_22 = arith.constant 0 : index
    %43 = vector.load %arg7[%c0_21, %c0_22] : memref<1x128xf32, #tpu.memory_space<vmem>>, vector<1x128xf32>
    %44 = vector.broadcast %43 : vector<1x128xf32> to vector<128x128xf32>
    %45 = arith.addf %42, %44 : vector<128x128xf32>
    %c0_23 = arith.constant 0 : index
    %c0_24 = arith.constant 0 : index
    %46 = vector.load %arg8[%c0_23, %c0_24] : memref<128x128xf32, #tpu.memory_space<vmem>>, vector<128x128xf32>
    tpu.vector_store %arg8[%c0_23, %c0_24], %45 {strides = array<i32>} : memref<128x128xf32, #tpu.memory_space<vmem>>, vector<128x128xf32>,
    return
  }
  func.func @transform_0(%arg0: i32) -> (i32, i32) {
    %c0_i32 = arith.constant 0 : i32
    %c0_i32_0 = arith.constant 0 : i32
    return %arg0, %c0_i32 : i32, i32
  }
  func.func @transform_1(%arg0: i32) -> (i32, i32) {
    %c0_i32 = arith.constant 0 : i32
    %c0_i32_0 = arith.constant 0 : i32
    %c0_i32_1 = arith.constant 0 : i32
    return %c0_i32, %c0_i32_0 : i32, i32
  }
  func.func @transform_2(%arg0: i32) -> (i32, i32) {
    %c0_i32 = arith.constant 0 : i32
    %c0_i32_0 = arith.constant 0 : i32
    %c0_i32_1 = arith.constant 0 : i32
    return %c0_i32, %c0_i32_0 : i32, i32
  }
  func.func @transform_3(%arg0: i32) -> (i32, i32) {
    %c0_i32 = arith.constant 0 : i32
    %c0_i32_0 = arith.constant 0 : i32
    %c0_i32_1 = arith.constant 0 : i32
    return %c0_i32, %c0_i32_0 : i32, i32
  }
  func.func @transform_4(%arg0: i32) -> (i32, i32) {
    %c0_i32 = arith.constant 0 : i32
    %c0_i32_0 = arith.constant 0 : i32
    %c0_i32_1 = arith.constant 0 : i32
    return %c0_i32, %c0_i32_0 : i32, i32
  }
  func.func @transform_5(%arg0: i32) -> (i32, i32) {
    %c0_i32 = arith.constant 0 : i32
    %c0_i32_0 = arith.constant 0 : i32
    %c0_i32_1 = arith.constant 0 : i32
    return %c0_i32, %c0_i32_0 : i32, i32
  }
  func.func @transform_6(%arg0: i32) -> (i32, i32) {
    %c0_i32 = arith.constant 0 : i32
    %c0_i32_0 = arith.constant 0 : i32
    %c0_i32_1 = arith.constant 0 : i32
    return %c0_i32, %c0_i32_0 : i32, i32
  }
  func.func @transform_7(%arg0: i32) -> (i32, i32) {
    %c0_i32 = arith.constant 0 : i32
    %c0_i32_0 = arith.constant 0 : i32
    return %arg0, %c0_i32 : i32, i32
  }
}

</mosaic_0001>

<bundles_post_ra>
// kernel: tpu_custom_call.1
= control target key start
LH: loop header
LB: loop body
LE: loop exit
PB: predicated region body
PF: predicated region fallthrough
CT: control target
= control target key end

     0   :  { %12 = vsyncpa [#allocation3], 0  ;;  %s3020_s0 = inlined_call_operand.hbm [shape: bf16[256,128], index: 0, kind: input, shape index: {}]   ;;  %s3021_s1 = inlined_call_operand.hbm [shape: bf16[128,256], index: 1, kind: input, shape index: {}]   ;;  %s3022_s2 = inlined_call_operand.vmem [shape: f32[1,256], index: 2, kind: input, shape index: {}]   ;;  %s3023_s3 = inlined_call_operand.vmem [shape: f32[1,256], index: 3, kind: input, shape index: {}]   ;;  %s3024_s4 = inlined_call_operand.vmem [shape: f32[1,256], index: 4, kind: input, shape index: {}]   ;;  %s3025_s5 = inlined_call_operand.hbm [shape: bf16[256,128], index: 5, kind: input, shape index: {}]   ;;  %s3026_s6 = inlined_call_operand.vmem [shape: f32[1,128], index: 6, kind: input, shape index: {}]   ;;  %s3027_s7 = inlined_call_operand.hbm [shape: f32[256,128], index: 7, kind: output, shape index: {}]  }
   0x1   :  { %14 = vsyncpa [#allocation3 + $0x1], 0 }
   0x2   :  { %15 = vsyncpa [#allocation6], 0 }
   0x3   :  { %16 = vsyncpa [#allocation4], 0 }
   0x4   :  { %18 = vsyncpa [#allocation4 + $0x1], 0  ;;  %s2137_s24 = smov 0   ;;  %s2139_s25 = smov 0  }
   0x5   :  { %s2141_s26 = smov 0   ;;  %s2143_s27 = smov 0  }
   0x6 LB: > { %s2158_s28 = sadd.s32 4294967295, %s2084_s27   ;;  %s1585_s29 = sadd.s32 4294967294, %s2084_s27   ;;  %s2084_s27 = sphi %s2143_s27, %s3049_s27   ;;  %s2080_s26 = sphi %s2141_s26, %s3048_s26   ;;  %s2076_s25 = sphi %s2139_s25, %s3047_s25   ;;  %s2072_s24 = sphi %s2137_s24, %s3046_s24  }
   0x7   : > { %p44_p0 = scmp.ne.s32.totalorder %s2076_s25, %s2072_s24  ;;  %p3028_p1 = scmp.eq.s32.totalorder %s2158_s28, 0 }
   0x8   : > { %p200_p3 = scmp.eq.s32.totalorder %s1585_s29, 1  ;;  %p1586_p5 = scmp.ge.s32.totalorder %s2084_s27, 1 }
   0x9   : > { %p2167_p4 = por %p3028_p1, %p44_p0  ;;  %p207_p7 = scmp.lt.s32.totalorder %s2084_s27, 3 }
   0xa   : > { %p2172_p6 = por %p200_p3, %p44_p0  ;;  %s2086_s10 = smov [#allocation5]  }
   0xb   : > { %s3032_s30 = scalar_select %p2167_p4, 1, 0 }
   0xc   : > { %s3033_s8 = scalar_select %p2172_p6, 1, 0 }
   0xd   : > { %p2177_p8 = pnand %p1586_p5, %p207_p7  ;;  %s219_s11 = sshll.u32 %s2086_s10, 4  ;;  %s2181_s11 = int_to_ptr.vmem [resolvable:$true] %s219_s11 }
   0xe   : > { %s2087_s13 = smov [#allocation7]   ;;  %s1928_s17 = scalar_lea.hbm %s3021_s1, 2048 }
   0xf   : > { %p1722_p9 = pneg %p2177_p8  ;;  %s241_s14 = sshll.u32 %s2087_s13, 4  ;;  %s2192_s14 = int_to_ptr.vmem [resolvable:$true] %s241_s14 }
  0x10   : > { %p1929_p12 = scmp.ne.s32.totalorder %s3021_s1, %s1928_s17  ;;  %p1935_p5 = scmp.lt.u32.totalorder %s1928_s17, %s3021_s1 }
  0x11   : > { %p2188_p11 = pnand %p1722_p9, %p3028_p1 }
  0x13   : > { %p1930_p13 = pneg %p2188_p11 }
  0x15   : > { %p1931_p0 = pnand %p1930_p13, %p1929_p12 }
  0x17   : > { %p1932_p3 = pneg %p1931_p0 }
  0x19   : > { %p1937_p7 = pnand %p1935_p5, %p1932_p3 }
  0x1b   : > { %1940 = shalt.err (!%p1937_p7)
}
  0x1c   : > { %s1941_s22 = scalar_lea.vmem %s2181_s11, 2048  ;;  %p1949_p2 = scmp.lt.s32.totalorder %s2181_s11, %s2181_s11 }
  0x1d   : > { %p1942_p9 = scmp.ne.s32.totalorder %s2181_s11, %s1941_s22  ;;  %p1950_p12 = scmp.lt.s32.totalorder %s1941_s22, %s1941_s22 }
  0x1f   : > { %p1944_p10 = pnand %p1942_p9, %p1930_p13  ;;  %p1951_p0 = por %p1950_p12, %p1949_p2 }
  0x21   : > { %p1945_p1 = pneg %p1944_p10 }
  0x23   : > { %p1952_p6 = pnand %p1951_p0, %p1945_p1 }
  0x25   : > { %1955 = shalt.err (!%p1952_p6)
}
  0x26   : > { %s2088_s23 = smov 128   ;;  %s2089_s29 = smov 8  }
  0x27   : > { %1725 = dma.hbm_to_vmem [thread:$0]  (!%p2188_p11), %s3021_s1, 2048, %s2181_s11, [#allocation6], %s2088_s23, %s2088_s23, %s2089_s29  }
  0x28   : > { %s1956_s17 = scalar_lea.hbm %s3025_s5, 2048 }
  0x29   : > { %p1957_p2 = scmp.ne.s32.totalorder %s3025_s5, %s1956_s17  ;;  %p1963_p10 = scmp.lt.u32.totalorder %s1956_s17, %s3025_s5 }
  0x2b   : > { %p1959_p1 = pnand %p1957_p2, %p1930_p13 }
  0x2d   : > { %p1960_p6 = pneg %p1959_p1 }
  0x2f   : > { %p1965_p3 = pnand %p1963_p10, %p1960_p6 }
  0x31   : > { %1968 = shalt.err (!%p1965_p3)
}
  0x32   : > { %s1969_s11 = scalar_lea.vmem %s2192_s14, 2048  ;;  %p1977_p12 = scmp.lt.s32.totalorder %s2192_s14, %s2192_s14 }
  0x33   : > { %p1970_p5 = scmp.ne.s32.totalorder %s2192_s14, %s1969_s11  ;;  %p1978_p0 = scmp.lt.s32.totalorder %s1969_s11, %s1969_s11 }
  0x35   : > { %p1972_p7 = pnand %p1970_p5, %p1930_p13  ;;  %p1979_p2 = por %p1978_p0, %p1977_p12 }
  0x37   : > { %p1973_p9 = pneg %p1972_p7 }
  0x39   : > { %p1980_p1 = pnand %p1979_p2, %p1973_p9 }
  0x3b   : > { %1983 = shalt.err (!%p1980_p1)
}
  0x3c   : > { %s3029_s22 = smov 64   ;;  %s2091_s23 = smov 4  }
  0x3d   : > { %1728 = dma.hbm_to_vmem [thread:$0]  (!%p2188_p11), %s3025_s5, 2048, %s2192_s14, [#allocation6], %s3029_s22, %s3029_s22, %s2091_s23  }
  0x3e   : > { %s2250_s13 = sadd.s32 1, %s2084_s27   ;;  %s31_s16 = sadd.s32 1, %s2080_s26 }
  0x3f   : > { %s28_s15 = ssub.s32 %s2084_s27, %s2250_s13  ;;  %p38_p6 = scmp.ne.s32.totalorder %s2080_s26, %s2076_s25 }
  0x40   : > { %p29_p13 = scmp.eq.s32.totalorder %s28_s15, 0  ;;  %p39_p10 = scmp.eq.s32.totalorder %s2084_s27, 0 }
  0x41   : > { %p3036_p5 = scmp.eq.s32.totalorder %s2158_s28, 1  ;;  %p1739_p9 = scmp.lt.s32.totalorder %s2084_s27, 2 }
  0x42   : > { %s2259_s17 = scalar_select %p29_p13, %s2080_s26, %s31_s16  }
  0x43   : > { %p40_p3 = por %p39_p10, %p38_p6  ;;  %p2263_p7 = por %p3036_p5, %p38_p6 }
  0x44   : > { %s258_s18 = sand.u32 1, %s2080_s26   ;;  %s1644_s14 = sshll.u32 %s2084_s27, 10 }
  0x45   : > { %s3037_s12 = scalar_select %p2263_p7, 1, 0 }
  0x46   : > { %s1590_s19 = sshll.u32 %s258_s18, 6  ;;  %s2273_s11 = scalar_lea.hbm %s3020_s0, %s1644_s14 }
  0x47   : > { %s262_s29 = scalar_lea.vmem [#allocation2], %s1590_s19  ;;  %p2277_p11 = pnand %p1739_p9, %p40_p3 }
  0x48   : > { %s269_s10 = sshll.u32 %s262_s29, 4  ;;  %s2281_s16 = scalar_lea.sflag [#allocation3], %s258_s18  ;;  %s2275_s10 = int_to_ptr.vmem [resolvable:$true] %s269_s10 }
  0x49   : > { %s1984_s22 = scalar_lea.hbm %s2273_s11, 1024  ;;  %p1986_p0 = pneg %p2277_p11 }
  0x4a   : > { %p1985_p12 = scmp.ne.s32.totalorder %s2273_s11, %s1984_s22  ;;  %s1989_s20 = scalar_lea.hbm %s3020_s0, 2048 }
  0x4b   : > { %p1990_p13 = scmp.lt.u32.totalorder %s2273_s11, %s3020_s0  ;;  %p1991_p6 = scmp.lt.u32.totalorder %s1989_s20, %s1984_s22 }
  0x4c   : > { %p1987_p2 = pnand %p1986_p0, %p1985_p12  ;;  %p1993_p3 = scmp.lt.u32.totalorder %s1984_s22, %s2273_s11 }
  0x4d   : > { %p1992_p10 = por %p1991_p6, %p1990_p13 }
  0x4e   : > { %p1988_p1 = pneg %p1987_p2 }
  0x4f   : > { %p1994_p5 = por %p1993_p3, %p1992_p10 }
  0x51   : > { %p1995_p9 = pnand %p1994_p5, %p1988_p1 }
  0x53   : > { %1998 = shalt.err (!%p1995_p9)
}
  0x54   : > { %s1999_s18 = scalar_lea.vmem %s2275_s10, 1024  ;;  %s2092_s19 = smov [#allocation2]  }
  0x55   : > { %p2000_p12 = scmp.ne.s32.totalorder %s2275_s10, %s1999_s18  ;;  %s2004_s14 = sshll.u32 %s2092_s19, 4  ;;  %s2005_s14 = int_to_ptr.vmem [resolvable:$false] %s2004_s14 }
  0x56   : > { %s2006_s21 = scalar_lea.vmem %s2005_s14, 2048  ;;  %p2007_p4 = scmp.lt.s32.totalorder %s2275_s10, %s2005_s14 }
  0x57   : > { %p2002_p2 = pnand %p2000_p12, %p1986_p0  ;;  %p2008_p13 = scmp.lt.s32.totalorder %s2006_s21, %s1999_s18 }
  0x59   : > { %p2003_p7 = pneg %p2002_p2  ;;  %p2009_p6 = por %p2008_p13, %p2007_p4 }
  0x5b   : > { %p2010_p10 = pnand %p2009_p6, %p2003_p7 }
  0x5d   : > { %2013 = shalt.err (!%p2010_p10)
}
  0x5e   : > { %s3039_s22 = smov 64   ;;  %281 = sbr.rel (%p2177_p8) target bundleno = 1015 (0x3f7), region = 48 }
  0x5f   : > { %1732 = dma.hbm_to_vmem [thread:$0]  (!%p2277_p11), %s2273_s11, 1024, %s2275_s10, %s2281_s16, %s3039_s22, %s3039_s22, %s2091_s23  }
  0x60   : > { %s2315_s20 = sand.u32 (!%p2177_p8), 1, %s2076_s25   ;;  %p3040_p4 = scmp.ne.s32.totalorder (!%p2177_p8), %s3032_s30, 0 }
  0x61   : > { %s1594_s29 = sshll.u32 (!%p2177_p8), %s2315_s20, 6  ;;  %s284_s18 = scalar_lea.sflag (!%p2177_p8), [#allocation3], %s2315_s20 }
  0x62   : > { %s2319_s19 = scalar_lea.vmem (!%p2177_p8), [#allocation2], %s1594_s29 }
  0x65   : > { %2059 = dma.done.wait (%p3040_p4), %s284_s18, 1024  }
  0x66   : > { %2061 = vsyncadd (%p3040_p4), %s284_s18, 4294966272  ;;  %p3041_p7 = scmp.eq.s32.totalorder %s2158_s28, 0 }
  0x68   : > { %2063 = dma.done.wait (%p3041_p7), [#allocation6], 4096   ;;  %p3042_p8 = pmov %p3041_p7 }
  0x69   : > { %v2093_v0 = vmov 0   ;;  %v1784_v1 = vld [vmem:[#allocation5 + $0x4] ss:$8 sps:$4 sm:$0xff]   ;;  %v1786_v2 = vld [vmem:[#allocation5] ss:$8 sps:$4 sm:$0xff]   ;;  %v1810_v19 = vld [vmem:[%s2319_s19 + $0x10] sm:$0xff]   ;;  %v363_v25 = vlaneseq }
  0x6a   : > { %2065 = vsyncadd (%p3042_p8), [#allocation6], 4294963200  ;;  %533 = vmatprep.mubr.bf16.mxu0 %v2093_v0  ;;  %501 = vmatprep.subr.bf16.mxu0 %v1784_v1  ;;  %v1787_v3 = vld [vmem:[#allocation5 + $0x14] ss:$8 sps:$4 sm:$0xff]   ;;  %v1789_v4 = vld [vmem:[#allocation5 + $0x10] ss:$8 sps:$4 sm:$0xff]  }
  0x6b   : > { %502 = vmatpush1.bf16.msra.mxu0 %v1786_v2  ;;  %v1790_v5 = vld [vmem:[#allocation5 + $0x24] ss:$8 sps:$4 sm:$0xff]   ;;  %v1792_v6 = vld [vmem:[#allocation5 + $0x20] ss:$8 sps:$4 sm:$0xff]   ;;  %v1793_v7 = vld [vmem:[#allocation5 + $0x34] ss:$8 sps:$4 sm:$0xff]  }
  0x6c   : > { %503 = vmatprep.subr.bf16.mxu0 %v1787_v3  ;;  %v1795_v8 = vld [vmem:[#allocation5 + $0x30] ss:$8 sps:$4 sm:$0xff]   ;;  %v1796_v9 = vld [vmem:[#allocation5 + $0x44] ss:$8 sps:$4 sm:$0xff]   ;;  %v1798_v10 = vld [vmem:[#allocation5 + $0x40] ss:$8 sps:$4 sm:$0xff]  }
  0x6d   : > { %v1799_v11 = vld [vmem:[#allocation5 + $0x54] ss:$8 sps:$4 sm:$0xff]   ;;  %v1801_v12 = vld [vmem:[#allocation5 + $0x50] ss:$8 sps:$4 sm:$0xff]   ;;  %v1802_v13 = vld [vmem:[#allocation5 + $0x64] ss:$8 sps:$4 sm:$0xff]  }
  0x6e   : > { %v1804_v14 = vld [vmem:[#allocation5 + $0x60] ss:$8 sps:$4 sm:$0xff]   ;;  %v1805_v15 = vld [vmem:[#allocation5 + $0x74] ss:$8 sps:$4 sm:$0xff]   ;;  %v1807_v16 = vld [vmem:[#allocation5 + $0x70] ss:$8 sps:$4 sm:$0xff]  }
  0x6f   : > { %504 = vmatpush1.bf16.msra.mxu0 %v1789_v4  ;;  %v1808_v17 = vld [vmem:[%s2319_s19] sm:$0xff]   ;;  %v1809_v18 = vld [vmem:[%s2319_s19 + $0x8] sm:$0xff]   ;;  %v1811_v20 = vld [vmem:[%s2319_s19 + $0x18] sm:$0xff]   ;;  %v364_v26 = vshrl.u32 %v363_v25, 7  ;;  %s1597_s16 = sshll.u32 %s2315_s20, 7  ;;  %s1645_s29 = sshll.u32 %s2158_s28, 11 }
  0x70   : > { %505 = vmatprep.subr.bf16.mxu0 %v1790_v5  ;;  %v1812_v21 = vld [vmem:[%s2319_s19 + $0x20] sm:$0xff]   ;;  %v1813_v22 = vld [vmem:[%s2319_s19 + $0x28] sm:$0xff]   ;;  %v1814_v23 = vld [vmem:[%s2319_s19 + $0x30] sm:$0xff]   ;;  %s2936_s22 = scalar_lea.vmem [#allocation8], %s1597_s16  ;;  %s2971_s9 = scalar_lea.hbm %s3027_s7, %s1645_s29 }
  0x71   : > { %v1815_v24 = vld [vmem:[%s2319_s19 + $0x38] sm:$0xff]   ;;  %v2337_v27 = vsub.s32 0, %v364_v26  ;;  %v361_v28 = vld [vmem:[%s3022_s2] sm:$0x3]  ;;  %v2342_v29 = vsub.s32 1, %v364_v26  ;;  %s1493_s18 = sshll.u32 %s2936_s22, 4  ;;  %s2973_s18 = int_to_ptr.vmem [resolvable:$true] %s1493_s18 }
  0x72   : > { %s1480_s28 = scalar_lea.sflag [#allocation4], %s2315_s20  ;;  %s2014_s23 = scalar_lea.vmem %s2973_s18, 2048 }
  0x73   : > { %506 = vmatpush1.bf16.msra.mxu0 %v1792_v6  ;;  %v2345_v30 = vrot.slane %v361_v28, %v2337_v27  ;;  %v2348_v31 = vrot.slane %v361_v28, %v2342_v29  ;;  %p2015_p11 = scmp.ne.s32.totalorder %s2973_s18, %s2014_s23  ;;  %p3043_p0 = scmp.ne.s32.totalorder %s3037_s12, 0 }
  0x74   : > { %507 = vmatprep.subr.bf16.mxu0 %v1793_v7  ;;  %s2094_s11 = smov [#allocation8]  }
  0x75   : > { %p2016_p1 = pnand %p2015_p11, %p3043_p0  ;;  %s2018_s10 = sshll.u32 %s2094_s11, 4  ;;  %s2019_s10 = int_to_ptr.vmem [resolvable:$false] %s2018_s10 }
  0x76   : > { %s2020_s15 = scalar_lea.vmem %s2019_s10, 4096  ;;  %p2021_p5 = scmp.lt.s32.totalorder %s2973_s18, %s2019_s10 }
  0x77   : > { %508 = vmatpush1.bf16.msra.mxu0 %v1795_v8  ;;  %p2017_p3 = pneg %p2016_p1  ;;  %p2022_p9 = scmp.lt.s32.totalorder %s2020_s15, %s2014_s23 }
  0x78   : > { %509 = vmatprep.subr.bf16.mxu0 %v1796_v9 }
  0x79   : > { %p2023_p12 = por %p2022_p9, %p2021_p5 }
  0x7b   : > { %510 = vmatpush1.bf16.msra.mxu0 %v1798_v10  ;;  %p2024_p2 = pnand %p2023_p12, %p2017_p3 }
  0x7c   : > { %511 = vmatprep.subr.bf16.mxu0 %v1799_v11 }
  0x7f   : > { %512 = vmatpush1.bf16.msra.mxu0 %v1801_v12 }
  0x80   : > { %513 = vmatprep.subr.bf16.mxu0 %v1802_v13 }
  0x83   : > { %514 = vmatpush1.bf16.msra.mxu0 %v1804_v14 }
  0x84   : > { %515 = vmatprep.subr.bf16.mxu0 %v1805_v15 }
  0x87   : > { %516 = vmatpush1.bf16.msra.mxu0 %v1807_v16 }
  0x8a   : > { %534 = vmatmul.mubr.bf16.vlgmr.msra.gmra.mrb[0].mxu0 %v1808_v17 }
  0x8b   : > { %543 = vmatprep.mubr.bf16.mxu0 %v2093_v0 }
  0x92   : > { %544 = vmatmul.mubr.bf16.gmra.mrb[4].mxu0 %v1809_v18 }
  0x93   : > { %553 = vmatprep.mubr.bf16.mxu0 %v2093_v0 }
  0x9a   : > { %554 = vmatmul.mubr.bf16.gmra.mrb[8].mxu0 %v1810_v19 }
  0x9b   : > { %563 = vmatprep.mubr.bf16.mxu0 %v2093_v0 }
  0xa2   : > { %564 = vmatmul.mubr.bf16.gmra.mrb[12].mxu0 %v1811_v20 }
  0xa3   : > { %573 = vmatprep.mubr.bf16.mxu0 %v2093_v0 }
  0xaa   : > { %574 = vmatmul.mubr.bf16.gmra.mrb[16].mxu0 %v1812_v21 }
  0xab   : > { %583 = vmatprep.mubr.bf16.mxu0 %v2093_v0 }
  0xb2   : > { %584 = vmatmul.mubr.bf16.gmra.mrb[20].mxu0 %v1813_v22 }
  0xb3   : > { %593 = vmatprep.mubr.bf16.mxu0 %v2093_v0 }
  0xba   : > { %594 = vmatmul.mubr.bf16.gmra.mrb[24].mxu0 %v1814_v23 }
  0xbb   : > { %603 = vmatprep.mubr.bf16.mxu0 %v2093_v0 }
  0xc2   : > { %604 = vmatmul.mubr.bf16.gmra.mrb[28].mxu0 %v1815_v24 }
 0x15d   : > { %v535_v32 = vpop.f32.mrb[0].mxu0 }
 0x15e   : > { %v2351_v33 = vadd.f32 %v535_v32, %v2345_v30  ;;  %v537_v34 = vpop.f32.mrb[1].mxu0 }
 0x15f   : > { %v2354_v35 = vadd.f32 %v537_v34, %v2348_v31  ;;  %v539_v36 = vpop.f32.mrb[2].mxu0 }
 0x160   : > { %v541_v37 = vpop.f32.mrb[3].mxu0  ;;  %v2357_v38 = vadd.f32 %v539_v36, %v2345_v30 }
 0x161   : > { %v2360_v39 = vadd.f32 %v541_v37, %v2348_v31  ;;  %v616_v40 = vadd.f32 %v2354_v35, %v2351_v33 }
 0x163   : > { %617 = vadd.xlane.f32.xlu0 %v616_v40  ;;  %v619_v42 = vadd.f32 %v2360_v39, %v2357_v38 }
 0x165   : > { %v545_v41 = vpop.f32.mrb[4].mxu0 }
 0x166   : > { %v2367_v43 = vadd.f32 %v545_v41, %v2345_v30  ;;  %v547_v44 = vpop.f32.mrb[5].mxu0 }
 0x167   : > { %v2370_v45 = vadd.f32 %v547_v44, %v2348_v31  ;;  %v549_v46 = vpop.f32.mrb[6].mxu0  ;;  %620 = vadd.xlane.f32.xlu0 %v619_v42 }
 0x168   : > { %v551_v47 = vpop.f32.mrb[7].mxu0  ;;  %v2373_v48 = vadd.f32 %v549_v46, %v2345_v30 }
 0x169   : > { %v2376_v49 = vadd.f32 %v551_v47, %v2348_v31  ;;  %v622_v50 = vadd.f32 %v2370_v45, %v2367_v43 }
 0x16b   : > { %623 = vadd.xlane.f32.xlu1 %v622_v50  ;;  %v625_v52 = vadd.f32 %v2376_v49, %v2373_v48 }
 0x16d   : > { %v555_v51 = vpop.f32.mrb[8].mxu0 }
 0x16e   : > { %v2383_v53 = vadd.f32 %v555_v51, %v2345_v30  ;;  %v557_v54 = vpop.f32.mrb[9].mxu0 }
 0x16f   : > { %v2386_v55 = vadd.f32 %v557_v54, %v2348_v31  ;;  %v559_v56 = vpop.f32.mrb[10].mxu0  ;;  %626 = vadd.xlane.f32.xlu1 %v625_v52 }
 0x170   : > { %v2389_v57 = vadd.f32 %v559_v56, %v2345_v30  ;;  %v561_v58 = vpop.f32.mrb[11].mxu0 }
 0x171   : > { %v2392_v59 = vadd.f32 %v561_v58, %v2348_v31  ;;  %v628_v60 = vadd.f32 %v2386_v55, %v2383_v53 }
 0x173   : > { %629 = vadd.xlane.f32.xlu0 %v628_v60  ;;  %v631_v61 = vadd.f32 %v2392_v59, %v2389_v57 }
 0x175   : > { %v565_v62 = vpop.f32.mrb[12].mxu0  ;;  %632 = vadd.xlane.f32.xlu1 %v631_v61 }
 0x176   : > { %v2399_v63 = vadd.f32 %v565_v62, %v2345_v30  ;;  %v567_v0 = vpop.f32.mrb[13].mxu0 }
 0x177   : > { %v2402_v1 = vadd.f32 %v567_v0, %v2348_v31  ;;  %v569_v2 = vpop.f32.mrb[14].mxu0 }
 0x178   : > { %v2405_v3 = vadd.f32 %v569_v2, %v2345_v30  ;;  %v571_v4 = vpop.f32.mrb[15].mxu0 }
 0x179   : > { %v2408_v5 = vadd.f32 %v571_v4, %v2348_v31  ;;  %v634_v6 = vadd.f32 %v2402_v1, %v2399_v63 }
 0x17b   : > { %635 = vadd.xlane.f32.xlu0 %v634_v6  ;;  %v637_v7 = vadd.f32 %v2408_v5, %v2405_v3 }
 0x17d   : > { %v575_v8 = vpop.f32.mrb[16].mxu0  ;;  %638 = vadd.xlane.f32.xlu1 %v637_v7 }
 0x17e   : > { %v2415_v9 = vadd.f32 %v575_v8, %v2345_v30  ;;  %v577_v10 = vpop.f32.mrb[17].mxu0 }
 0x17f   : > { %v2418_v11 = vadd.f32 %v577_v10, %v2348_v31  ;;  %v579_v12 = vpop.f32.mrb[18].mxu0 }
 0x180   : > { %v2421_v13 = vadd.f32 %v579_v12, %v2345_v30  ;;  %v581_v14 = vpop.f32.mrb[19].mxu0 }
 0x181   : > { %v2424_v15 = vadd.f32 %v581_v14, %v2348_v31  ;;  %v640_v16 = vadd.f32 %v2418_v11, %v2415_v9 }
 0x183   : > { %641 = vadd.xlane.f32.xlu0 %v640_v16  ;;  %v643_v17 = vadd.f32 %v2424_v15, %v2421_v13 }
 0x185   : > { %v585_v18 = vpop.f32.mrb[20].mxu0  ;;  %644 = vadd.xlane.f32.xlu1 %v643_v17 }
 0x186   : > { %v2431_v19 = vadd.f32 %v585_v18, %v2345_v30  ;;  %v587_v20 = vpop.f32.mrb[21].mxu0 }
 0x187   : > { %v2434_v21 = vadd.f32 %v587_v20, %v2348_v31  ;;  %v589_v22 = vpop.f32.mrb[22].mxu0 }
 0x188   : > { %v2437_v23 = vadd.f32 %v589_v22, %v2345_v30  ;;  %v591_v24 = vpop.f32.mrb[23].mxu0 }
 0x189   : > { %v2440_v25 = vadd.f32 %v591_v24, %v2348_v31  ;;  %v646_v26 = vadd.f32 %v2434_v21, %v2431_v19 }
 0x18b   : > { %647 = vadd.xlane.f32.xlu0 %v646_v26  ;;  %v649_v28 = vadd.f32 %v2440_v25, %v2437_v23 }
 0x18d   : > { %v595_v32 = vpop.f32.mrb[24].mxu0  ;;  %650 = vadd.xlane.f32.xlu1 %v649_v28 }
 0x18e   : > { %v2447_v34 = vadd.f32 %v595_v32, %v2345_v30  ;;  %v597_v36 = vpop.f32.mrb[25].mxu0 }
 0x18f   : > { %v2450_v37 = vadd.f32 %v597_v36, %v2348_v31  ;;  %v599_v40 = vpop.f32.mrb[26].mxu0 }
 0x190   : > { %v2453_v41 = vadd.f32 %v599_v40, %v2345_v30  ;;  %v601_v42 = vpop.f32.mrb[27].mxu0 }
 0x191   : > { %v2456_v44 = vadd.f32 %v601_v42, %v2348_v31  ;;  %v652_v46 = vadd.f32 %v2450_v37, %v2447_v34 }
 0x193   : > { %653 = vadd.xlane.f32.xlu0 %v652_v46  ;;  %v655_v47 = vadd.f32 %v2456_v44, %v2453_v41 }
 0x195   : > { %v605_v50 = vpop.f32.mrb[28].mxu0  ;;  %656 = vadd.xlane.f32.xlu1 %v655_v47 }
 0x196   : > { %v2463_v51 = vadd.f32 %v605_v50, %v2345_v30  ;;  %v607_v52 = vpop.f32.mrb[29].mxu0 }
 0x197   : > { %v2466_v54 = vadd.f32 %v607_v52, %v2348_v31  ;;  %v609_v56 = vpop.f32.mrb[30].mxu0 }
 0x198   : > { %v2469_v58 = vadd.f32 %v609_v56, %v2345_v30  ;;  %v611_v60 = vpop.f32.mrb[31].mxu0 }
 0x199   : > { %v2472_v61 = vadd.f32 %v611_v60, %v2348_v31  ;;  %v658_v62 = vadd.f32 %v2466_v54, %v2463_v51 }
 0x19b   : > { %659 = vadd.xlane.f32.xlu0 %v658_v62  ;;  %v661_v0 = vadd.f32 %v2472_v61, %v2469_v58 }
 0x19d   : > { %662 = vadd.xlane.f32.xlu1 %v661_v0 }
 0x1f0   : > { %v618_v2 = vpop.xlane.xlu0 %617 }
 0x1f1   : > { %v665_v4 = vmul.f32 0.00390625, %v618_v2 }
 0x1f3   : > { %v2479_v6 = vsub.f32 %v2351_v33, %v665_v4  ;;  %v2482_v30 = vsub.f32 %v2354_v35, %v665_v4 }
 0x1f4   : > { %v621_v7 = vpop.xlane.xlu0 %620 }
 0x1f5   : > { %v666_v8 = vmul.f32 0.00390625, %v621_v7  ;;  %v713_v31 = vmul.f32 %v2479_v6, %v2479_v6  ;;  %v714_v10 = vmul.f32 %v2482_v30, %v2482_v30 }
 0x1f7   : > { %v2489_v12 = vsub.f32 %v2357_v38, %v666_v8  ;;  %v2492_v14 = vsub.f32 %v2360_v39, %v666_v8  ;;  %v745_v16 = vadd.f32 %v714_v10, %v713_v31 }
 0x1f8   : > { %v624_v33 = vpop.xlane.xlu1 %623 }
 0x1f9   : > { %v667_v17 = vmul.f32 0.00390625, %v624_v33  ;;  %746 = vadd.xlane.f32.xlu0 %v745_v16  ;;  %v715_v35 = vmul.f32 %v2489_v12, %v2489_v12  ;;  %v716_v18 = vmul.f32 %v2492_v14, %v2492_v14 }
 0x1fb   : > { %v2499_v20 = vsub.f32 %v2367_v43, %v667_v17  ;;  %v2502_v22 = vsub.f32 %v2370_v45, %v667_v17  ;;  %v748_v38 = vadd.f32 %v716_v18, %v715_v35 }
 0x1fc   : > { %v627_v24 = vpop.xlane.xlu1 %626 }
 0x1fd   : > { %v668_v39 = vmul.f32 0.00390625, %v627_v24  ;;  %749 = vadd.xlane.f32.xlu1 %v748_v38  ;;  %v717_v26 = vmul.f32 %v2499_v20, %v2499_v20  ;;  %v718_v28 = vmul.f32 %v2502_v22, %v2502_v22 }
 0x1ff   : > { %v2509_v32 = vsub.f32 %v2373_v48, %v668_v39  ;;  %v2512_v36 = vsub.f32 %v2376_v49, %v668_v39  ;;  %v751_v43 = vadd.f32 %v718_v28, %v717_v26 }
 0x200   : > { %v630_v40 = vpop.xlane.xlu0 %629 }
 0x201   : > { %v669_v45 = vmul.f32 0.00390625, %v630_v40  ;;  %752 = vadd.xlane.f32.xlu0 %v751_v43  ;;  %v719_v42 = vmul.f32 %v2509_v32, %v2509_v32  ;;  %v720_v46 = vmul.f32 %v2512_v36, %v2512_v36 }
 0x202   : > { %v633_v47 = vpop.xlane.xlu1 %632 }
 0x203   : > { %v2519_v50 = vsub.f32 %v2383_v53, %v669_v45  ;;  %v2522_v48 = vsub.f32 %v2386_v55, %v669_v45  ;;  %v670_v52 = vmul.f32 0.00390625, %v633_v47  ;;  %v754_v49 = vadd.f32 %v720_v46, %v719_v42 }
 0x205   : > { %v2525_v56 = vsub.f32 %v2389_v57, %v670_v52  ;;  %v2528_v60 = vsub.f32 %v2392_v59, %v670_v52  ;;  %755 = vadd.xlane.f32.xlu1 %v754_v49  ;;  %v721_v62 = vmul.f32 %v2519_v50, %v2519_v50  ;;  %v722_v0 = vmul.f32 %v2522_v48, %v2522_v48  ;;  %v1816_v52 = vld [vmem:[#allocation7 + $0x40] sm:$0xff]  }
 0x206   : > { %1646 = vmatprep.subr.bf16.mxu1 %v1816_v52 }
 0x207   : > { %v757_v53 = vadd.f32 %v722_v0, %v721_v62  ;;  %v723_v55 = vmul.f32 %v2525_v56, %v2525_v56  ;;  %v724_v2 = vmul.f32 %v2528_v60, %v2528_v60 }
 0x208   : > { %v636_v4 = vpop.xlane.xlu0 %635 }
 0x209   : > { %v671_v57 = vmul.f32 0.00390625, %v636_v4  ;;  %758 = vadd.xlane.f32.xlu0 %v757_v53  ;;  %v760_v7 = vadd.f32 %v724_v2, %v723_v55  ;;  %v1818_v2 = vld [vmem:[#allocation7 + $0x48] sm:$0xff]  }
 0x20a   : > { %v639_v59 = vpop.xlane.xlu1 %638 }
 0x20b   : > { %v2539_v8 = vsub.f32 %v2399_v63, %v671_v57  ;;  %v2542_v31 = vsub.f32 %v2402_v1, %v671_v57  ;;  %v672_v10 = vmul.f32 0.00390625, %v639_v59  ;;  %761 = vadd.xlane.f32.xlu1 %v760_v7  ;;  %v1819_v59 = vld [vmem:[#allocation7 + $0x8] sm:$0xff]  }
 0x20d   : > { %v2545_v16 = vsub.f32 %v2405_v3, %v672_v10  ;;  %v2548_v33 = vsub.f32 %v2408_v5, %v672_v10  ;;  %v725_v17 = vmul.f32 %v2539_v8, %v2539_v8  ;;  %v726_v35 = vmul.f32 %v2542_v31, %v2542_v31 }
 0x20f   : > { %v763_v18 = vadd.f32 %v726_v35, %v725_v17  ;;  %v727_v63 = vmul.f32 %v2545_v16, %v2545_v16  ;;  %v728_v1 = vmul.f32 %v2548_v33, %v2548_v33  ;;  %v1820_v35 = vld [vmem:[#allocation7 + $0x50] sm:$0xff]  }
 0x210   : > { %v642_v38 = vpop.xlane.xlu0 %641 }
 0x211   : > { %v673_v24 = vmul.f32 0.00390625, %v642_v38  ;;  %764 = vadd.xlane.f32.xlu0 %v763_v18  ;;  %v766_v3 = vadd.f32 %v728_v1, %v727_v63  ;;  %v1821_v63 = vld [vmem:[#allocation7 + $0x10] sm:$0xff]  }
 0x212   : > { %v645_v39 = vpop.xlane.xlu1 %644 }
 0x213   : > { %v2559_v5 = vsub.f32 %v2415_v9, %v673_v24  ;;  %v2562_v26 = vsub.f32 %v2418_v11, %v673_v24  ;;  %v674_v28 = vmul.f32 0.00390625, %v645_v39  ;;  %767 = vadd.xlane.f32.xlu1 %v766_v3  ;;  %v1822_v39 = vld [vmem:[#allocation7 + $0x58] sm:$0xff]  }
 0x215   : > { %v2565_v43 = vsub.f32 %v2421_v13, %v674_v28  ;;  %v2568_v40 = vsub.f32 %v2424_v15, %v674_v28  ;;  %v729_v45 = vmul.f32 %v2559_v5, %v2559_v5  ;;  %v730_v42 = vmul.f32 %v2562_v26, %v2562_v26  ;;  %v1817_v15 = vld [vmem:[#allocation7] sm:$0xff]  }
 0x216   : > { %1647 = vmatpush3.bf16.msra.mxu1 %v1817_v15 }
 0x217   : > { %v769_v46 = vadd.f32 %v730_v42, %v729_v45  ;;  %v731_v9 = vmul.f32 %v2565_v43, %v2565_v43  ;;  %v732_v11 = vmul.f32 %v2568_v40, %v2568_v40  ;;  %1648 = vmatprep.subr.bf16.mxu1 %v1818_v2  ;;  %v1826_v2 = vld [vmem:[#allocation7 + $0x68] sm:$0xff]  }
 0x218   : > { %v648_v47 = vpop.xlane.xlu0 %647 }
 0x219   : > { %v675_v13 = vmul.f32 0.00390625, %v648_v47  ;;  %770 = vadd.xlane.f32.xlu0 %v769_v46  ;;  %v772_v49 = vadd.f32 %v732_v11, %v731_v9  ;;  %v1823_v46 = vld [vmem:[#allocation7 + $0x18] sm:$0xff]   ;;  %v1824_v47 = vld [vmem:[#allocation7 + $0x60] sm:$0xff]  }
 0x21a   : > { %v651_v62 = vpop.xlane.xlu1 %650  ;;  %1649 = vmatpush3.bf16.msra.mxu1 %v1819_v59 }
 0x21b   : > { %v2579_v0 = vsub.f32 %v2431_v19, %v675_v13  ;;  %v2582_v53 = vsub.f32 %v2434_v21, %v675_v13  ;;  %v676_v55 = vmul.f32 0.00390625, %v651_v62  ;;  %773 = vadd.xlane.f32.xlu1 %v772_v49  ;;  %1650 = vmatprep.subr.bf16.mxu1 %v1820_v35  ;;  %v1825_v13 = vld [vmem:[#allocation7 + $0x20] sm:$0xff]   ;;  %v1830_v35 = vld [vmem:[#allocation7 + $0x78] sm:$0xff]  }
 0x21d   : > { %v2585_v4 = vsub.f32 %v2437_v23, %v676_v55  ;;  %v2588_v57 = vsub.f32 %v2440_v25, %v676_v55  ;;  %v733_v7 = vmul.f32 %v2579_v0, %v2579_v0  ;;  %v734_v19 = vmul.f32 %v2582_v53, %v2582_v53 }
 0x21e   : > { %1651 = vmatpush3.bf16.msra.mxu1 %v1821_v63 }
 0x21f   : > { %v775_v21 = vadd.f32 %v734_v19, %v733_v7  ;;  %v735_v10 = vmul.f32 %v2585_v4, %v2585_v4  ;;  %v736_v17 = vmul.f32 %v2588_v57, %v2588_v57  ;;  %1652 = vmatprep.subr.bf16.mxu1 %v1822_v39 }
 0x220   : > { %v654_v23 = vpop.xlane.xlu0 %653 }
 0x221   : > { %v677_v25 = vmul.f32 0.00390625, %v654_v23  ;;  %776 = vadd.xlane.f32.xlu0 %v775_v21  ;;  %v778_v18 = vadd.f32 %v736_v17, %v735_v10  ;;  %v1827_v21 = vld [vmem:[#allocation7 + $0x28] sm:$0xff]   ;;  %v1829_v23 = vld [vmem:[#allocation7 + $0x30] sm:$0xff]  }
 0x222   : > { %v657_v1 = vpop.xlane.xlu1 %656  ;;  %1653 = vmatpush3.bf16.msra.mxu1 %v1823_v46 }
 0x223   : > { %v2599_v38 = vsub.f32 %v2447_v34, %v677_v25  ;;  %v2602_v24 = vsub.f32 %v2450_v37, %v677_v25  ;;  %v678_v3 = vmul.f32 0.00390625, %v657_v1  ;;  %779 = vadd.xlane.f32.xlu1 %v778_v18  ;;  %1654 = vmatprep.subr.bf16.mxu1 %v1824_v47  ;;  %v1831_v25 = vld [vmem:[#allocation7 + $0x38] sm:$0xff]  }
 0x225   : > { %v2605_v28 = vsub.f32 %v2453_v41, %v678_v3  ;;  %v2608_v45 = vsub.f32 %v2456_v44, %v678_v3  ;;  %v737_v42 = vmul.f32 %v2599_v38, %v2599_v38  ;;  %v738_v34 = vmul.f32 %v2602_v24, %v2602_v24 }
 0x226   : > { %1655 = vmatpush3.bf16.msra.mxu1 %v1825_v13 }
 0x227   : > { %v781_v37 = vadd.f32 %v738_v34, %v737_v42  ;;  %v739_v9 = vmul.f32 %v2605_v28, %v2605_v28  ;;  %v740_v11 = vmul.f32 %v2608_v45, %v2608_v45  ;;  %1656 = vmatprep.subr.bf16.mxu1 %v1826_v2 }
 0x228   : > { %v660_v41 = vpop.xlane.xlu0 %659 }
 0x229   : > { %v679_v44 = vmul.f32 0.00390625, %v660_v41  ;;  %782 = vadd.xlane.f32.xlu0 %v781_v37  ;;  %v784_v52 = vadd.f32 %v740_v11, %v739_v9  ;;  %v614_v37 = vld [vmem:[%s3023_s3] sm:$0x3] }
 0x22a   : > { %v663_v49 = vpop.xlane.xlu1 %662  ;;  %1657 = vmatpush3.bf16.msra.mxu1 %v1827_v21  ;;  %v615_v41 = vld [vmem:[%s3024_s4] sm:$0x3] }
 0x22b   : > { %v2619_v15 = vsub.f32 %v2463_v51, %v679_v44  ;;  %v2622_v62 = vsub.f32 %v2466_v54, %v679_v44  ;;  %v680_v55 = vmul.f32 0.00390625, %v663_v49  ;;  %785 = vadd.xlane.f32.xlu1 %v784_v52  ;;  %v2645_v44 = vrot.slane %v614_v37, %v2337_v27 }
 0x22c   : > { %v2648_v52 = vrot.slane %v614_v37, %v2342_v29  ;;  %v2656_v21 = vrot.slane %v615_v41, %v2342_v29 }
 0x22d   : > { %v2625_v7 = vsub.f32 %v2469_v58, %v680_v55  ;;  %v2628_v19 = vsub.f32 %v2472_v61, %v680_v55  ;;  %v741_v59 = vmul.f32 %v2619_v15, %v2619_v15  ;;  %v742_v51 = vmul.f32 %v2622_v62, %v2622_v62  ;;  %v1828_v58 = vld [vmem:[#allocation7 + $0x70] sm:$0xff]  }
 0x22e   : > { %1658 = vmatprep.subr.bf16.mxu1 %v1828_v58  ;;  %v2651_v55 = vrot.slane %v615_v41, %v2337_v27 }
 0x22f   : > { %v787_v54 = vadd.f32 %v742_v51, %v741_v59  ;;  %v743_v10 = vmul.f32 %v2625_v7, %v2625_v7  ;;  %v744_v17 = vmul.f32 %v2628_v19, %v2628_v19  ;;  %1659 = vmatpush3.bf16.msra.mxu1 %v1829_v23 }
 0x230   : > { %1660 = vmatprep.subr.bf16.mxu1 %v1830_v35 }
 0x231   : > { %788 = vadd.xlane.f32.xlu0 %v787_v54  ;;  %v790_v61 = vadd.f32 %v744_v17, %v743_v10 }
 0x233   : > { %791 = vadd.xlane.f32.xlu1 %v790_v61  ;;  %1661 = vmatpush3.bf16.msra.mxu1 %v1831_v25 }
 0x286   : > { %v747_v18 = vpop.xlane.xlu0 %746 }
 0x287   : > { %v793_v63 = vmul.f32 0.00390625, %v747_v18 }
 0x289   : > { %v809_v1 = vadd.f32 1e-05, %v793_v63 }
 0x28a   : > { %v750_v3 = vpop.xlane.xlu1 %749 }
 0x28b   : > { %1832 = vrsqrt.f32 %v809_v1  ;;  %v794_v39 = vmul.f32 0.00390625, %v750_v3 }
 0x28d   : > { %v810_v42 = vadd.f32 1e-05, %v794_v39 }
 0x28e   : > { %v753_v34 = vpop.xlane.xlu0 %752 }
 0x28f   : > { %1834 = vrsqrt.f32 %v810_v42  ;;  %v795_v46 = vmul.f32 0.00390625, %v753_v34 }
 0x291   : > { %v811_v9 = vadd.f32 1e-05, %v795_v46 }
 0x292   : > { %v756_v11 = vpop.xlane.xlu1 %755 }
 0x293   : > { %1836 = vrsqrt.f32 %v811_v9  ;;  %v796_v47 = vmul.f32 0.00390625, %v756_v11 }
 0x295   : > { %v1833_v13 = vpop.eup %1832  ;;  %v812_v49 = vadd.f32 1e-05, %v796_v47 }
 0x296   : > { %v841_v2 = vmul.f32 %v1833_v13, %v2479_v6  ;;  %v759_v59 = vpop.xlane.xlu0 %758  ;;  %v842_v51 = vmul.f32 %v1833_v13, %v2482_v30 }
 0x297   : > { %1838 = vrsqrt.f32 %v812_v49  ;;  %v797_v54 = vmul.f32 0.00390625, %v759_v59 }
 0x298   : > { %v762_v10 = vpop.xlane.xlu1 %761  ;;  %v885_v17 = vmul.f32 %v2648_v52, %v842_v51  ;;  %v884_v58 = vmul.f32 %v2645_v44, %v841_v2 }
 0x299   : > { %v1835_v61 = vpop.eup %1834  ;;  %v813_v23 = vadd.f32 1e-05, %v797_v54  ;;  %v798_v35 = vmul.f32 0.00390625, %v762_v10 }
 0x29a   : > { %v843_v27 = vmul.f32 %v1835_v61, %v2489_v12  ;;  %v844_v6 = vmul.f32 %v1835_v61, %v2492_v14  ;;  %v928_v25 = vadd.f32 %v2656_v21, %v885_v17  ;;  %v927_v30 = vadd.f32 %v2651_v55, %v884_v58 }
 0x29b   : > { %v814_v29 = vadd.f32 1e-05, %v798_v35  ;;  %1840 = vrsqrt.f32 %v813_v23 }
 0x29c   : > { %v887_v18 = vmul.f32 %v2648_v52, %v844_v6  ;;  %v960_v63 = vmul.f32 %v928_v25, %v928_v25  ;;  %v886_v1 = vmul.f32 %v2645_v44, %v843_v27  ;;  %v959_v39 = vmul.f32 %v927_v30, %v927_v30 }
 0x29d   : > { %v1837_v3 = vpop.eup %1836  ;;  %1842 = vrsqrt.f32 %v814_v29  ;;  %v2672_v58 = vmul.f32 0.5, %v928_v25 }
 0x29e   : > { %v846_v42 = vmul.f32 %v1837_v3, %v2502_v22  ;;  %v765_v34 = vpop.xlane.xlu0 %764  ;;  %v930_v12 = vadd.f32 %v2656_v21, %v887_v18  ;;  %v1024_v14 = vmul.f32 0.035677407, %v960_v63  ;;  %v929_v37 = vadd.f32 %v2651_v55, %v886_v1 }
 0x29f   : > { %v799_v46 = vmul.f32 0.00390625, %v765_v34  ;;  %v1023_v9 = vmul.f32 0.035677407, %v959_v39  ;;  %v845_v2 = vmul.f32 %v1837_v3, %v2499_v20 }
 0x2a0   : > { %v768_v11 = vpop.xlane.xlu1 %767  ;;  %v962_v41 = vmul.f32 %v930_v12, %v930_v12  ;;  %v1056_v47 = vadd.f32 0.7978846, %v1024_v14  ;;  %v889_v13 = vmul.f32 %v2648_v52, %v846_v42  ;;  %v961_v51 = vmul.f32 %v929_v37, %v929_v37 }
 0x2a1   : > { %v1839_v49 = vpop.eup %1838  ;;  %v815_v59 = vadd.f32 1e-05, %v799_v46  ;;  %v800_v54 = vmul.f32 0.00390625, %v768_v11  ;;  %v1055_v23 = vadd.f32 0.7978846, %v1023_v9  ;;  %v888_v39 = vmul.f32 %v2645_v44, %v845_v2 }
 0x2a2   : > { %v848_v22 = vmul.f32 %v1839_v49, %v2512_v36  ;;  %v1026_v10 = vmul.f32 0.035677407, %v962_v41  ;;  %v1088_v17 = vmul.f32 %v1056_v47, %v928_v25  ;;  %v1025_v61 = vmul.f32 0.035677407, %v961_v51 }
 0x2a3   : > { %v932_v6 = vadd.f32 %v2656_v21, %v889_v13  ;;  %v847_v29 = vmul.f32 %v1839_v49, %v2509_v32  ;;  %v1087_v18 = vmul.f32 %v1055_v23, %v927_v30  ;;  %v816_v36 = vadd.f32 1e-05, %v800_v54 }
 0x2a4   : > { %v1058_v35 = vadd.f32 0.7978846, %v1026_v10  ;;  %1844 = vtanh.f32 %v1088_v17  ;;  %v891_v27 = vmul.f32 %v2648_v52, %v848_v22  ;;  %v1057_v20 = vadd.f32 0.7978846, %v1025_v61 }
 0x2a5   : > { %1846 = vrsqrt.f32 %v815_v59  ;;  %v1841_v63 = vpop.eup %1840  ;;  %v964_v46 = vmul.f32 %v932_v6, %v932_v6  ;;  %v994_v11 = vmul.f32 0.5, %v930_v12  ;;  %v991_v32 = vmul.f32 0.5, %v927_v30 }
 0x2a6   : > { %v771_v1 = vpop.xlane.xlu0 %770  ;;  %v1090_v3 = vmul.f32 %v1058_v35, %v930_v12  ;;  %v934_v25 = vadd.f32 %v2656_v21, %v891_v27  ;;  %v1089_v14 = vmul.f32 %v1057_v20, %v929_v37  ;;  %1848 = vtanh.f32 %v1087_v18 }
 0x2a7   : > { %v1843_v42 = vpop.eup %1842  ;;  %v801_v34 = vmul.f32 0.00390625, %v771_v1  ;;  %v850_v47 = vmul.f32 %v1841_v63, %v2522_v48  ;;  %v1028_v51 = vmul.f32 0.035677407, %v964_v46  ;;  %v890_v2 = vmul.f32 %v2645_v44, %v847_v29 }
 0x2a8   : > { %v774_v9 = vpop.xlane.xlu1 %773  ;;  %1850 = vtanh.f32 %v1090_v3  ;;  %v966_v41 = vmul.f32 %v934_v25, %v934_v25  ;;  %v852_v13 = vmul.f32 %v1843_v42, %v2528_v60  ;;  %v993_v10 = vmul.f32 0.5, %v929_v37 }
 0x2a9   : > { %v802_v49 = vmul.f32 0.00390625, %v774_v9  ;;  %1852 = vtanh.f32 %v1089_v14  ;;  %v817_v59 = vadd.f32 1e-05, %v801_v34  ;;  %v931_v17 = vadd.f32 %v2651_v55, %v888_v39 }
 0x2aa   : > { %v1030_v22 = vmul.f32 0.035677407, %v966_v41  ;;  %1854 = vrsqrt.f32 %v816_v36  ;;  %v2684_v12 = vmul.f32 %v1841_v63, %v2519_v50  ;;  %v1060_v30 = vadd.f32 0.7978846, %v1028_v51 }
 0x2ab   : > { %v818_v54 = vadd.f32 1e-05, %v802_v49  ;;  %v933_v48 = vadd.f32 %v2651_v55, %v890_v2  ;;  %v2688_v60 = vmul.f32 %v1843_v42, %v2525_v56  ;;  %v2690_v23 = vmul.f32 0.5, %v932_v6 }
 0x2ac   : > { %v1062_v61 = vadd.f32 0.7978846, %v1030_v22  ;;  %v963_v35 = vmul.f32 %v931_v17, %v931_v17  ;;  %v893_v27 = vmul.f32 %v2648_v52, %v850_v47  ;;  %1856 = vrsqrt.f32 %v817_v59 }
 0x2ad   : > { %v1092_v20 = vmul.f32 %v1060_v30, %v932_v6  ;;  %v895_v50 = vmul.f32 %v2648_v52, %v852_v13  ;;  %1858 = vrsqrt.f32 %v818_v54  ;;  %v2694_v1 = vmul.f32 0.5, %v934_v25 }
 0x2ae   : > { %v1845_v29 = vpop.eup %1844  ;;  %v777_v37 = vpop.xlane.xlu0 %776  ;;  %v1094_v18 = vmul.f32 %v1062_v61, %v934_v25  ;;  %v965_v3 = vmul.f32 %v933_v48, %v933_v48  ;;  %v2696_v42 = vmul.f32 0.5, %v931_v17  ;;  %v1027_v34 = vmul.f32 0.035677407, %v963_v35 }
 0x2af   : > { %v1847_v63 = vpop.eup %1846  ;;  %v803_v36 = vmul.f32 0.00390625, %v777_v37  ;;  %v1152_v39 = vadd.f32 1.0, %v1845_v29  ;;  %1860 = vtanh.f32 %v1092_v20  ;;  %v936_v6 = vadd.f32 %v2656_v21, %v893_v27 }
 0x2b0   : > { %v780_v56 = vpop.xlane.xlu1 %779  ;;  %v1849_v14 = vpop.eup %1848  ;;  %1862 = vtanh.f32 %v1094_v18  ;;  %v1029_v13 = vmul.f32 0.035677407, %v965_v3  ;;  %v1059_v49 = vadd.f32 0.7978846, %v1027_v34  ;;  %v2700_v25 = vadd.f32 %v2656_v21, %v895_v50 }
 0x2b1   : > { %v819_v46 = vadd.f32 1e-05, %v803_v36  ;;  %v804_v9 = vmul.f32 0.00390625, %v780_v56  ;;  %v1151_v47 = vadd.f32 1.0, %v1849_v14  ;;  %v2703_v51 = vmul.f32 %v1847_v63, %v2539_v8 }
 0x2b2   : > { %v1851_v41 = vpop.eup %1850  ;;  %v854_v22 = vmul.f32 %v1847_v63, %v2542_v31  ;;  %v1184_v30 = vmul.f32 %v1152_v39, %v2672_v58  ;;  %v1061_v35 = vadd.f32 0.7978846, %v1029_v13  ;;  %v1091_v27 = vmul.f32 %v1059_v49, %v931_v17 }
 0x2b3   : > { %v1853_v59 = vpop.eup %1852  ;;  %v820_v2 = vadd.f32 1e-05, %v804_v9  ;;  %v1154_v54 = vadd.f32 1.0, %v1851_v41  ;;  %1864 = vrsqrt.f32 %v819_v46  ;;  %v1183_v20 = vmul.f32 %v1151_v47, %v991_v32 }
 0x2b4   : > { %v1153_v61 = vadd.f32 1.0, %v1853_v59  ;;  %v1855_v29 = vpop.eup %1854  ;;  %v968_v18 = vmul.f32 %v936_v6, %v936_v6  ;;  %v1093_v3 = vmul.f32 %v1061_v35, %v933_v48  ;;  %v970_v8 = vmul.f32 %v2700_v25, %v2700_v25 }
 0x2b5   : > { %v1186_v37 = vmul.f32 %v1154_v54, %v994_v11  ;;  %1866 = vrsqrt.f32 %v820_v2  ;;  %v2709_v56 = vmul.f32 0.5, %v933_v48  ;;  %v2712_v17 = vmul.f32 %v1855_v29, %v2545_v16 }
 0x2b6   : > { %v783_v50 = vpop.xlane.xlu0 %782  ;;  %v1185_v36 = vmul.f32 %v1153_v61, %v993_v10  ;;  %1868 = vtanh.f32 %v1091_v27  ;;  %v1857_v58 = vpop.eup %1856  ;;  %v856_v11 = vmul.f32 %v1855_v29, %v2548_v33  ;;  %v1032_v46 = vmul.f32 0.035677407, %v968_v18 }
 0x2b7   : > { %v805_v31 = vmul.f32 0.00390625, %v783_v50  ;;  %v1216_v63 = vpack.c.bf16 %v1186_v37, %v1184_v30  ;;  %1870 = vtanh.f32 %v1093_v3  ;;  %v1859_v34 = vpop.eup %1858  ;;  %v892_v9 = vmul.f32 %v2645_v44, %v2684_v12 }
 0x2b8   : > { %v786_v32 = vpop.xlane.xlu1 %785  ;;  %v1215_v39 = vpack.c.bf16 %v1185_v36, %v1183_v20  ;;  %v2717_v41 = vmul.f32 0.5, %v936_v6  ;;  %v1034_v47 = vmul.f32 0.035677407, %v970_v8  ;;  %v894_v16 = vmul.f32 %v2645_v44, %v2688_v60 }
 0x2b9   : > { %v821_v10 = vadd.f32 1e-05, %v805_v31  ;;  %v806_v14 = vmul.f32 0.00390625, %v786_v32  ;;  %1398 = vmatprep.mubr.bf16.mxu1 %v1216_v63  ;;  %v1861_v48 = vpop.eup %1860  ;;  %v897_v33 = vmul.f32 %v2648_v52, %v854_v22  ;;  %v2723_v49 = vmul.f32 %v1857_v58, %v2559_v5 }
 0x2ba   : > { %1399 = vmatmul.mubr.bf16.vlgmr.msra.gmra.mrb[0].mxu1 %v1215_v39  ;;  %v1863_v13 = vpop.eup %1862  ;;  %v2726_v59 = vmul.f32 %v1857_v58, %v2562_v26  ;;  %v1156_v2 = vadd.f32 1.0, %v1861_v48  ;;  %v1064_v54 = vadd.f32 0.7978846, %v1032_v46  ;;  %v1066_v30 = vadd.f32 0.7978846, %v1034_v47 }
 0x2bb   : > { %v1158_v12 = vadd.f32 1.0, %v1863_v13  ;;  %v935_v61 = vadd.f32 %v2651_v55, %v892_v9  ;;  %v937_v35 = vadd.f32 %v2651_v55, %v894_v16  ;;  %1872 = vrsqrt.f32 %v821_v10 }
 0x2bc   : > { %v822_v27 = vadd.f32 1e-05, %v806_v14  ;;  %v1096_v60 = vmul.f32 %v1064_v54, %v936_v6  ;;  %v899_v22 = vmul.f32 %v2648_v52, %v856_v11  ;;  %v1188_v5 = vmul.f32 %v1156_v2, %v2690_v23 }
 0x2bd   : > { %v1190_v37 = vmul.f32 %v1158_v12, %v2694_v1  ;;  %v1098_v26 = vmul.f32 %v1066_v30, %v2700_v25  ;;  %v2735_v20 = vadd.f32 %v2656_v21, %v897_v33  ;;  %v1865_v18 = vpop.eup %1864  ;;  %v967_v36 = vmul.f32 %v935_v61, %v935_v61 }
 0x2be   : > { %v789_v29 = vpop.xlane.xlu0 %788  ;;  %1874 = vtanh.f32 %v1096_v60  ;;  %v969_v3 = vmul.f32 %v937_v35, %v937_v35  ;;  %v2738_v6 = vmul.f32 %v1859_v34, %v2565_v43  ;;  %v1002_v23 = vmul.f32 0.5, %v2700_v25 }
 0x2bf   : > { %v807_v50 = vmul.f32 0.00390625, %v789_v29  ;;  %v1867_v8 = vpop.eup %1866  ;;  %v1218_v63 = vpack.c.bf16 %v1190_v37, %v1188_v5  ;;  %1876 = vtanh.f32 %v1098_v26  ;;  %v860_v58 = vmul.f32 %v1859_v34, %v2568_v40 }
 0x2c0   : > { %v792_v31 = vpop.xlane.xlu1 %791  ;;  %v1869_v1 = vpop.eup %1868  ;;  %1878 = vrsqrt.f32 %v822_v27  ;;  %v1031_v14 = vmul.f32 0.035677407, %v967_v36  ;;  %v1033_v46 = vmul.f32 0.035677407, %v969_v3  ;;  %v942_v9 = vadd.f32 %v2656_v21, %v899_v22 }
 0x2c1   : > { %v823_v11 = vadd.f32 1e-05, %v807_v50  ;;  %v808_v32 = vmul.f32 0.00390625, %v792_v31  ;;  %v1871_v39 = vpop.eup %1870  ;;  %1406 = vmatprep.mubr.bf16.mxu1 %v1218_v63  ;;  %v1155_v10 = vadd.f32 1.0, %v1869_v1  ;;  %v972_v25 = vmul.f32 %v2735_v20, %v2735_v20 }
 0x2c2   : > { %v1157_v48 = vadd.f32 1.0, %v1871_v39  ;;  %v2746_v47 = vmul.f32 %v1865_v18, %v2579_v0  ;;  %v1063_v40 = vadd.f32 0.7978846, %v1031_v14  ;;  %v1065_v34 = vadd.f32 0.7978846, %v1033_v46 }
 0x2c3   : > { %1880 = vrsqrt.f32 %v823_v11  ;;  %v824_v43 = vadd.f32 1e-05, %v808_v32  ;;  %v974_v16 = vmul.f32 %v942_v9, %v942_v9  ;;  %v2749_v33 = vmul.f32 %v1865_v18, %v2582_v53 }
 0x2c4   : > { %v2752_v13 = vmul.f32 %v1867_v8, %v2585_v4  ;;  %v1187_v2 = vmul.f32 %v1155_v10, %v2696_v42  ;;  %v1189_v54 = vmul.f32 %v1157_v48, %v2709_v56  ;;  %v2757_v12 = vmul.f32 %v1867_v8, %v2588_v57 }
 0x2c5   : > { %1882 = vrsqrt.f32 %v824_v43  ;;  %v1095_v30 = vmul.f32 %v1063_v40, %v935_v61  ;;  %v1097_v0 = vmul.f32 %v1065_v34, %v937_v35  ;;  %v1873_v27 = vpop.eup %1872  ;;  %v1036_v22 = vmul.f32 0.035677407, %v972_v25 }
 0x2c6   : > { %v1217_v60 = vpack.c.bf16 %v1189_v54, %v1187_v2  ;;  %v1038_v29 = vmul.f32 0.035677407, %v974_v16  ;;  %v896_v53 = vmul.f32 %v2645_v44, %v2703_v51  ;;  %v999_v5 = vmul.f32 0.5, %v935_v61 }
 0x2c7   : > { %v2761_v4 = vmul.f32 0.5, %v937_v35  ;;  %1884 = vtanh.f32 %v1095_v30  ;;  %v898_v42 = vmul.f32 %v2645_v44, %v2712_v17  ;;  %v1068_v57 = vadd.f32 0.7978846, %v1036_v22 }
 0x2c8   : > { %v1875_v56 = vpop.eup %1874  ;;  %1407 = vmatmul.mubr.bf16.gmra.mrb[4].mxu1 %v1217_v60  ;;  %1886 = vtanh.f32 %v1097_v0  ;;  %v1070_v37 = vadd.f32 0.7978846, %v1038_v29  ;;  %v939_v26 = vadd.f32 %v2651_v55, %v896_v53  ;;  %v901_v51 = vmul.f32 %v2648_v52, %v2726_v59 }
 0x2c9   : > { %v1877_v18 = vpop.eup %1876  ;;  %v1160_v50 = vadd.f32 1.0, %v1875_v56  ;;  %v941_v36 = vadd.f32 %v2651_v55, %v898_v42  ;;  %v903_v61 = vmul.f32 %v2648_v52, %v860_v58  ;;  %v1100_v17 = vmul.f32 %v1068_v57, %v2735_v20 }
 0x2ca   : > { %v1879_v35 = vpop.eup %1878  ;;  %v1162_v3 = vadd.f32 1.0, %v1877_v18  ;;  %v1102_v8 = vmul.f32 %v1070_v37, %v942_v9  ;;  %v971_v31 = vmul.f32 %v939_v26, %v939_v26  ;;  %v2773_v1 = vmul.f32 0.5, %v2735_v20 }
 0x2cb   : > { %v1192_v63 = vmul.f32 %v1160_v50, %v2717_v41  ;;  %v2775_v11 = vmul.f32 0.5, %v942_v9  ;;  %v973_v32 = vmul.f32 %v941_v36, %v941_v36  ;;  %1888 = vtanh.f32 %v1100_v17 }
 0x2cc   : > { %v1194_v10 = vmul.f32 %v1162_v3, %v1002_v23  ;;  %v1035_v59 = vmul.f32 0.035677407, %v971_v31  ;;  %v944_v58 = vadd.f32 %v2656_v21, %v901_v51  ;;  %1890 = vtanh.f32 %v1102_v8 }
 0x2cd   : > { %v1881_v39 = vpop.eup %1880  ;;  %v1037_v43 = vmul.f32 0.035677407, %v973_v32  ;;  %v2781_v20 = vadd.f32 %v2656_v21, %v903_v61  ;;  %v2784_v40 = vmul.f32 %v1873_v27, %v2599_v38  ;;  %v2787_v23 = vmul.f32 %v1873_v27, %v2602_v24 }
 0x2ce   : > { %v869_v14 = vmul.f32 %v1881_v39, %v2619_v15  ;;  %v870_v46 = vmul.f32 %v1881_v39, %v2622_v62  ;;  %v1220_v48 = vpack.c.bf16 %v1194_v10, %v1192_v63  ;;  %v1067_v41 = vadd.f32 0.7978846, %v1035_v59 }
 0x2cf   : > { %v976_v9 = vmul.f32 %v944_v58, %v944_v58  ;;  %v1883_v25 = vpop.eup %1882  ;;  %v2790_v34 = vmul.f32 %v1879_v35, %v2605_v28  ;;  %v2793_v15 = vmul.f32 %v1879_v35, %v2608_v45  ;;  %v2795_v62 = vmul.f32 0.5, %v939_v26 }
 0x2d0   : > { %1414 = vmatprep.mubr.bf16.mxu1 %v1220_v48  ;;  %v1069_v16 = vadd.f32 0.7978846, %v1037_v43  ;;  %v1099_v2 = vmul.f32 %v1067_v41, %v939_v26  ;;  %v978_v54 = vmul.f32 %v2781_v20, %v2781_v20  ;;  %v2800_v38 = vmul.f32 %v2645_v44, %v869_v14 }
 0x2d1   : > { %v1885_v30 = vpop.eup %1884  ;;  %v2803_v24 = vmul.f32 %v2648_v52, %v870_v46  ;;  %v2805_v28 = vmul.f32 0.5, %v941_v36  ;;  %v1040_v0 = vmul.f32 0.035677407, %v976_v9  ;;  %v900_v42 = vmul.f32 %v2645_v44, %v2723_v49 }
 0x2d2   : > { %v1887_v45 = vpop.eup %1886  ;;  %v1159_v27 = vadd.f32 1.0, %v1885_v30  ;;  %v1101_v60 = vmul.f32 %v1069_v16, %v941_v36  ;;  %1892 = vtanh.f32 %v1099_v2  ;;  %v1042_v22 = vmul.f32 0.035677407, %v978_v54 }
 0x2d3   : > { %v1161_v29 = vadd.f32 1.0, %v1887_v45  ;;  %v1072_v53 = vadd.f32 0.7978846, %v1040_v0  ;;  %v902_v56 = vmul.f32 %v2645_v44, %v2738_v6  ;;  %v905_v26 = vmul.f32 %v2648_v52, %v2749_v33 }
 0x2d4   : > { %v1191_v57 = vmul.f32 %v1159_v27, %v999_v5  ;;  %1894 = vtanh.f32 %v1101_v60  ;;  %v1074_v37 = vadd.f32 0.7978846, %v1042_v22  ;;  %v2815_v36 = vadd.f32 %v2651_v55, %v900_v42 }
 0x2d5   : > { %v1193_v18 = vmul.f32 %v1161_v29, %v2761_v4  ;;  %v1104_v50 = vmul.f32 %v1072_v53, %v944_v58  ;;  %v2818_v51 = vadd.f32 %v2651_v55, %v902_v56  ;;  %v1889_v61 = vpop.eup %1888  ;;  %v871_v49 = vmul.f32 %v1883_v25, %v2625_v7 }
 0x2d6   : > { %v1106_v6 = vmul.f32 %v1074_v37, %v2781_v20  ;;  %v907_v5 = vmul.f32 %v2648_v52, %v2757_v12  ;;  %v2825_v35 = vadd.f32 %v2656_v21, %v905_v26  ;;  %v1891_v33 = vpop.eup %1890  ;;  %v1164_v3 = vadd.f32 1.0, %v1889_v61 }
 0x2d7   : > { %v1219_v4 = vpack.c.bf16 %v1193_v18, %v1191_v57  ;;  %1896 = vtanh.f32 %v1104_v50  ;;  %v975_v17 = vmul.f32 %v2815_v36, %v2815_v36  ;;  %v1166_v8 = vadd.f32 1.0, %v1891_v33 }
 0x2d8   : > { %1898 = vtanh.f32 %v1106_v6  ;;  %v977_v7 = vmul.f32 %v2818_v51, %v2818_v51  ;;  %v904_v31 = vmul.f32 %v2645_v44, %v2746_v47  ;;  %v872_v12 = vmul.f32 %v1883_v25, %v2628_v19 }
 0x2d9   : > { %1415 = vmatmul.mubr.bf16.gmra.mrb[8].mxu1 %v1219_v4  ;;  %v1008_v63 = vmul.f32 0.5, %v944_v58  ;;  %v1039_v32 = vmul.f32 0.035677407, %v975_v17  ;;  %v2835_v39 = vadd.f32 %v2656_v21, %v907_v5  ;;  %v1196_v10 = vmul.f32 %v1164_v3, %v2773_v1 }
 0x2da   : > { %v1198_v59 = vmul.f32 %v1166_v8, %v2775_v11  ;;  %v1041_v14 = vmul.f32 0.035677407, %v977_v7  ;;  %v980_v46 = vmul.f32 %v2825_v35, %v2825_v35  ;;  %v2842_v43 = vmul.f32 %v2645_v44, %v871_v49 }
 0x2db   : > { %v1071_v47 = vadd.f32 0.7978846, %v1039_v32  ;;  %v982_v19 = vmul.f32 %v2835_v39, %v2835_v39  ;;  %v906_v58 = vmul.f32 %v2645_v44, %v2752_v13  ;;  %v2849_v11 = vadd.f32 %v2651_v55, %v904_v31 }
 0x2dc   : > { %v1893_v48 = vpop.eup %1892  ;;  %v1222_v41 = vpack.c.bf16 %v1198_v59, %v1196_v10  ;;  %v1073_v9 = vadd.f32 0.7978846, %v1041_v14  ;;  %v1044_v1 = vmul.f32 0.035677407, %v980_v46  ;;  %v915_v0 = vmul.f32 %v2648_v52, %v872_v12 }
 0x2dd   : > { %v1163_v25 = vadd.f32 1.0, %v1893_v48  ;;  %v1103_v16 = vmul.f32 %v1071_v47, %v2815_v36  ;;  %v1046_v2 = vmul.f32 0.035677407, %v982_v19  ;;  %v2853_v54 = vadd.f32 %v2651_v55, %v906_v58 }
 0x2de   : > { %v1895_v30 = vpop.eup %1894  ;;  %1422 = vmatprep.mubr.bf16.mxu1 %v1222_v41  ;;  %v1105_v13 = vmul.f32 %v1073_v9, %v2818_v51  ;;  %v1076_v45 = vadd.f32 0.7978846, %v1044_v1  ;;  %v979_v27 = vmul.f32 %v2849_v11, %v2849_v11  ;;  %v1010_v22 = vmul.f32 0.5, %v2781_v20 }
 0x2df   : > { %v1165_v60 = vadd.f32 1.0, %v1895_v30  ;;  %1900 = vtanh.f32 %v1103_v16  ;;  %v1078_v29 = vadd.f32 0.7978846, %v1046_v2  ;;  %v1195_v53 = vmul.f32 %v1163_v25, %v2795_v62 }
 0x2e0   : > { %1902 = vtanh.f32 %v1105_v13  ;;  %v1108_v42 = vmul.f32 %v1076_v45, %v2825_v35  ;;  %v981_v56 = vmul.f32 %v2853_v54, %v2853_v54  ;;  %v1043_v18 = vmul.f32 0.035677407, %v979_v27 }
 0x2e1   : > { %v1897_v57 = vpop.eup %1896  ;;  %v1197_v37 = vmul.f32 %v1165_v60, %v2805_v28  ;;  %v1110_v26 = vmul.f32 %v1078_v29, %v2835_v39  ;;  %v909_v50 = vmul.f32 %v2648_v52, %v2787_v23  ;;  %v911_v62 = vmul.f32 %v2648_v52, %v2793_v15 }
 0x2e2   : > { %v1899_v20 = vpop.eup %1898  ;;  %v1168_v61 = vadd.f32 1.0, %v1897_v57  ;;  %1904 = vtanh.f32 %v1108_v42  ;;  %v1045_v49 = vmul.f32 0.035677407, %v981_v56  ;;  %v1075_v33 = vadd.f32 0.7978846, %v1043_v18 }
 0x2e3   : > { %v1221_v6 = vpack.c.bf16 %v1197_v37, %v1195_v53  ;;  %v1170_v5 = vadd.f32 1.0, %v1899_v20  ;;  %1906 = vtanh.f32 %v1110_v26  ;;  %v2871_v28 = vadd.f32 %v2656_v21, %v909_v50 }
 0x2e4   : > { %v1200_v4 = vmul.f32 %v1168_v61, %v1008_v63  ;;  %v1077_v3 = vadd.f32 0.7978846, %v1045_v49  ;;  %v2874_v17 = vadd.f32 %v2656_v21, %v911_v62  ;;  %v1107_v8 = vmul.f32 %v1075_v33, %v2849_v11 }
 0x2e5   : > { %1423 = vmatmul.mubr.bf16.gmra.mrb[12].mxu1 %v1221_v6  ;;  %v1202_v23 = vmul.f32 %v1170_v5, %v1010_v22  ;;  %v908_v7 = vmul.f32 %v2645_v44, %v2784_v40  ;;  %v910_v52 = vmul.f32 %v2645_v44, %v2790_v34  ;;  %v1007_v15 = vmul.f32 0.5, %v2815_v36 }
 0x2e6   : > { %v1109_v31 = vmul.f32 %v1077_v3, %v2853_v54  ;;  %v984_v12 = vmul.f32 %v2871_v28, %v2871_v28  ;;  %v986_v63 = vmul.f32 %v2874_v17, %v2874_v17  ;;  %v1009_v10 = vmul.f32 0.5, %v2818_v51 }
 0x2e7   : > { %v1224_v32 = vpack.c.bf16 %v1202_v23, %v1200_v4  ;;  %1908 = vtanh.f32 %v1107_v8  ;;  %v2889_v59 = vadd.f32 %v2651_v55, %v908_v7  ;;  %v2892_v34 = vadd.f32 %v2651_v55, %v910_v52 }
 0x2e8   : > { %1910 = vtanh.f32 %v1109_v31  ;;  %v1048_v40 = vmul.f32 0.035677407, %v984_v12  ;;  %v1050_v44 = vmul.f32 0.035677407, %v986_v63  ;;  %v1012_v14 = vmul.f32 0.5, %v2825_v35 }
 0x2e9   : > { %v1901_v36 = vpop.eup %1900  ;;  %1430 = vmatprep.mubr.bf16.mxu1 %v1224_v32  ;;  %v983_v46 = vmul.f32 %v2889_v59, %v2889_v59  ;;  %v2899_v51 = vadd.f32 %v2656_v21, %v2803_v24  ;;  %v2902_v47 = vadd.f32 %v2656_v21, %v915_v0  ;;  %v985_v9 = vmul.f32 %v2892_v34, %v2892_v34 }
 0x2ea   : > { %v1903_v19 = vpop.eup %1902  ;;  %v1167_v58 = vadd.f32 1.0, %v1901_v36  ;;  %v1080_v48 = vadd.f32 0.7978846, %v1048_v40  ;;  %v1082_v41 = vadd.f32 0.7978846, %v1050_v44  ;;  %v1014_v35 = vmul.f32 0.5, %v2835_v39 }
 0x2eb   : > { %v1169_v1 = vadd.f32 1.0, %v1903_v19  ;;  %v1047_v25 = vmul.f32 0.035677407, %v983_v46  ;;  %v988_v16 = vmul.f32 %v2899_v51, %v2899_v51  ;;  %v1049_v0 = vmul.f32 0.035677407, %v985_v9 }
 0x2ec   : > { %v1905_v2 = vpop.eup %1904  ;;  %v1199_v24 = vmul.f32 %v1167_v58, %v1007_v15  ;;  %v1112_v30 = vmul.f32 %v1080_v48, %v2871_v28  ;;  %v1114_v21 = vmul.f32 %v1082_v41, %v2874_v17  ;;  %v990_v22 = vmul.f32 %v2902_v47, %v2902_v47 }
 0x2ed   : > { %v1907_v13 = vpop.eup %1906  ;;  %v1201_v45 = vmul.f32 %v1169_v1, %v1009_v10  ;;  %v1172_v27 = vadd.f32 1.0, %v1905_v2  ;;  %v1079_v60 = vadd.f32 0.7978846, %v1047_v25  ;;  %v1011_v39 = vmul.f32 0.5, %v2849_v11 }
 0x2ee   : > { %v1174_v29 = vadd.f32 1.0, %v1907_v13  ;;  %1912 = vtanh.f32 %v1112_v30  ;;  %v1081_v53 = vadd.f32 0.7978846, %v1049_v0  ;;  %v1013_v56 = vmul.f32 0.5, %v2853_v54 }
 0x2ef   : > { %v1223_v42 = vpack.c.bf16 %v1201_v45, %v1199_v24  ;;  %1914 = vtanh.f32 %v1114_v21  ;;  %v1111_v57 = vmul.f32 %v1079_v60, %v2889_v59  ;;  %v1204_v37 = vmul.f32 %v1172_v27, %v1012_v14 }
 0x2f0   : > { %v1206_v26 = vmul.f32 %v1174_v29, %v1014_v35  ;;  %v1113_v18 = vmul.f32 %v1081_v53, %v2892_v34  ;;  %v1052_v50 = vmul.f32 0.035677407, %v988_v16  ;;  %v1054_v61 = vmul.f32 0.035677407, %v990_v22 }
 0x2f1   : > { %v1909_v20 = vpop.eup %1908  ;;  %1431 = vmatmul.mubr.bf16.gmra.mrb[16].mxu1 %v1223_v42  ;;  %1916 = vtanh.f32 %v1111_v57  ;;  %v955_v11 = vadd.f32 %v2651_v55, %v2800_v38  ;;  %v957_v49 = vadd.f32 %v2651_v55, %v2842_v43  ;;  %v1016_v36 = vmul.f32 0.5, %v2871_v28 }
 0x2f2   : > { %v1911_v62 = vpop.eup %1910  ;;  %v1226_v54 = vpack.c.bf16 %v1206_v26, %v1204_v37  ;;  %v1171_v6 = vadd.f32 1.0, %v1909_v20  ;;  %1918 = vtanh.f32 %v1113_v18  ;;  %v1084_v5 = vadd.f32 0.7978846, %v1052_v50 }
 0x2f3   : > { %v1173_v33 = vadd.f32 1.0, %v1911_v62  ;;  %v1086_v4 = vadd.f32 0.7978846, %v1054_v61  ;;  %v987_v3 = vmul.f32 %v955_v11, %v955_v11  ;;  %v989_v23 = vmul.f32 %v957_v49, %v957_v49 }
 0x2f4   : > { %1438 = vmatprep.mubr.bf16.mxu1 %v1226_v54  ;;  %v1203_v8 = vmul.f32 %v1171_v6, %v1011_v39  ;;  %v1116_v7 = vmul.f32 %v1084_v5, %v2899_v51  ;;  %v1018_v14 = vmul.f32 0.5, %v2874_v17  ;;  %v1015_v1 = vmul.f32 0.5, %v2889_v59 }
 0x2f5   : > { %v1205_v52 = vmul.f32 %v1173_v33, %v1013_v56  ;;  %v1118_v15 = vmul.f32 %v1086_v4, %v2902_v47  ;;  %v1051_v38 = vmul.f32 0.035677407, %v987_v3  ;;  %v1053_v31 = vmul.f32 0.035677407, %v989_v23 }
 0x2f6   : > { %1920 = vtanh.f32 %v1116_v7  ;;  %v1017_v35 = vmul.f32 0.5, %v2892_v34  ;;  %v1020_v0 = vmul.f32 0.5, %v2899_v51  ;;  %v1022_v13 = vmul.f32 0.5, %v2902_v47  ;;  %v2933_v47 = vld [vmem:[%s3026_s6] ss:$0 sm:$0xff] }
 0x2f7   : > { %v1225_v55 = vpack.c.bf16 %v1205_v52, %v1203_v8  ;;  %1922 = vtanh.f32 %v1118_v15  ;;  %v1083_v43 = vadd.f32 0.7978846, %v1051_v38  ;;  %v1085_v12 = vadd.f32 0.7978846, %v1053_v31 }
 0x2f8   : > { %v1913_v63 = vpop.eup %1912  ;;  %v1019_v39 = vmul.f32 0.5, %v955_v11  ;;  %v1021_v53 = vmul.f32 0.5, %v957_v49 }
 0x2f9   : > { %v1915_v32 = vpop.eup %1914  ;;  %1439 = vmatmul.mubr.bf16.gmra.mrb[20].mxu1 %v1225_v55  ;;  %v1176_v10 = vadd.f32 1.0, %v1913_v63  ;;  %v1115_v40 = vmul.f32 %v1083_v43, %v955_v11  ;;  %v1117_v44 = vmul.f32 %v1085_v12, %v957_v49 }
 0x2fa   : > { %v1178_v46 = vadd.f32 1.0, %v1915_v32 }
 0x2fb   : > { %v1917_v19 = vpop.eup %1916  ;;  %1924 = vtanh.f32 %v1115_v40  ;;  %v1208_v48 = vmul.f32 %v1176_v10, %v1016_v36 }
 0x2fc   : > { %v1919_v58 = vpop.eup %1918  ;;  %v1210_v41 = vmul.f32 %v1178_v46, %v1018_v14  ;;  %v1175_v9 = vadd.f32 1.0, %v1917_v19  ;;  %1926 = vtanh.f32 %v1117_v44 }
 0x2fd   : > { %v1177_v25 = vadd.f32 1.0, %v1919_v58 }
 0x2fe   : > { %v1228_v16 = vpack.c.bf16 %v1210_v41, %v1208_v48  ;;  %v1207_v2 = vmul.f32 %v1175_v9, %v1015_v1 }
 0x2ff   : > { %v1209_v24 = vmul.f32 %v1177_v25, %v1017_v35 }
 0x300   : > { %v1921_v30 = vpop.eup %1920  ;;  %1446 = vmatprep.mubr.bf16.mxu1 %v1228_v16 }
 0x301   : > { %v1923_v28 = vpop.eup %1922  ;;  %v1227_v17 = vpack.c.bf16 %v1209_v24, %v1207_v2  ;;  %v1180_v21 = vadd.f32 1.0, %v1921_v30 }
 0x302   : > { %v1182_v45 = vadd.f32 1.0, %v1923_v28 }
 0x303   : > { %1447 = vmatmul.mubr.bf16.gmra.mrb[24].mxu1 %v1227_v17  ;;  %v1212_v27 = vmul.f32 %v1180_v21, %v1020_v0 }
 0x304   : > { %v1214_v59 = vmul.f32 %v1182_v45, %v1022_v13 }
 0x305   : > { %v1925_v60 = vpop.eup %1924 }
 0x306   : > { %v1927_v34 = vpop.eup %1926  ;;  %v1230_v22 = vpack.c.bf16 %v1214_v59, %v1212_v27  ;;  %v1179_v29 = vadd.f32 1.0, %v1925_v60 }
 0x307   : > { %v1181_v42 = vadd.f32 1.0, %v1927_v34 }
 0x308   : > { %1454 = vmatprep.mubr.bf16.mxu1 %v1230_v22  ;;  %v1211_v56 = vmul.f32 %v1179_v29, %v1019_v39 }
 0x309   : > { %v1213_v57 = vmul.f32 %v1181_v42, %v1021_v53 }
 0x30b   : > { %v1229_v37 = vpack.c.bf16 %v1213_v57, %v1211_v56 }
 0x30d   : > { %1455 = vmatmul.mubr.bf16.gmra.mrb[28].mxu1 %v1229_v37 }
 0x38d   : > { %v1662_v51 = vpop.f32.mrb[0].mxu1 }
 0x38e   : > { %v1663_v26 = vpop.f32.mrb[1].mxu1 }
 0x38f   : > { %v1664_v18 = vadd.f32 %v1663_v26, %v1662_v51  ;;  %v1665_v50 = vpop.f32.mrb[2].mxu1 }
 0x390   : > { %v1666_v20 = vpop.f32.mrb[3].mxu1 }
 0x391   : > { %v1401_v61 = vadd.f32 %v1664_v18, %v2933_v47  ;;  %v1667_v11 = vadd.f32 %v1666_v20, %v1665_v50 }
 0x393   : > { %1463 = vst [vmem:[%s2936_s22] sm:$0xff] %v1401_v61  ;;  %v1404_v49 = vadd.f32 %v1667_v11, %v2933_v47 }
 0x395   : > { %1464 = vst [vmem:[%s2936_s22 + $0x8] sm:$0xff] %v1404_v49 }
 0x39b   : > { %v1668_v62 = vpop.f32.mrb[4].mxu1 }
 0x39c   : > { %v1669_v54 = vpop.f32.mrb[5].mxu1 }
 0x39d   : > { %v1670_v6 = vadd.f32 %v1669_v54, %v1668_v62  ;;  %v1671_v5 = vpop.f32.mrb[6].mxu1 }
 0x39e   : > { %v1672_v33 = vpop.f32.mrb[7].mxu1 }
 0x39f   : > { %v1409_v4 = vadd.f32 %v1670_v6, %v2933_v47  ;;  %v1673_v3 = vadd.f32 %v1672_v33, %v1671_v5 }
 0x3a1   : > { %1465 = vst [vmem:[%s2936_s22 + $0x10] sm:$0xff] %v1409_v4  ;;  %v1412_v23 = vadd.f32 %v1673_v3, %v2933_v47 }
 0x3a3   : > { %1466 = vst [vmem:[%s2936_s22 + $0x18] sm:$0xff] %v1412_v23 }
 0x3ac   : > { %v1674_v8 = vpop.f32.mrb[8].mxu1 }
 0x3ad   : > { %v1675_v7 = vpop.f32.mrb[9].mxu1 }
 0x3ae   : > { %v1676_v52 = vadd.f32 %v1675_v7, %v1674_v8  ;;  %v1677_v15 = vpop.f32.mrb[10].mxu1 }
 0x3af   : > { %v1678_v38 = vpop.f32.mrb[11].mxu1 }
 0x3b0   : > { %v1417_v31 = vadd.f32 %v1676_v52, %v2933_v47  ;;  %v1679_v55 = vadd.f32 %v1678_v38, %v1677_v15 }
 0x3b2   : > { %1467 = vst [vmem:[%s2936_s22 + $0x20] sm:$0xff] %v1417_v31  ;;  %v1420_v43 = vadd.f32 %v1679_v55, %v2933_v47 }
 0x3b4   : > { %1468 = vst [vmem:[%s2936_s22 + $0x28] sm:$0xff] %v1420_v43 }
 0x3b8   : > { %v1680_v12 = vpop.f32.mrb[12].mxu1 }
 0x3b9   : > { %v1681_v63 = vpop.f32.mrb[13].mxu1 }
 0x3ba   : > { %v1682_v32 = vadd.f32 %v1681_v63, %v1680_v12  ;;  %v1683_v10 = vpop.f32.mrb[14].mxu1 }
 0x3bb   : > { %v1684_v40 = vpop.f32.mrb[15].mxu1 }
 0x3bc   : > { %v1425_v44 = vadd.f32 %v1682_v32, %v2933_v47  ;;  %v1685_v36 = vadd.f32 %v1684_v40, %v1683_v10 }
 0x3be   : > { %1469 = vst [vmem:[%s2936_s22 + $0x30] sm:$0xff] %v1425_v44  ;;  %v1428_v14 = vadd.f32 %v1685_v36, %v2933_v47 }
 0x3c0   : > { %1470 = vst [vmem:[%s2936_s22 + $0x38] sm:$0xff] %v1428_v14 }
 0x3c4   : > { %v1686_v46 = vpop.f32.mrb[16].mxu1 }
 0x3c5   : > { %v1687_v19 = vpop.f32.mrb[17].mxu1 }
 0x3c6   : > { %v1688_v58 = vadd.f32 %v1687_v19, %v1686_v46  ;;  %v1689_v48 = vpop.f32.mrb[18].mxu1 }
 0x3c7   : > { %v1690_v41 = vpop.f32.mrb[19].mxu1 }
 0x3c8   : > { %v1433_v9 = vadd.f32 %v1688_v58, %v2933_v47  ;;  %v1691_v1 = vadd.f32 %v1690_v41, %v1689_v48 }
 0x3ca   : > { %1471 = vst [vmem:[%s2936_s22 + $0x40] sm:$0xff] %v1433_v9  ;;  %v1436_v35 = vadd.f32 %v1691_v1, %v2933_v47 }
 0x3cc   : > { %1472 = vst [vmem:[%s2936_s22 + $0x48] sm:$0xff] %v1436_v35  ;;  %v1692_v25 = vpop.f32.mrb[20].mxu1 }
 0x3cd   : > { %v1693_v16 = vpop.f32.mrb[21].mxu1 }
 0x3ce   : > { %v1694_v2 = vadd.f32 %v1693_v16, %v1692_v25  ;;  %v1695_v24 = vpop.f32.mrb[22].mxu1 }
 0x3cf   : > { %v1696_v30 = vpop.f32.mrb[23].mxu1 }
 0x3d0   : > { %v1441_v28 = vadd.f32 %v1694_v2, %v2933_v47  ;;  %v1697_v17 = vadd.f32 %v1696_v30, %v1695_v24 }
 0x3d2   : > { %1473 = vst [vmem:[%s2936_s22 + $0x50] sm:$0xff] %v1441_v28  ;;  %v1444_v21 = vadd.f32 %v1697_v17, %v2933_v47 }
 0x3d4   : > { %1474 = vst [vmem:[%s2936_s22 + $0x58] sm:$0xff] %v1444_v21 }
 0x3d6   : > { %v1698_v0 = vpop.f32.mrb[24].mxu1 }
 0x3d7   : > { %v1699_v13 = vpop.f32.mrb[25].mxu1 }
 0x3d8   : > { %v1700_v45 = vadd.f32 %v1699_v13, %v1698_v0  ;;  %v1701_v27 = vpop.f32.mrb[26].mxu1 }
 0x3d9   : > { %v1702_v59 = vpop.f32.mrb[27].mxu1 }
 0x3da   : > { %v1449_v60 = vadd.f32 %v1700_v45, %v2933_v47  ;;  %v1703_v34 = vadd.f32 %v1702_v59, %v1701_v27 }
 0x3dc   : > { %1475 = vst [vmem:[%s2936_s22 + $0x60] sm:$0xff] %v1449_v60  ;;  %v1452_v22 = vadd.f32 %v1703_v34, %v2933_v47 }
 0x3de   : > { %1476 = vst [vmem:[%s2936_s22 + $0x68] sm:$0xff] %v1452_v22 }
 0x3e0   : > { %v1704_v29 = vpop.f32.mrb[28].mxu1 }
 0x3e1   : > { %v1705_v39 = vpop.f32.mrb[29].mxu1 }
 0x3e2   : > { %v1706_v53 = vadd.f32 %v1705_v39, %v1704_v29  ;;  %v1707_v42 = vpop.f32.mrb[30].mxu1 }
 0x3e3   : > { %v1708_v56 = vpop.f32.mrb[31].mxu1 }
 0x3e4   : > { %v1457_v57 = vadd.f32 %v1706_v53, %v2933_v47  ;;  %v1709_v37 = vadd.f32 %v1708_v56, %v1707_v42 }
 0x3e6   : > { %1477 = vst [vmem:[%s2936_s22 + $0x70] sm:$0xff] %v1457_v57  ;;  %v1460_v51 = vadd.f32 %v1709_v37, %v2933_v47 }
 0x3e8   : > { %1478 = vst [vmem:[%s2936_s22 + $0x78] sm:$0xff] %v1460_v51 }
 0x3e9   : > { %2027 = shalt.err (!%p2024_p2)
}
 0x3ea   : > { %s2028_s16 = scalar_lea.hbm %s2971_s9, 2048  ;;  %s2032_s22 = scalar_lea.hbm %s3027_s7, 4096 }
 0x3eb   : > { %p2029_p13 = scmp.ne.s32.totalorder %s2971_s9, %s2028_s16  ;;  %p2033_p4 = scmp.lt.u32.totalorder %s2971_s9, %s3027_s7 }
 0x3ec   : > { %p2034_p7 = scmp.lt.u32.totalorder %s2032_s22, %s2028_s16  ;;  %p2036_p11 = scmp.lt.u32.totalorder %s2028_s16, %s2971_s9 }
 0x3ed   : > { %p2030_p6 = pnand %p2029_p13, %p3043_p0 }
 0x3ee   : > { %p2035_p8 = por %p2034_p7, %p2033_p4 }
 0x3ef   : > { %p2031_p10 = pneg %p2030_p6 }
 0x3f0   : > { %p2037_p1 = por %p2036_p11, %p2035_p8 }
 0x3f2   : > { %p2038_p3 = pnand %p2037_p1, %p2031_p10 }
 0x3f4   : > { %2041 = shalt.err (!%p2038_p3)
}
 0x3f5   : > { %s2095_s30 = smov 128   ;;  %s2096_s23 = smov 8  }
 0x3f6   : > { %1720 = dma.vmem_to_hbm [thread:$0]  (%p3043_p0), %s2973_s18, 2048, %s2971_s9, %s1480_s28, %s2095_s30, %s2095_s30, %s2096_s23  }
 0x3f7 PF: > { %s1508_s11 = sand.u32 1, %s2072_s24   ;;  %p3044_p5 = scmp.ne.s32.totalorder %s3033_s8, 0 }
 0x3f8   : > { %p3045_p9 = scmp.ge.s32.totalorder %s2084_s27, 2  ;;  %s1509_s10 = scalar_lea.sflag [#allocation4], %s1508_s11 }
 0x3fa   : > { %p1734_p12 = pnand %p3045_p9, %p3044_p5 }
 0x3fc   : > { %2067 = dma.done.wait (!%p1734_p12), %s1509_s10, 2048  }
 0x3fd   : > { %2069 = vsyncadd (!%p1734_p12), %s1509_s10, 4294965248  ;;  %p21_p2 = scmp.ge.s32.totalorder %s2250_s13, 4   ;;  %s3046_s24 = smov %s2076_s25 }
 0x3fe   : > { %s3047_s25 = smov %s2080_s26  ;;  %s3048_s26 = smov %s2259_s17 }
 0x3ff   : > { %s3049_s27 = smov %s2250_s13  ;;  %23 = sbr.rel (!%p21_p2) target bundleno = 6 (0x6), region = 101 }
 0x406   :  { %1514 = vsyncpa [#allocation3], 1 }
 0x407   :  { %1516 = vsyncpa [#allocation3 + $0x1], 1 }
 0x408   :  { %1517 = vsyncpa [#allocation6], 1 }
 0x409   :  { %1518 = vsyncpa [#allocation4], 1 }
 0x40a   :  { %1520 = vsyncpa [#allocation4 + $0x1], 1 }

// kernel: tpu_custom_call.1
= control target key start
LH: loop header
LB: loop body
LE: loop exit
PB: predicated region body
PF: predicated region fallthrough
CT: control target
= control target key end

     0   :  { %12 = vsyncpa [#allocation3], 0  ;;  %s3020_s0 = inlined_call_operand.hbm [shape: bf16[256,128], index: 0, kind: input, shape index: {}]   ;;  %s3021_s1 = inlined_call_operand.hbm [shape: bf16[128,256], index: 1, kind: input, shape index: {}]   ;;  %s3022_s2 = inlined_call_operand.vmem [shape: f32[1,256], index: 2, kind: input, shape index: {}]   ;;  %s3023_s3 = inlined_call_operand.vmem [shape: f32[1,256], index: 3, kind: input, shape index: {}]   ;;  %s3024_s4 = inlined_call_operand.vmem [shape: f32[1,256], index: 4, kind: input, shape index: {}]   ;;  %s3025_s5 = inlined_call_operand.hbm [shape: bf16[256,128], index: 5, kind: input, shape index: {}]   ;;  %s3026_s6 = inlined_call_operand.vmem [shape: f32[1,128], index: 6, kind: input, shape index: {}]   ;;  %s3027_s7 = inlined_call_operand.hbm [shape: f32[256,128], index: 7, kind: output, shape index: {}]  }
   0x1   :  { %14 = vsyncpa [#allocation3 + $0x1], 0 }
   0x2   :  { %15 = vsyncpa [#allocation6], 0 }
   0x3   :  { %16 = vsyncpa [#allocation4], 0 }
   0x4   :  { %18 = vsyncpa [#allocation4 + $0x1], 0  ;;  %s2137_s24 = smov 0   ;;  %s2139_s25 = smov 0  }
   0x5   :  { %s2141_s26 = smov 0   ;;  %s2143_s27 = smov 0  }
   0x6 LB: > { %s2158_s28 = sadd.s32 4294967295, %s2084_s27   ;;  %s1585_s29 = sadd.s32 4294967294, %s2084_s27   ;;  %s2084_s27 = sphi %s2143_s27, %s3049_s27   ;;  %s2080_s26 = sphi %s2141_s26, %s3048_s26   ;;  %s2076_s25 = sphi %s2139_s25, %s3047_s25   ;;  %s2072_s24 = sphi %s2137_s24, %s3046_s24  }
   0x7   : > { %p44_p0 = scmp.ne.s32.totalorder %s2076_s25, %s2072_s24  ;;  %p3028_p1 = scmp.eq.s32.totalorder %s2158_s28, 0 }
   0x8   : > { %p200_p3 = scmp.eq.s32.totalorder %s1585_s29, 1  ;;  %p1586_p5 = scmp.ge.s32.totalorder %s2084_s27, 1 }
   0x9   : > { %p2167_p4 = por %p3028_p1, %p44_p0  ;;  %p207_p7 = scmp.lt.s32.totalorder %s2084_s27, 3 }
   0xa   : > { %p2172_p6 = por %p200_p3, %p44_p0  ;;  %s2086_s10 = smov [#allocation5]  }
   0xb   : > { %s3032_s30 = scalar_select %p2167_p4, 1, 0 }
   0xc   : > { %s3033_s8 = scalar_select %p2172_p6, 1, 0 }
   0xd   : > { %p2177_p8 = pnand %p1586_p5, %p207_p7  ;;  %s219_s11 = sshll.u32 %s2086_s10, 4  ;;  %s2181_s11 = int_to_ptr.vmem [resolvable:$true] %s219_s11 }
   0xe   : > { %s2087_s13 = smov [#allocation7]   ;;  %s1928_s17 = scalar_lea.hbm %s3021_s1, 2048 }
   0xf   : > { %p1722_p9 = pneg %p2177_p8  ;;  %s241_s14 = sshll.u32 %s2087_s13, 4  ;;  %s2192_s14 = int_to_ptr.vmem [resolvable:$true] %s241_s14 }
  0x10   : > { %p1929_p12 = scmp.ne.s32.totalorder %s3021_s1, %s1928_s17  ;;  %p1935_p5 = scmp.lt.u32.totalorder %s1928_s17, %s3021_s1 }
  0x11   : > { %p2188_p11 = pnand %p1722_p9, %p3028_p1 }
  0x13   : > { %p1930_p13 = pneg %p2188_p11 }
  0x15   : > { %p1931_p0 = pnand %p1930_p13, %p1929_p12 }
  0x17   : > { %p1932_p3 = pneg %p1931_p0 }
  0x19   : > { %p1937_p7 = pnand %p1935_p5, %p1932_p3 }
  0x1b   : > { %1940 = shalt.err (!%p1937_p7)
}
  0x1c   : > { %s1941_s22 = scalar_lea.vmem %s2181_s11, 2048  ;;  %p1949_p2 = scmp.lt.s32.totalorder %s2181_s11, %s2181_s11 }
  0x1d   : > { %p1942_p9 = scmp.ne.s32.totalorder %s2181_s11, %s1941_s22  ;;  %p1950_p12 = scmp.lt.s32.totalorder %s1941_s22, %s1941_s22 }
  0x1f   : > { %p1944_p10 = pnand %p1942_p9, %p1930_p13  ;;  %p1951_p0 = por %p1950_p12, %p1949_p2 }
  0x21   : > { %p1945_p1 = pneg %p1944_p10 }
  0x23   : > { %p1952_p6 = pnand %p1951_p0, %p1945_p1 }
  0x25   : > { %1955 = shalt.err (!%p1952_p6)
}
  0x26   : > { %s2088_s23 = smov 128   ;;  %s2089_s29 = smov 8  }
  0x27   : > { %1725 = dma.hbm_to_vmem [thread:$0]  (!%p2188_p11), %s3021_s1, 2048, %s2181_s11, [#allocation6], %s2088_s23, %s2088_s23, %s2089_s29  }
  0x28   : > { %s1956_s17 = scalar_lea.hbm %s3025_s5, 2048 }
  0x29   : > { %p1957_p2 = scmp.ne.s32.totalorder %s3025_s5, %s1956_s17  ;;  %p1963_p10 = scmp.lt.u32.totalorder %s1956_s17, %s3025_s5 }
  0x2b   : > { %p1959_p1 = pnand %p1957_p2, %p1930_p13 }
  0x2d   : > { %p1960_p6 = pneg %p1959_p1 }
  0x2f   : > { %p1965_p3 = pnand %p1963_p10, %p1960_p6 }
  0x31   : > { %1968 = shalt.err (!%p1965_p3)
}
  0x32   : > { %s1969_s11 = scalar_lea.vmem %s2192_s14, 2048  ;;  %p1977_p12 = scmp.lt.s32.totalorder %s2192_s14, %s2192_s14 }
  0x33   : > { %p1970_p5 = scmp.ne.s32.totalorder %s2192_s14, %s1969_s11  ;;  %p1978_p0 = scmp.lt.s32.totalorder %s1969_s11, %s1969_s11 }
  0x35   : > { %p1972_p7 = pnand %p1970_p5, %p1930_p13  ;;  %p1979_p2 = por %p1978_p0, %p1977_p12 }
  0x37   : > { %p1973_p9 = pneg %p1972_p7 }
  0x39   : > { %p1980_p1 = pnand %p1979_p2, %p1973_p9 }
  0x3b   : > { %1983 = shalt.err (!%p1980_p1)
}
  0x3c   : > { %s3029_s22 = smov 64   ;;  %s2091_s23 = smov 4  }
  0x3d   : > { %1728 = dma.hbm_to_vmem [thread:$0]  (!%p2188_p11), %s3025_s5, 2048, %s2192_s14, [#allocation6], %s3029_s22, %s3029_s22, %s2091_s23  }
  0x3e   : > { %s2250_s13 = sadd.s32 1, %s2084_s27   ;;  %s31_s16 = sadd.s32 1, %s2080_s26 }
  0x3f   : > { %s28_s15 = ssub.s32 %s2084_s27, %s2250_s13  ;;  %p38_p6 = scmp.ne.s32.totalorder %s2080_s26, %s2076_s25 }
  0x40   : > { %p29_p13 = scmp.eq.s32.totalorder %s28_s15, 0  ;;  %p39_p10 = scmp.eq.s32.totalorder %s2084_s27, 0 }
  0x41   : > { %p3036_p5 = scmp.eq.s32.totalorder %s2158_s28, 1  ;;  %p1739_p9 = scmp.lt.s32.totalorder %s2084_s27, 2 }
  0x42   : > { %s2259_s17 = scalar_select %p29_p13, %s2080_s26, %s31_s16  }
  0x43   : > { %p40_p3 = por %p39_p10, %p38_p6  ;;  %p2263_p7 = por %p3036_p5, %p38_p6 }
  0x44   : > { %s258_s18 = sand.u32 1, %s2080_s26   ;;  %s1644_s14 = sshll.u32 %s2084_s27, 10 }
  0x45   : > { %s3037_s12 = scalar_select %p2263_p7, 1, 0 }
  0x46   : > { %s1590_s19 = sshll.u32 %s258_s18, 6  ;;  %s2273_s11 = scalar_lea.hbm %s3020_s0, %s1644_s14 }
  0x47   : > { %s262_s29 = scalar_lea.vmem [#allocation2], %s1590_s19  ;;  %p2277_p11 = pnand %p1739_p9, %p40_p3 }
  0x48   : > { %s269_s10 = sshll.u32 %s262_s29, 4  ;;  %s2281_s16 = scalar_lea.sflag [#allocation3], %s258_s18  ;;  %s2275_s10 = int_to_ptr.vmem [resolvable:$true] %s269_s10 }
  0x49   : > { %s1984_s22 = scalar_lea.hbm %s2273_s11, 1024  ;;  %p1986_p0 = pneg %p2277_p11 }
  0x4a   : > { %p1985_p12 = scmp.ne.s32.totalorder %s2273_s11, %s1984_s22  ;;  %s1989_s20 = scalar_lea.hbm %s3020_s0, 2048 }
  0x4b   : > { %p1990_p13 = scmp.lt.u32.totalorder %s2273_s11, %s3020_s0  ;;  %p1991_p6 = scmp.lt.u32.totalorder %s1989_s20, %s1984_s22 }
  0x4c   : > { %p1987_p2 = pnand %p1986_p0, %p1985_p12  ;;  %p1993_p3 = scmp.lt.u32.totalorder %s1984_s22, %s2273_s11 }
  0x4d   : > { %p1992_p10 = por %p1991_p6, %p1990_p13 }
  0x4e   : > { %p1988_p1 = pneg %p1987_p2 }
  0x4f   : > { %p1994_p5 = por %p1993_p3, %p1992_p10 }
  0x51   : > { %p1995_p9 = pnand %p1994_p5, %p1988_p1 }
  0x53   : > { %1998 = shalt.err (!%p1995_p9)
}
  0x54   : > { %s1999_s18 = scalar_lea.vmem %s2275_s10, 1024  ;;  %s2092_s19 = smov [#allocation2]  }
  0x55   : > { %p2000_p12 = scmp.ne.s32.totalorder %s2275_s10, %s1999_s18  ;;  %s2004_s14 = sshll.u32 %s2092_s19, 4  ;;  %s2005_s14 = int_to_ptr.vmem [resolvable:$false] %s2004_s14 }
  0x56   : > { %s2006_s21 = scalar_lea.vmem %s2005_s14, 2048  ;;  %p2007_p4 = scmp.lt.s32.totalorder %s2275_s10, %s2005_s14 }
  0x57   : > { %p2002_p2 = pnand %p2000_p12, %p1986_p0  ;;  %p2008_p13 = scmp.lt.s32.totalorder %s2006_s21, %s1999_s18 }
  0x59   : > { %p2003_p7 = pneg %p2002_p2  ;;  %p2009_p6 = por %p2008_p13, %p2007_p4 }
  0x5b   : > { %p2010_p10 = pnand %p2009_p6, %p2003_p7 }
  0x5d   : > { %2013 = shalt.err (!%p2010_p10)
}
  0x5e   : > { %s3039_s22 = smov 64   ;;  %281 = sbr.rel (%p2177_p8) target bundleno = 1015 (0x3f7), region = 48 }
  0x5f   : > { %1732 = dma.hbm_to_vmem [thread:$0]  (!%p2277_p11), %s2273_s11, 1024, %s2275_s10, %s2281_s16, %s3039_s22, %s3039_s22, %s2091_s23  }
  0x60   : > { %s2315_s20 = sand.u32 (!%p2177_p8), 1, %s2076_s25   ;;  %p3040_p4 = scmp.ne.s32.totalorder (!%p2177_p8), %s3032_s30, 0 }
  0x61   : > { %s1594_s29 = sshll.u32 (!%p2177_p8), %s2315_s20, 6  ;;  %s284_s18 = scalar_lea.sflag (!%p2177_p8), [#allocation3], %s2315_s20 }
  0x62   : > { %s2319_s19 = scalar_lea.vmem (!%p2177_p8), [#allocation2], %s1594_s29 }
  0x65   : > { %2059 = dma.done.wait (%p3040_p4), %s284_s18, 1024  }
  0x66   : > { %2061 = vsyncadd (%p3040_p4), %s284_s18, 4294966272  ;;  %p3041_p7 = scmp.eq.s32.totalorder %s2158_s28, 0 }
  0x68   : > { %2063 = dma.done.wait (%p3041_p7), [#allocation6], 4096   ;;  %p3042_p8 = pmov %p3041_p7 }
  0x69   : > { %v2093_v0 = vmov 0   ;;  %v1784_v1 = vld [vmem:[#allocation5 + $0x4] ss:$8 sps:$4 sm:$0xff]   ;;  %v1786_v2 = vld [vmem:[#allocation5] ss:$8 sps:$4 sm:$0xff]   ;;  %v1810_v19 = vld [vmem:[%s2319_s19 + $0x10] sm:$0xff]   ;;  %v363_v25 = vlaneseq }
  0x6a   : > { %2065 = vsyncadd (%p3042_p8), [#allocation6], 4294963200  ;;  %533 = vmatprep.mubr.bf16.mxu0 %v2093_v0  ;;  %501 = vmatprep.subr.bf16.mxu0 %v1784_v1  ;;  %v1787_v3 = vld [vmem:[#allocation5 + $0x14] ss:$8 sps:$4 sm:$0xff]   ;;  %v1789_v4 = vld [vmem:[#allocation5 + $0x10] ss:$8 sps:$4 sm:$0xff]  }
  0x6b   : > { %502 = vmatpush1.bf16.msra.mxu0 %v1786_v2  ;;  %v1790_v5 = vld [vmem:[#allocation5 + $0x24] ss:$8 sps:$4 sm:$0xff]   ;;  %v1792_v6 = vld [vmem:[#allocation5 + $0x20] ss:$8 sps:$4 sm:$0xff]   ;;  %v1793_v7 = vld [vmem:[#allocation5 + $0x34] ss:$8 sps:$4 sm:$0xff]  }
  0x6c   : > { %503 = vmatprep.subr.bf16.mxu0 %v1787_v3  ;;  %v1795_v8 = vld [vmem:[#allocation5 + $0x30] ss:$8 sps:$4 sm:$0xff]   ;;  %v1796_v9 = vld [vmem:[#allocation5 + $0x44] ss:$8 sps:$4 sm:$0xff]   ;;  %v1798_v10 = vld [vmem:[#allocation5 + $0x40] ss:$8 sps:$4 sm:$0xff]  }
  0x6d   : > { %v1799_v11 = vld [vmem:[#allocation5 + $0x54] ss:$8 sps:$4 sm:$0xff]   ;;  %v1801_v12 = vld [vmem:[#allocation5 + $0x50] ss:$8 sps:$4 sm:$0xff]   ;;  %v1802_v13 = vld [vmem:[#allocation5 + $0x64] ss:$8 sps:$4 sm:$0xff]  }
  0x6e   : > { %v1804_v14 = vld [vmem:[#allocation5 + $0x60] ss:$8 sps:$4 sm:$0xff]   ;;  %v1805_v15 = vld [vmem:[#allocation5 + $0x74] ss:$8 sps:$4 sm:$0xff]   ;;  %v1807_v16 = vld [vmem:[#allocation5 + $0x70] ss:$8 sps:$4 sm:$0xff]  }
  0x6f   : > { %504 = vmatpush1.bf16.msra.mxu0 %v1789_v4  ;;  %v1808_v17 = vld [vmem:[%s2319_s19] sm:$0xff]   ;;  %v1809_v18 = vld [vmem:[%s2319_s19 + $0x8] sm:$0xff]   ;;  %v1811_v20 = vld [vmem:[%s2319_s19 + $0x18] sm:$0xff]   ;;  %v364_v26 = vshrl.u32 %v363_v25, 7  ;;  %s1597_s16 = sshll.u32 %s2315_s20, 7  ;;  %s1645_s29 = sshll.u32 %s2158_s28, 11 }
  0x70   : > { %505 = vmatprep.subr.bf16.mxu0 %v1790_v5  ;;  %v1812_v21 = vld [vmem:[%s2319_s19 + $0x20] sm:$0xff]   ;;  %v1813_v22 = vld [vmem:[%s2319_s19 + $0x28] sm:$0xff]   ;;  %v1814_v23 = vld [vmem:[%s2319_s19 + $0x30] sm:$0xff]   ;;  %s2936_s22 = scalar_lea.vmem [#allocation8], %s1597_s16  ;;  %s2971_s9 = scalar_lea.hbm %s3027_s7, %s1645_s29 }
  0x71   : > { %v1815_v24 = vld [vmem:[%s2319_s19 + $0x38] sm:$0xff]   ;;  %v2337_v27 = vsub.s32 0, %v364_v26  ;;  %v361_v28 = vld [vmem:[%s3022_s2] sm:$0x3]  ;;  %v2342_v29 = vsub.s32 1, %v364_v26  ;;  %s1493_s18 = sshll.u32 %s2936_s22, 4  ;;  %s2973_s18 = int_to_ptr.vmem [resolvable:$true] %s1493_s18 }
  0x72   : > { %s1480_s28 = scalar_lea.sflag [#allocation4], %s2315_s20  ;;  %s2014_s23 = scalar_lea.vmem %s2973_s18, 2048 }
  0x73   : > { %506 = vmatpush1.bf16.msra.mxu0 %v1792_v6  ;;  %v2345_v30 = vrot.slane %v361_v28, %v2337_v27  ;;  %v2348_v31 = vrot.slane %v361_v28, %v2342_v29  ;;  %p2015_p11 = scmp.ne.s32.totalorder %s2973_s18, %s2014_s23  ;;  %p3043_p0 = scmp.ne.s32.totalorder %s3037_s12, 0 }
  0x74   : > { %507 = vmatprep.subr.bf16.mxu0 %v1793_v7  ;;  %s2094_s11 = smov [#allocation8]  }
  0x75   : > { %p2016_p1 = pnand %p2015_p11, %p3043_p0  ;;  %s2018_s10 = sshll.u32 %s2094_s11, 4  ;;  %s2019_s10 = int_to_ptr.vmem [resolvable:$false] %s2018_s10 }
  0x76   : > { %s2020_s15 = scalar_lea.vmem %s2019_s10, 4096  ;;  %p2021_p5 = scmp.lt.s32.totalorder %s2973_s18, %s2019_s10 }
  0x77   : > { %508 = vmatpush1.bf16.msra.mxu0 %v1795_v8  ;;  %p2017_p3 = pneg %p2016_p1  ;;  %p2022_p9 = scmp.lt.s32.totalorder %s2020_s15, %s2014_s23 }
  0x78   : > { %509 = vmatprep.subr.bf16.mxu0 %v1796_v9 }
  0x79   : > { %p2023_p12 = por %p2022_p9, %p2021_p5 }
  0x7b   : > { %510 = vmatpush1.bf16.msra.mxu0 %v1798_v10  ;;  %p2024_p2 = pnand %p2023_p12, %p2017_p3 }
  0x7c   : > { %511 = vmatprep.subr.bf16.mxu0 %v1799_v11 }
  0x7f   : > { %512 = vmatpush1.bf16.msra.mxu0 %v1801_v12 }
  0x80   : > { %513 = vmatprep.subr.bf16.mxu0 %v1802_v13 }
  0x83   : > { %514 = vmatpush1.bf16.msra.mxu0 %v1804_v14 }
  0x84   : > { %515 = vmatprep.subr.bf16.mxu0 %v1805_v15 }
  0x87   : > { %516 = vmatpush1.bf16.msra.mxu0 %v1807_v16 }
  0x8a   : > { %534 = vmatmul.mubr.bf16.vlgmr.msra.gmra.mrb[0].mxu0 %v1808_v17 }
  0x8b   : > { %543 = vmatprep.mubr.bf16.mxu0 %v2093_v0 }
  0x92   : > { %544 = vmatmul.mubr.bf16.gmra.mrb[4].mxu0 %v1809_v18 }
  0x93   : > { %553 = vmatprep.mubr.bf16.mxu0 %v2093_v0 }
  0x9a   : > { %554 = vmatmul.mubr.bf16.gmra.mrb[8].mxu0 %v1810_v19 }
  0x9b   : > { %563 = vmatprep.mubr.bf16.mxu0 %v2093_v0 }
  0xa2   : > { %564 = vmatmul.mubr.bf16.gmra.mrb[12].mxu0 %v1811_v20 }
  0xa3   : > { %573 = vmatprep.mubr.bf16.mxu0 %v2093_v0 }
  0xaa   : > { %574 = vmatmul.mubr.bf16.gmra.mrb[16].mxu0 %v1812_v21 }
  0xab   : > { %583 = vmatprep.mubr.bf16.mxu0 %v2093_v0 }
  0xb2   : > { %584 = vmatmul.mubr.bf16.gmra.mrb[20].mxu0 %v1813_v22 }
  0xb3   : > { %593 = vmatprep.mubr.bf16.mxu0 %v2093_v0 }
  0xba   : > { %594 = vmatmul.mubr.bf16.gmra.mrb[24].mxu0 %v1814_v23 }
  0xbb   : > { %603 = vmatprep.mubr.bf16.mxu0 %v2093_v0 }
  0xc2   : > { %604 = vmatmul.mubr.bf16.gmra.mrb[28].mxu0 %v1815_v24 }
 0x15d   : > { %v535_v32 = vpop.f32.mrb[0].mxu0 }
 0x15e   : > { %v2351_v33 = vadd.f32 %v535_v32, %v2345_v30  ;;  %v537_v34 = vpop.f32.mrb[1].mxu0 }
 0x15f   : > { %v2354_v35 = vadd.f32 %v537_v34, %v2348_v31  ;;  %v539_v36 = vpop.f32.mrb[2].mxu0 }
 0x160   : > { %v541_v37 = vpop.f32.mrb[3].mxu0  ;;  %v2357_v38 = vadd.f32 %v539_v36, %v2345_v30 }
 0x161   : > { %v2360_v39 = vadd.f32 %v541_v37, %v2348_v31  ;;  %v616_v40 = vadd.f32 %v2354_v35, %v2351_v33 }
 0x163   : > { %617 = vadd.xlane.f32.xlu0 %v616_v40  ;;  %v619_v42 = vadd.f32 %v2360_v39, %v2357_v38 }
 0x165   : > { %v545_v41 = vpop.f32.mrb[4].mxu0 }
 0x166   : > { %v2367_v43 = vadd.f32 %v545_v41, %v2345_v30  ;;  %v547_v44 = vpop.f32.mrb[5].mxu0 }
 0x167   : > { %v2370_v45 = vadd.f32 %v547_v44, %v2348_v31  ;;  %v549_v46 = vpop.f32.mrb[6].mxu0  ;;  %620 = vadd.xlane.f32.xlu0 %v619_v42 }
 0x168   : > { %v551_v47 = vpop.f32.mrb[7].mxu0  ;;  %v2373_v48 = vadd.f32 %v549_v46, %v2345_v30 }
 0x169   : > { %v2376_v49 = vadd.f32 %v551_v47, %v2348_v31  ;;  %v622_v50 = vadd.f32 %v2370_v45, %v2367_v43 }
 0x16b   : > { %623 = vadd.xlane.f32.xlu1 %v622_v50  ;;  %v625_v52 = vadd.f32 %v2376_v49, %v2373_v48 }
 0x16d   : > { %v555_v51 = vpop.f32.mrb[8].mxu0 }
 0x16e   : > { %v2383_v53 = vadd.f32 %v555_v51, %v2345_v30  ;;  %v557_v54 = vpop.f32.mrb[9].mxu0 }
 0x16f   : > { %v2386_v55 = vadd.f32 %v557_v54, %v2348_v31  ;;  %v559_v56 = vpop.f32.mrb[10].mxu0  ;;  %626 = vadd.xlane.f32.xlu1 %v625_v52 }
 0x170   : > { %v2389_v57 = vadd.f32 %v559_v56, %v2345_v30  ;;  %v561_v58 = vpop.f32.mrb[11].mxu0 }
 0x171   : > { %v2392_v59 = vadd.f32 %v561_v58, %v2348_v31  ;;  %v628_v60 = vadd.f32 %v2386_v55, %v2383_v53 }
 0x173   : > { %629 = vadd.xlane.f32.xlu0 %v628_v60  ;;  %v631_v61 = vadd.f32 %v2392_v59, %v2389_v57 }
 0x175   : > { %v565_v62 = vpop.f32.mrb[12].mxu0  ;;  %632 = vadd.xlane.f32.xlu1 %v631_v61 }
 0x176   : > { %v2399_v63 = vadd.f32 %v565_v62, %v2345_v30  ;;  %v567_v0 = vpop.f32.mrb[13].mxu0 }
 0x177   : > { %v2402_v1 = vadd.f32 %v567_v0, %v2348_v31  ;;  %v569_v2 = vpop.f32.mrb[14].mxu0 }
 0x178   : > { %v2405_v3 = vadd.f32 %v569_v2, %v2345_v30  ;;  %v571_v4 = vpop.f32.mrb[15].mxu0 }
 0x179   : > { %v2408_v5 = vadd.f32 %v571_v4, %v2348_v31  ;;  %v634_v6 = vadd.f32 %v2402_v1, %v2399_v63 }
 0x17b   : > { %635 = vadd.xlane.f32.xlu0 %v634_v6  ;;  %v637_v7 = vadd.f32 %v2408_v5, %v2405_v3 }
 0x17d   : > { %v575_v8 = vpop.f32.mrb[16].mxu0  ;;  %638 = vadd.xlane.f32.xlu1 %v637_v7 }
 0x17e   : > { %v2415_v9 = vadd.f32 %v575_v8, %v2345_v30  ;;  %v577_v10 = vpop.f32.mrb[17].mxu0 }
 0x17f   : > { %v2418_v11 = vadd.f32 %v577_v10, %v2348_v31  ;;  %v579_v12 = vpop.f32.mrb[18].mxu0 }
 0x180   : > { %v2421_v13 = vadd.f32 %v579_v12, %v2345_v30  ;;  %v581_v14 = vpop.f32.mrb[19].mxu0 }
 0x181   : > { %v2424_v15 = vadd.f32 %v581_v14, %v2348_v31  ;;  %v640_v16 = vadd.f32 %v2418_v11, %v2415_v9 }
 0x183   : > { %641 = vadd.xlane.f32.xlu0 %v640_v16  ;;  %v643_v17 = vadd.f32 %v2424_v15, %v2421_v13 }
 0x185   : > { %v585_v18 = vpop.f32.mrb[20].mxu0  ;;  %644 = vadd.xlane.f32.xlu1 %v643_v17 }
 0x186   : > { %v2431_v19 = vadd.f32 %v585_v18, %v2345_v30  ;;  %v587_v20 = vpop.f32.mrb[21].mxu0 }
 0x187   : > { %v2434_v21 = vadd.f32 %v587_v20, %v2348_v31  ;;  %v589_v22 = vpop.f32.mrb[22].mxu0 }
 0x188   : > { %v2437_v23 = vadd.f32 %v589_v22, %v2345_v30  ;;  %v591_v24 = vpop.f32.mrb[23].mxu0 }
 0x189   : > { %v2440_v25 = vadd.f32 %v591_v24, %v2348_v31  ;;  %v646_v26 = vadd.f32 %v2434_v21, %v2431_v19 }
 0x18b   : > { %647 = vadd.xlane.f32.xlu0 %v646_v26  ;;  %v649_v28 = vadd.f32 %v2440_v25, %v2437_v23 }
 0x18d   : > { %v595_v32 = vpop.f32.mrb[24].mxu0  ;;  %650 = vadd.xlane.f32.xlu1 %v649_v28 }
 0x18e   : > { %v2447_v34 = vadd.f32 %v595_v32, %v2345_v30  ;;  %v597_v36 = vpop.f32.mrb[25].mxu0 }
 0x18f   : > { %v2450_v37 = vadd.f32 %v597_v36, %v2348_v31  ;;  %v599_v40 = vpop.f32.mrb[26].mxu0 }
 0x190   : > { %v2453_v41 = vadd.f32 %v599_v40, %v2345_v30  ;;  %v601_v42 = vpop.f32.mrb[27].mxu0 }
 0x191   : > { %v2456_v44 = vadd.f32 %v601_v42, %v2348_v31  ;;  %v652_v46 = vadd.f32 %v2450_v37, %v2447_v34 }
 0x193   : > { %653 = vadd.xlane.f32.xlu0 %v652_v46  ;;  %v655_v47 = vadd.f32 %v2456_v44, %v2453_v41 }
 0x195   : > { %v605_v50 = vpop.f32.mrb[28].mxu0  ;;  %656 = vadd.xlane.f32.xlu1 %v655_v47 }
 0x196   : > { %v2463_v51 = vadd.f32 %v605_v50, %v2345_v30  ;;  %v607_v52 = vpop.f32.mrb[29].mxu0 }
 0x197   : > { %v2466_v54 = vadd.f32 %v607_v52, %v2348_v31  ;;  %v609_v56 = vpop.f32.mrb[30].mxu0 }
 0x198   : > { %v2469_v58 = vadd.f32 %v609_v56, %v2345_v30  ;;  %v611_v60 = vpop.f32.mrb[31].mxu0 }
 0x199   : > { %v2472_v61 = vadd.f32 %v611_v60, %v2348_v31  ;;  %v658_v62 = vadd.f32 %v2466_v54, %v2463_v51 }
 0x19b   : > { %659 = vadd.xlane.f32.xlu0 %v658_v62  ;;  %v661_v0 = vadd.f32 %v2472_v61, %v2469_v58 }
 0x19d   : > { %662 = vadd.xlane.f32.xlu1 %v661_v0 }
 0x1f0   : > { %v618_v2 = vpop.xlane.xlu0 %617 }
 0x1f1   : > { %v665_v4 = vmul.f32 0.00390625, %v618_v2 }
 0x1f3   : > { %v2479_v6 = vsub.f32 %v2351_v33, %v665_v4  ;;  %v2482_v30 = vsub.f32 %v2354_v35, %v665_v4 }
 0x1f4   : > { %v621_v7 = vpop.xlane.xlu0 %620 }
 0x1f5   : > { %v666_v8 = vmul.f32 0.00390625, %v621_v7  ;;  %v713_v31 = vmul.f32 %v2479_v6, %v2479_v6  ;;  %v714_v10 = vmul.f32 %v2482_v30, %v2482_v30 }
 0x1f7   : > { %v2489_v12 = vsub.f32 %v2357_v38, %v666_v8  ;;  %v2492_v14 = vsub.f32 %v2360_v39, %v666_v8  ;;  %v745_v16 = vadd.f32 %v714_v10, %v713_v31 }
 0x1f8   : > { %v624_v33 = vpop.xlane.xlu1 %623 }
 0x1f9   : > { %v667_v17 = vmul.f32 0.00390625, %v624_v33  ;;  %746 = vadd.xlane.f32.xlu0 %v745_v16  ;;  %v715_v35 = vmul.f32 %v2489_v12, %v2489_v12  ;;  %v716_v18 = vmul.f32 %v2492_v14, %v2492_v14 }
 0x1fb   : > { %v2499_v20 = vsub.f32 %v2367_v43, %v667_v17  ;;  %v2502_v22 = vsub.f32 %v2370_v45, %v667_v17  ;;  %v748_v38 = vadd.f32 %v716_v18, %v715_v35 }
 0x1fc   : > { %v627_v24 = vpop.xlane.xlu1 %626 }
 0x1fd   : > { %v668_v39 = vmul.f32 0.00390625, %v627_v24  ;;  %749 = vadd.xlane.f32.xlu1 %v748_v38  ;;  %v717_v26 = vmul.f32 %v2499_v20, %v2499_v20  ;;  %v718_v28 = vmul.f32 %v2502_v22, %v2502_v22 }
 0x1ff   : > { %v2509_v32 = vsub.f32 %v2373_v48, %v668_v39  ;;  %v2512_v36 = vsub.f32 %v2376_v49, %v668_v39  ;;  %v751_v43 = vadd.f32 %v718_v28, %v717_v26 }
 0x200   : > { %v630_v40 = vpop.xlane.xlu0 %629 }
 0x201   : > { %v669_v45 = vmul.f32 0.00390625, %v630_v40  ;;  %752 = vadd.xlane.f32.xlu0 %v751_v43  ;;  %v719_v42 = vmul.f32 %v2509_v32, %v2509_v32  ;;  %v720_v46 = vmul.f32 %v2512_v36, %v2512_v36 }
 0x202   : > { %v633_v47 = vpop.xlane.xlu1 %632 }
 0x203   : > { %v2519_v50 = vsub.f32 %v2383_v53, %v669_v45  ;;  %v2522_v48 = vsub.f32 %v2386_v55, %v669_v45  ;;  %v670_v52 = vmul.f32 0.00390625, %v633_v47  ;;  %v754_v49 = vadd.f32 %v720_v46, %v719_v42 }
 0x205   : > { %v2525_v56 = vsub.f32 %v2389_v57, %v670_v52  ;;  %v2528_v60 = vsub.f32 %v2392_v59, %v670_v52  ;;  %755 = vadd.xlane.f32.xlu1 %v754_v49  ;;  %v721_v62 = vmul.f32 %v2519_v50, %v2519_v50  ;;  %v722_v0 = vmul.f32 %v2522_v48, %v2522_v48  ;;  %v1816_v52 = vld [vmem:[#allocation7 + $0x40] sm:$0xff]  }
 0x206   : > { %1646 = vmatprep.subr.bf16.mxu1 %v1816_v52 }
 0x207   : > { %v757_v53 = vadd.f32 %v722_v0, %v721_v62  ;;  %v723_v55 = vmul.f32 %v2525_v56, %v2525_v56  ;;  %v724_v2 = vmul.f32 %v2528_v60, %v2528_v60 }
 0x208   : > { %v636_v4 = vpop.xlane.xlu0 %635 }
 0x209   : > { %v671_v57 = vmul.f32 0.00390625, %v636_v4  ;;  %758 = vadd.xlane.f32.xlu0 %v757_v53  ;;  %v760_v7 = vadd.f32 %v724_v2, %v723_v55  ;;  %v1818_v2 = vld [vmem:[#allocation7 + $0x48] sm:$0xff]  }
 0x20a   : > { %v639_v59 = vpop.xlane.xlu1 %638 }
 0x20b   : > { %v2539_v8 = vsub.f32 %v2399_v63, %v671_v57  ;;  %v2542_v31 = vsub.f32 %v2402_v1, %v671_v57  ;;  %v672_v10 = vmul.f32 0.00390625, %v639_v59  ;;  %761 = vadd.xlane.f32.xlu1 %v760_v7  ;;  %v1819_v59 = vld [vmem:[#allocation7 + $0x8] sm:$0xff]  }
 0x20d   : > { %v2545_v16 = vsub.f32 %v2405_v3, %v672_v10  ;;  %v2548_v33 = vsub.f32 %v2408_v5, %v672_v10  ;;  %v725_v17 = vmul.f32 %v2539_v8, %v2539_v8  ;;  %v726_v35 = vmul.f32 %v2542_v31, %v2542_v31 }
 0x20f   : > { %v763_v18 = vadd.f32 %v726_v35, %v725_v17  ;;  %v727_v63 = vmul.f32 %v2545_v16, %v2545_v16  ;;  %v728_v1 = vmul.f32 %v2548_v33, %v2548_v33  ;;  %v1820_v35 = vld [vmem:[#allocation7 + $0x50] sm:$0xff]  }
 0x210   : > { %v642_v38 = vpop.xlane.xlu0 %641 }
 0x211   : > { %v673_v24 = vmul.f32 0.00390625, %v642_v38  ;;  %764 = vadd.xlane.f32.xlu0 %v763_v18  ;;  %v766_v3 = vadd.f32 %v728_v1, %v727_v63  ;;  %v1821_v63 = vld [vmem:[#allocation7 + $0x10] sm:$0xff]  }
 0x212   : > { %v645_v39 = vpop.xlane.xlu1 %644 }
 0x213   : > { %v2559_v5 = vsub.f32 %v2415_v9, %v673_v24  ;;  %v2562_v26 = vsub.f32 %v2418_v11, %v673_v24  ;;  %v674_v28 = vmul.f32 0.00390625, %v645_v39  ;;  %767 = vadd.xlane.f32.xlu1 %v766_v3  ;;  %v1822_v39 = vld [vmem:[#allocation7 + $0x58] sm:$0xff]  }
 0x215   : > { %v2565_v43 = vsub.f32 %v2421_v13, %v674_v28  ;;  %v2568_v40 = vsub.f32 %v2424_v15, %v674_v28  ;;  %v729_v45 = vmul.f32 %v2559_v5, %v2559_v5  ;;  %v730_v42 = vmul.f32 %v2562_v26, %v2562_v26  ;;  %v1817_v15 = vld [vmem:[#allocation7] sm:$0xff]  }
 0x216   : > { %1647 = vmatpush3.bf16.msra.mxu1 %v1817_v15 }
 0x217   : > { %v769_v46 = vadd.f32 %v730_v42, %v729_v45  ;;  %v731_v9 = vmul.f32 %v2565_v43, %v2565_v43  ;;  %v732_v11 = vmul.f32 %v2568_v40, %v2568_v40  ;;  %1648 = vmatprep.subr.bf16.mxu1 %v1818_v2  ;;  %v1826_v2 = vld [vmem:[#allocation7 + $0x68] sm:$0xff]  }
 0x218   : > { %v648_v47 = vpop.xlane.xlu0 %647 }
 0x219   : > { %v675_v13 = vmul.f32 0.00390625, %v648_v47  ;;  %770 = vadd.xlane.f32.xlu0 %v769_v46  ;;  %v772_v49 = vadd.f32 %v732_v11, %v731_v9  ;;  %v1823_v46 = vld [vmem:[#allocation7 + $0x18] sm:$0xff]   ;;  %v1824_v47 = vld [vmem:[#allocation7 + $0x60] sm:$0xff]  }
 0x21a   : > { %v651_v62 = vpop.xlane.xlu1 %650  ;;  %1649 = vmatpush3.bf16.msra.mxu1 %v1819_v59 }
 0x21b   : > { %v2579_v0 = vsub.f32 %v2431_v19, %v675_v13  ;;  %v2582_v53 = vsub.f32 %v2434_v21, %v675_v13  ;;  %v676_v55 = vmul.f32 0.00390625, %v651_v62  ;;  %773 = vadd.xlane.f32.xlu1 %v772_v49  ;;  %1650 = vmatprep.subr.bf16.mxu1 %v1820_v35  ;;  %v1825_v13 = vld [vmem:[#allocation7 + $0x20] sm:$0xff]   ;;  %v1830_v35 = vld [vmem:[#allocation7 + $0x78] sm:$0xff]  }
 0x21d   : > { %v2585_v4 = vsub.f32 %v2437_v23, %v676_v55  ;;  %v2588_v57 = vsub.f32 %v2440_v25, %v676_v55  ;;  %v733_v7 = vmul.f32 %v2579_v0, %v2579_v0  ;;  %v734_v19 = vmul.f32 %v2582_v53, %v2582_v53 }
 0x21e   : > { %1651 = vmatpush3.bf16.msra.mxu1 %v1821_v63 }
 0x21f   : > { %v775_v21 = vadd.f32 %v734_v19, %v733_v7  ;;  %v735_v10 = vmul.f32 %v2585_v4, %v2585_v4  ;;  %v736_v17 = vmul.f32 %v2588_v57, %v2588_v57  ;;  %1652 = vmatprep.subr.bf16.mxu1 %v1822_v39 }
 0x220   : > { %v654_v23 = vpop.xlane.xlu0 %653 }
 0x221   : > { %v677_v25 = vmul.f32 0.00390625, %v654_v23  ;;  %776 = vadd.xlane.f32.xlu0 %v775_v21  ;;  %v778_v18 = vadd.f32 %v736_v17, %v735_v10  ;;  %v1827_v21 = vld [vmem:[#allocation7 + $0x28] sm:$0xff]   ;;  %v1829_v23 = vld [vmem:[#allocation7 + $0x30] sm:$0xff]  }
 0x222   : > { %v657_v1 = vpop.xlane.xlu1 %656  ;;  %1653 = vmatpush3.bf16.msra.mxu1 %v1823_v46 }
 0x223   : > { %v2599_v38 = vsub.f32 %v2447_v34, %v677_v25  ;;  %v2602_v24 = vsub.f32 %v2450_v37, %v677_v25  ;;  %v678_v3 = vmul.f32 0.00390625, %v657_v1  ;;  %779 = vadd.xlane.f32.xlu1 %v778_v18  ;;  %1654 = vmatprep.subr.bf16.mxu1 %v1824_v47  ;;  %v1831_v25 = vld [vmem:[#allocation7 + $0x38] sm:$0xff]  }
 0x225   : > { %v2605_v28 = vsub.f32 %v2453_v41, %v678_v3  ;;  %v2608_v45 = vsub.f32 %v2456_v44, %v678_v3  ;;  %v737_v42 = vmul.f32 %v2599_v38, %v2599_v38  ;;  %v738_v34 = vmul.f32 %v2602_v24, %v2602_v24 }
 0x226   : > { %1655 = vmatpush3.bf16.msra.mxu1 %v1825_v13 }
 0x227   : > { %v781_v37 = vadd.f32 %v738_v34, %v737_v42  ;;  %v739_v9 = vmul.f32 %v2605_v28, %v2605_v28  ;;  %v740_v11 = vmul.f32 %v2608_v45, %v2608_v45  ;;  %1656 = vmatprep.subr.bf16.mxu1 %v1826_v2 }
 0x228   : > { %v660_v41 = vpop.xlane.xlu0 %659 }
 0x229   : > { %v679_v44 = vmul.f32 0.00390625, %v660_v41  ;;  %782 = vadd.xlane.f32.xlu0 %v781_v37  ;;  %v784_v52 = vadd.f32 %v740_v11, %v739_v9  ;;  %v614_v37 = vld [vmem:[%s3023_s3] sm:$0x3] }
 0x22a   : > { %v663_v49 = vpop.xlane.xlu1 %662  ;;  %1657 = vmatpush3.bf16.msra.mxu1 %v1827_v21  ;;  %v615_v41 = vld [vmem:[%s3024_s4] sm:$0x3] }
 0x22b   : > { %v2619_v15 = vsub.f32 %v2463_v51, %v679_v44  ;;  %v2622_v62 = vsub.f32 %v2466_v54, %v679_v44  ;;  %v680_v55 = vmul.f32 0.00390625, %v663_v49  ;;  %785 = vadd.xlane.f32.xlu1 %v784_v52  ;;  %v2645_v44 = vrot.slane %v614_v37, %v2337_v27 }
 0x22c   : > { %v2648_v52 = vrot.slane %v614_v37, %v2342_v29  ;;  %v2656_v21 = vrot.slane %v615_v41, %v2342_v29 }
 0x22d   : > { %v2625_v7 = vsub.f32 %v2469_v58, %v680_v55  ;;  %v2628_v19 = vsub.f32 %v2472_v61, %v680_v55  ;;  %v741_v59 = vmul.f32 %v2619_v15, %v2619_v15  ;;  %v742_v51 = vmul.f32 %v2622_v62, %v2622_v62  ;;  %v1828_v58 = vld [vmem:[#allocation7 + $0x70] sm:$0xff]  }
 0x22e   : > { %1658 = vmatprep.subr.bf16.mxu1 %v1828_v58  ;;  %v2651_v55 = vrot.slane %v615_v41, %v2337_v27 }
 0x22f   : > { %v787_v54 = vadd.f32 %v742_v51, %v741_v59  ;;  %v743_v10 = vmul.f32 %v2625_v7, %v2625_v7  ;;  %v744_v17 = vmul.f32 %v2628_v19, %v2628_v19  ;;  %1659 = vmatpush3.bf16.msra.mxu1 %v1829_v23 }
 0x230   : > { %1660 = vmatprep.subr.bf16.mxu1 %v1830_v35 }
 0x231   : > { %788 = vadd.xlane.f32.xlu0 %v787_v54  ;;  %v790_v61 = vadd.f32 %v744_v17, %v743_v10 }
 0x233   : > { %791 = vadd.xlane.f32.xlu1 %v790_v61  ;;  %1661 = vmatpush3.bf16.msra.mxu1 %v1831_v25 }
 0x286   : > { %v747_v18 = vpop.xlane.xlu0 %746 }
 0x287   : > { %v793_v63 = vmul.f32 0.00390625, %v747_v18 }
 0x289   : > { %v809_v1 = vadd.f32 1e-05, %v793_v63 }
 0x28a   : > { %v750_v3 = vpop.xlane.xlu1 %749 }
 0x28b   : > { %1832 = vrsqrt.f32 %v809_v1  ;;  %v794_v39 = vmul.f32 0.00390625, %v750_v3 }
 0x28d   : > { %v810_v42 = vadd.f32 1e-05, %v794_v39 }
 0x28e   : > { %v753_v34 = vpop.xlane.xlu0 %752 }
 0x28f   : > { %1834 = vrsqrt.f32 %v810_v42  ;;  %v795_v46 = vmul.f32 0.00390625, %v753_v34 }
 0x291   : > { %v811_v9 = vadd.f32 1e-05, %v795_v46 }
 0x292   : > { %v756_v11 = vpop.xlane.xlu1 %755 }
 0x293   : > { %1836 = vrsqrt.f32 %v811_v9  ;;  %v796_v47 = vmul.f32 0.00390625, %v756_v11 }
 0x295   : > { %v1833_v13 = vpop.eup %1832  ;;  %v812_v49 = vadd.f32 1e-05, %v796_v47 }
 0x296   : > { %v841_v2 = vmul.f32 %v1833_v13, %v2479_v6  ;;  %v759_v59 = vpop.xlane.xlu0 %758  ;;  %v842_v51 = vmul.f32 %v1833_v13, %v2482_v30 }
 0x297   : > { %1838 = vrsqrt.f32 %v812_v49  ;;  %v797_v54 = vmul.f32 0.00390625, %v759_v59 }
 0x298   : > { %v762_v10 = vpop.xlane.xlu1 %761  ;;  %v885_v17 = vmul.f32 %v2648_v52, %v842_v51  ;;  %v884_v58 = vmul.f32 %v2645_v44, %v841_v2 }
 0x299   : > { %v1835_v61 = vpop.eup %1834  ;;  %v813_v23 = vadd.f32 1e-05, %v797_v54  ;;  %v798_v35 = vmul.f32 0.00390625, %v762_v10 }
 0x29a   : > { %v843_v27 = vmul.f32 %v1835_v61, %v2489_v12  ;;  %v844_v6 = vmul.f32 %v1835_v61, %v2492_v14  ;;  %v928_v25 = vadd.f32 %v2656_v21, %v885_v17  ;;  %v927_v30 = vadd.f32 %v2651_v55, %v884_v58 }
 0x29b   : > { %v814_v29 = vadd.f32 1e-05, %v798_v35  ;;  %1840 = vrsqrt.f32 %v813_v23 }
 0x29c   : > { %v887_v18 = vmul.f32 %v2648_v52, %v844_v6  ;;  %v960_v63 = vmul.f32 %v928_v25, %v928_v25  ;;  %v886_v1 = vmul.f32 %v2645_v44, %v843_v27  ;;  %v959_v39 = vmul.f32 %v927_v30, %v927_v30 }
 0x29d   : > { %v1837_v3 = vpop.eup %1836  ;;  %1842 = vrsqrt.f32 %v814_v29  ;;  %v2672_v58 = vmul.f32 0.5, %v928_v25 }
 0x29e   : > { %v846_v42 = vmul.f32 %v1837_v3, %v2502_v22  ;;  %v765_v34 = vpop.xlane.xlu0 %764  ;;  %v930_v12 = vadd.f32 %v2656_v21, %v887_v18  ;;  %v1024_v14 = vmul.f32 0.035677407, %v960_v63  ;;  %v929_v37 = vadd.f32 %v2651_v55, %v886_v1 }
 0x29f   : > { %v799_v46 = vmul.f32 0.00390625, %v765_v34  ;;  %v1023_v9 = vmul.f32 0.035677407, %v959_v39  ;;  %v845_v2 = vmul.f32 %v1837_v3, %v2499_v20 }
 0x2a0   : > { %v768_v11 = vpop.xlane.xlu1 %767  ;;  %v962_v41 = vmul.f32 %v930_v12, %v930_v12  ;;  %v1056_v47 = vadd.f32 0.7978846, %v1024_v14  ;;  %v889_v13 = vmul.f32 %v2648_v52, %v846_v42  ;;  %v961_v51 = vmul.f32 %v929_v37, %v929_v37 }
 0x2a1   : > { %v1839_v49 = vpop.eup %1838  ;;  %v815_v59 = vadd.f32 1e-05, %v799_v46  ;;  %v800_v54 = vmul.f32 0.00390625, %v768_v11  ;;  %v1055_v23 = vadd.f32 0.7978846, %v1023_v9  ;;  %v888_v39 = vmul.f32 %v2645_v44, %v845_v2 }
 0x2a2   : > { %v848_v22 = vmul.f32 %v1839_v49, %v2512_v36  ;;  %v1026_v10 = vmul.f32 0.035677407, %v962_v41  ;;  %v1088_v17 = vmul.f32 %v1056_v47, %v928_v25  ;;  %v1025_v61 = vmul.f32 0.035677407, %v961_v51 }
 0x2a3   : > { %v932_v6 = vadd.f32 %v2656_v21, %v889_v13  ;;  %v847_v29 = vmul.f32 %v1839_v49, %v2509_v32  ;;  %v1087_v18 = vmul.f32 %v1055_v23, %v927_v30  ;;  %v816_v36 = vadd.f32 1e-05, %v800_v54 }
 0x2a4   : > { %v1058_v35 = vadd.f32 0.7978846, %v1026_v10  ;;  %1844 = vtanh.f32 %v1088_v17  ;;  %v891_v27 = vmul.f32 %v2648_v52, %v848_v22  ;;  %v1057_v20 = vadd.f32 0.7978846, %v1025_v61 }
 0x2a5   : > { %1846 = vrsqrt.f32 %v815_v59  ;;  %v1841_v63 = vpop.eup %1840  ;;  %v964_v46 = vmul.f32 %v932_v6, %v932_v6  ;;  %v994_v11 = vmul.f32 0.5, %v930_v12  ;;  %v991_v32 = vmul.f32 0.5, %v927_v30 }
 0x2a6   : > { %v771_v1 = vpop.xlane.xlu0 %770  ;;  %v1090_v3 = vmul.f32 %v1058_v35, %v930_v12  ;;  %v934_v25 = vadd.f32 %v2656_v21, %v891_v27  ;;  %v1089_v14 = vmul.f32 %v1057_v20, %v929_v37  ;;  %1848 = vtanh.f32 %v1087_v18 }
 0x2a7   : > { %v1843_v42 = vpop.eup %1842  ;;  %v801_v34 = vmul.f32 0.00390625, %v771_v1  ;;  %v850_v47 = vmul.f32 %v1841_v63, %v2522_v48  ;;  %v1028_v51 = vmul.f32 0.035677407, %v964_v46  ;;  %v890_v2 = vmul.f32 %v2645_v44, %v847_v29 }
 0x2a8   : > { %v774_v9 = vpop.xlane.xlu1 %773  ;;  %1850 = vtanh.f32 %v1090_v3  ;;  %v966_v41 = vmul.f32 %v934_v25, %v934_v25  ;;  %v852_v13 = vmul.f32 %v1843_v42, %v2528_v60  ;;  %v993_v10 = vmul.f32 0.5, %v929_v37 }
 0x2a9   : > { %v802_v49 = vmul.f32 0.00390625, %v774_v9  ;;  %1852 = vtanh.f32 %v1089_v14  ;;  %v817_v59 = vadd.f32 1e-05, %v801_v34  ;;  %v931_v17 = vadd.f32 %v2651_v55, %v888_v39 }
 0x2aa   : > { %v1030_v22 = vmul.f32 0.035677407, %v966_v41  ;;  %1854 = vrsqrt.f32 %v816_v36  ;;  %v2684_v12 = vmul.f32 %v1841_v63, %v2519_v50  ;;  %v1060_v30 = vadd.f32 0.7978846, %v1028_v51 }
 0x2ab   : > { %v818_v54 = vadd.f32 1e-05, %v802_v49  ;;  %v933_v48 = vadd.f32 %v2651_v55, %v890_v2  ;;  %v2688_v60 = vmul.f32 %v1843_v42, %v2525_v56  ;;  %v2690_v23 = vmul.f32 0.5, %v932_v6 }
 0x2ac   : > { %v1062_v61 = vadd.f32 0.7978846, %v1030_v22  ;;  %v963_v35 = vmul.f32 %v931_v17, %v931_v17  ;;  %v893_v27 = vmul.f32 %v2648_v52, %v850_v47  ;;  %1856 = vrsqrt.f32 %v817_v59 }
 0x2ad   : > { %v1092_v20 = vmul.f32 %v1060_v30, %v932_v6  ;;  %v895_v50 = vmul.f32 %v2648_v52, %v852_v13  ;;  %1858 = vrsqrt.f32 %v818_v54  ;;  %v2694_v1 = vmul.f32 0.5, %v934_v25 }
 0x2ae   : > { %v1845_v29 = vpop.eup %1844  ;;  %v777_v37 = vpop.xlane.xlu0 %776  ;;  %v1094_v18 = vmul.f32 %v1062_v61, %v934_v25  ;;  %v965_v3 = vmul.f32 %v933_v48, %v933_v48  ;;  %v2696_v42 = vmul.f32 0.5, %v931_v17  ;;  %v1027_v34 = vmul.f32 0.035677407, %v963_v35 }
 0x2af   : > { %v1847_v63 = vpop.eup %1846  ;;  %v803_v36 = vmul.f32 0.00390625, %v777_v37  ;;  %v1152_v39 = vadd.f32 1.0, %v1845_v29  ;;  %1860 = vtanh.f32 %v1092_v20  ;;  %v936_v6 = vadd.f32 %v2656_v21, %v893_v27 }
 0x2b0   : > { %v780_v56 = vpop.xlane.xlu1 %779  ;;  %v1849_v14 = vpop.eup %1848  ;;  %1862 = vtanh.f32 %v1094_v18  ;;  %v1029_v13 = vmul.f32 0.035677407, %v965_v3  ;;  %v1059_v49 = vadd.f32 0.7978846, %v1027_v34  ;;  %v2700_v25 = vadd.f32 %v2656_v21, %v895_v50 }
 0x2b1   : > { %v819_v46 = vadd.f32 1e-05, %v803_v36  ;;  %v804_v9 = vmul.f32 0.00390625, %v780_v56  ;;  %v1151_v47 = vadd.f32 1.0, %v1849_v14  ;;  %v2703_v51 = vmul.f32 %v1847_v63, %v2539_v8 }
 0x2b2   : > { %v1851_v41 = vpop.eup %1850  ;;  %v854_v22 = vmul.f32 %v1847_v63, %v2542_v31  ;;  %v1184_v30 = vmul.f32 %v1152_v39, %v2672_v58  ;;  %v1061_v35 = vadd.f32 0.7978846, %v1029_v13  ;;  %v1091_v27 = vmul.f32 %v1059_v49, %v931_v17 }
 0x2b3   : > { %v1853_v59 = vpop.eup %1852  ;;  %v820_v2 = vadd.f32 1e-05, %v804_v9  ;;  %v1154_v54 = vadd.f32 1.0, %v1851_v41  ;;  %1864 = vrsqrt.f32 %v819_v46  ;;  %v1183_v20 = vmul.f32 %v1151_v47, %v991_v32 }
 0x2b4   : > { %v1153_v61 = vadd.f32 1.0, %v1853_v59  ;;  %v1855_v29 = vpop.eup %1854  ;;  %v968_v18 = vmul.f32 %v936_v6, %v936_v6  ;;  %v1093_v3 = vmul.f32 %v1061_v35, %v933_v48  ;;  %v970_v8 = vmul.f32 %v2700_v25, %v2700_v25 }
 0x2b5   : > { %v1186_v37 = vmul.f32 %v1154_v54, %v994_v11  ;;  %1866 = vrsqrt.f32 %v820_v2  ;;  %v2709_v56 = vmul.f32 0.5, %v933_v48  ;;  %v2712_v17 = vmul.f32 %v1855_v29, %v2545_v16 }
 0x2b6   : > { %v783_v50 = vpop.xlane.xlu0 %782  ;;  %v1185_v36 = vmul.f32 %v1153_v61, %v993_v10  ;;  %1868 = vtanh.f32 %v1091_v27  ;;  %v1857_v58 = vpop.eup %1856  ;;  %v856_v11 = vmul.f32 %v1855_v29, %v2548_v33  ;;  %v1032_v46 = vmul.f32 0.035677407, %v968_v18 }
 0x2b7   : > { %v805_v31 = vmul.f32 0.00390625, %v783_v50  ;;  %v1216_v63 = vpack.c.bf16 %v1186_v37, %v1184_v30  ;;  %1870 = vtanh.f32 %v1093_v3  ;;  %v1859_v34 = vpop.eup %1858  ;;  %v892_v9 = vmul.f32 %v2645_v44, %v2684_v12 }
 0x2b8   : > { %v786_v32 = vpop.xlane.xlu1 %785  ;;  %v1215_v39 = vpack.c.bf16 %v1185_v36, %v1183_v20  ;;  %v2717_v41 = vmul.f32 0.5, %v936_v6  ;;  %v1034_v47 = vmul.f32 0.035677407, %v970_v8  ;;  %v894_v16 = vmul.f32 %v2645_v44, %v2688_v60 }
 0x2b9   : > { %v821_v10 = vadd.f32 1e-05, %v805_v31  ;;  %v806_v14 = vmul.f32 0.00390625, %v786_v32  ;;  %1398 = vmatprep.mubr.bf16.mxu1 %v1216_v63  ;;  %v1861_v48 = vpop.eup %1860  ;;  %v897_v33 = vmul.f32 %v2648_v52, %v854_v22  ;;  %v2723_v49 = vmul.f32 %v1857_v58, %v2559_v5 }
 0x2ba   : > { %1399 = vmatmul.mubr.bf16.vlgmr.msra.gmra.mrb[0].mxu1 %v1215_v39  ;;  %v1863_v13 = vpop.eup %1862  ;;  %v2726_v59 = vmul.f32 %v1857_v58, %v2562_v26  ;;  %v1156_v2 = vadd.f32 1.0, %v1861_v48  ;;  %v1064_v54 = vadd.f32 0.7978846, %v1032_v46  ;;  %v1066_v30 = vadd.f32 0.7978846, %v1034_v47 }
 0x2bb   : > { %v1158_v12 = vadd.f32 1.0, %v1863_v13  ;;  %v935_v61 = vadd.f32 %v2651_v55, %v892_v9  ;;  %v937_v35 = vadd.f32 %v2651_v55, %v894_v16  ;;  %1872 = vrsqrt.f32 %v821_v10 }
 0x2bc   : > { %v822_v27 = vadd.f32 1e-05, %v806_v14  ;;  %v1096_v60 = vmul.f32 %v1064_v54, %v936_v6  ;;  %v899_v22 = vmul.f32 %v2648_v52, %v856_v11  ;;  %v1188_v5 = vmul.f32 %v1156_v2, %v2690_v23 }
 0x2bd   : > { %v1190_v37 = vmul.f32 %v1158_v12, %v2694_v1  ;;  %v1098_v26 = vmul.f32 %v1066_v30, %v2700_v25  ;;  %v2735_v20 = vadd.f32 %v2656_v21, %v897_v33  ;;  %v1865_v18 = vpop.eup %1864  ;;  %v967_v36 = vmul.f32 %v935_v61, %v935_v61 }
 0x2be   : > { %v789_v29 = vpop.xlane.xlu0 %788  ;;  %1874 = vtanh.f32 %v1096_v60  ;;  %v969_v3 = vmul.f32 %v937_v35, %v937_v35  ;;  %v2738_v6 = vmul.f32 %v1859_v34, %v2565_v43  ;;  %v1002_v23 = vmul.f32 0.5, %v2700_v25 }
 0x2bf   : > { %v807_v50 = vmul.f32 0.00390625, %v789_v29  ;;  %v1867_v8 = vpop.eup %1866  ;;  %v1218_v63 = vpack.c.bf16 %v1190_v37, %v1188_v5  ;;  %1876 = vtanh.f32 %v1098_v26  ;;  %v860_v58 = vmul.f32 %v1859_v34, %v2568_v40 }
 0x2c0   : > { %v792_v31 = vpop.xlane.xlu1 %791  ;;  %v1869_v1 = vpop.eup %1868  ;;  %1878 = vrsqrt.f32 %v822_v27  ;;  %v1031_v14 = vmul.f32 0.035677407, %v967_v36  ;;  %v1033_v46 = vmul.f32 0.035677407, %v969_v3  ;;  %v942_v9 = vadd.f32 %v2656_v21, %v899_v22 }
 0x2c1   : > { %v823_v11 = vadd.f32 1e-05, %v807_v50  ;;  %v808_v32 = vmul.f32 0.00390625, %v792_v31  ;;  %v1871_v39 = vpop.eup %1870  ;;  %1406 = vmatprep.mubr.bf16.mxu1 %v1218_v63  ;;  %v1155_v10 = vadd.f32 1.0, %v1869_v1  ;;  %v972_v25 = vmul.f32 %v2735_v20, %v2735_v20 }
 0x2c2   : > { %v1157_v48 = vadd.f32 1.0, %v1871_v39  ;;  %v2746_v47 = vmul.f32 %v1865_v18, %v2579_v0  ;;  %v1063_v40 = vadd.f32 0.7978846, %v1031_v14  ;;  %v1065_v34 = vadd.f32 0.7978846, %v1033_v46 }
 0x2c3   : > { %1880 = vrsqrt.f32 %v823_v11  ;;  %v824_v43 = vadd.f32 1e-05, %v808_v32  ;;  %v974_v16 = vmul.f32 %v942_v9, %v942_v9  ;;  %v2749_v33 = vmul.f32 %v1865_v18, %v2582_v53 }
 0x2c4   : > { %v2752_v13 = vmul.f32 %v1867_v8, %v2585_v4  ;;  %v1187_v2 = vmul.f32 %v1155_v10, %v2696_v42  ;;  %v1189_v54 = vmul.f32 %v1157_v48, %v2709_v56  ;;  %v2757_v12 = vmul.f32 %v1867_v8, %v2588_v57 }
 0x2c5   : > { %1882 = vrsqrt.f32 %v824_v43  ;;  %v1095_v30 = vmul.f32 %v1063_v40, %v935_v61  ;;  %v1097_v0 = vmul.f32 %v1065_v34, %v937_v35  ;;  %v1873_v27 = vpop.eup %1872  ;;  %v1036_v22 = vmul.f32 0.035677407, %v972_v25 }
 0x2c6   : > { %v1217_v60 = vpack.c.bf16 %v1189_v54, %v1187_v2  ;;  %v1038_v29 = vmul.f32 0.035677407, %v974_v16  ;;  %v896_v53 = vmul.f32 %v2645_v44, %v2703_v51  ;;  %v999_v5 = vmul.f32 0.5, %v935_v61 }
 0x2c7   : > { %v2761_v4 = vmul.f32 0.5, %v937_v35  ;;  %1884 = vtanh.f32 %v1095_v30  ;;  %v898_v42 = vmul.f32 %v2645_v44, %v2712_v17  ;;  %v1068_v57 = vadd.f32 0.7978846, %v1036_v22 }
 0x2c8   : > { %v1875_v56 = vpop.eup %1874  ;;  %1407 = vmatmul.mubr.bf16.gmra.mrb[4].mxu1 %v1217_v60  ;;  %1886 = vtanh.f32 %v1097_v0  ;;  %v1070_v37 = vadd.f32 0.7978846, %v1038_v29  ;;  %v939_v26 = vadd.f32 %v2651_v55, %v896_v53  ;;  %v901_v51 = vmul.f32 %v2648_v52, %v2726_v59 }
 0x2c9   : > { %v1877_v18 = vpop.eup %1876  ;;  %v1160_v50 = vadd.f32 1.0, %v1875_v56  ;;  %v941_v36 = vadd.f32 %v2651_v55, %v898_v42  ;;  %v903_v61 = vmul.f32 %v2648_v52, %v860_v58  ;;  %v1100_v17 = vmul.f32 %v1068_v57, %v2735_v20 }
 0x2ca   : > { %v1879_v35 = vpop.eup %1878  ;;  %v1162_v3 = vadd.f32 1.0, %v1877_v18  ;;  %v1102_v8 = vmul.f32 %v1070_v37, %v942_v9  ;;  %v971_v31 = vmul.f32 %v939_v26, %v939_v26  ;;  %v2773_v1 = vmul.f32 0.5, %v2735_v20 }
 0x2cb   : > { %v1192_v63 = vmul.f32 %v1160_v50, %v2717_v41  ;;  %v2775_v11 = vmul.f32 0.5, %v942_v9  ;;  %v973_v32 = vmul.f32 %v941_v36, %v941_v36  ;;  %1888 = vtanh.f32 %v1100_v17 }
 0x2cc   : > { %v1194_v10 = vmul.f32 %v1162_v3, %v1002_v23  ;;  %v1035_v59 = vmul.f32 0.035677407, %v971_v31  ;;  %v944_v58 = vadd.f32 %v2656_v21, %v901_v51  ;;  %1890 = vtanh.f32 %v1102_v8 }
 0x2cd   : > { %v1881_v39 = vpop.eup %1880  ;;  %v1037_v43 = vmul.f32 0.035677407, %v973_v32  ;;  %v2781_v20 = vadd.f32 %v2656_v21, %v903_v61  ;;  %v2784_v40 = vmul.f32 %v1873_v27, %v2599_v38  ;;  %v2787_v23 = vmul.f32 %v1873_v27, %v2602_v24 }
 0x2ce   : > { %v869_v14 = vmul.f32 %v1881_v39, %v2619_v15  ;;  %v870_v46 = vmul.f32 %v1881_v39, %v2622_v62  ;;  %v1220_v48 = vpack.c.bf16 %v1194_v10, %v1192_v63  ;;  %v1067_v41 = vadd.f32 0.7978846, %v1035_v59 }
 0x2cf   : > { %v976_v9 = vmul.f32 %v944_v58, %v944_v58  ;;  %v1883_v25 = vpop.eup %1882  ;;  %v2790_v34 = vmul.f32 %v1879_v35, %v2605_v28  ;;  %v2793_v15 = vmul.f32 %v1879_v35, %v2608_v45  ;;  %v2795_v62 = vmul.f32 0.5, %v939_v26 }
 0x2d0   : > { %1414 = vmatprep.mubr.bf16.mxu1 %v1220_v48  ;;  %v1069_v16 = vadd.f32 0.7978846, %v1037_v43  ;;  %v1099_v2 = vmul.f32 %v1067_v41, %v939_v26  ;;  %v978_v54 = vmul.f32 %v2781_v20, %v2781_v20  ;;  %v2800_v38 = vmul.f32 %v2645_v44, %v869_v14 }
 0x2d1   : > { %v1885_v30 = vpop.eup %1884  ;;  %v2803_v24 = vmul.f32 %v2648_v52, %v870_v46  ;;  %v2805_v28 = vmul.f32 0.5, %v941_v36  ;;  %v1040_v0 = vmul.f32 0.035677407, %v976_v9  ;;  %v900_v42 = vmul.f32 %v2645_v44, %v2723_v49 }
 0x2d2   : > { %v1887_v45 = vpop.eup %1886  ;;  %v1159_v27 = vadd.f32 1.0, %v1885_v30  ;;  %v1101_v60 = vmul.f32 %v1069_v16, %v941_v36  ;;  %1892 = vtanh.f32 %v1099_v2  ;;  %v1042_v22 = vmul.f32 0.035677407, %v978_v54 }
 0x2d3   : > { %v1161_v29 = vadd.f32 1.0, %v1887_v45  ;;  %v1072_v53 = vadd.f32 0.7978846, %v1040_v0  ;;  %v902_v56 = vmul.f32 %v2645_v44, %v2738_v6  ;;  %v905_v26 = vmul.f32 %v2648_v52, %v2749_v33 }
 0x2d4   : > { %v1191_v57 = vmul.f32 %v1159_v27, %v999_v5  ;;  %1894 = vtanh.f32 %v1101_v60  ;;  %v1074_v37 = vadd.f32 0.7978846, %v1042_v22  ;;  %v2815_v36 = vadd.f32 %v2651_v55, %v900_v42 }
 0x2d5   : > { %v1193_v18 = vmul.f32 %v1161_v29, %v2761_v4  ;;  %v1104_v50 = vmul.f32 %v1072_v53, %v944_v58  ;;  %v2818_v51 = vadd.f32 %v2651_v55, %v902_v56  ;;  %v1889_v61 = vpop.eup %1888  ;;  %v871_v49 = vmul.f32 %v1883_v25, %v2625_v7 }
 0x2d6   : > { %v1106_v6 = vmul.f32 %v1074_v37, %v2781_v20  ;;  %v907_v5 = vmul.f32 %v2648_v52, %v2757_v12  ;;  %v2825_v35 = vadd.f32 %v2656_v21, %v905_v26  ;;  %v1891_v33 = vpop.eup %1890  ;;  %v1164_v3 = vadd.f32 1.0, %v1889_v61 }
 0x2d7   : > { %v1219_v4 = vpack.c.bf16 %v1193_v18, %v1191_v57  ;;  %1896 = vtanh.f32 %v1104_v50  ;;  %v975_v17 = vmul.f32 %v2815_v36, %v2815_v36  ;;  %v1166_v8 = vadd.f32 1.0, %v1891_v33 }
 0x2d8   : > { %1898 = vtanh.f32 %v1106_v6  ;;  %v977_v7 = vmul.f32 %v2818_v51, %v2818_v51  ;;  %v904_v31 = vmul.f32 %v2645_v44, %v2746_v47  ;;  %v872_v12 = vmul.f32 %v1883_v25, %v2628_v19 }
 0x2d9   : > { %1415 = vmatmul.mubr.bf16.gmra.mrb[8].mxu1 %v1219_v4  ;;  %v1008_v63 = vmul.f32 0.5, %v944_v58  ;;  %v1039_v32 = vmul.f32 0.035677407, %v975_v17  ;;  %v2835_v39 = vadd.f32 %v2656_v21, %v907_v5  ;;  %v1196_v10 = vmul.f32 %v1164_v3, %v2773_v1 }
 0x2da   : > { %v1198_v59 = vmul.f32 %v1166_v8, %v2775_v11  ;;  %v1041_v14 = vmul.f32 0.035677407, %v977_v7  ;;  %v980_v46 = vmul.f32 %v2825_v35, %v2825_v35  ;;  %v2842_v43 = vmul.f32 %v2645_v44, %v871_v49 }
 0x2db   : > { %v1071_v47 = vadd.f32 0.7978846, %v1039_v32  ;;  %v982_v19 = vmul.f32 %v2835_v39, %v2835_v39  ;;  %v906_v58 = vmul.f32 %v2645_v44, %v2752_v13  ;;  %v2849_v11 = vadd.f32 %v2651_v55, %v904_v31 }
 0x2dc   : > { %v1893_v48 = vpop.eup %1892  ;;  %v1222_v41 = vpack.c.bf16 %v1198_v59, %v1196_v10  ;;  %v1073_v9 = vadd.f32 0.7978846, %v1041_v14  ;;  %v1044_v1 = vmul.f32 0.035677407, %v980_v46  ;;  %v915_v0 = vmul.f32 %v2648_v52, %v872_v12 }
 0x2dd   : > { %v1163_v25 = vadd.f32 1.0, %v1893_v48  ;;  %v1103_v16 = vmul.f32 %v1071_v47, %v2815_v36  ;;  %v1046_v2 = vmul.f32 0.035677407, %v982_v19  ;;  %v2853_v54 = vadd.f32 %v2651_v55, %v906_v58 }
 0x2de   : > { %v1895_v30 = vpop.eup %1894  ;;  %1422 = vmatprep.mubr.bf16.mxu1 %v1222_v41  ;;  %v1105_v13 = vmul.f32 %v1073_v9, %v2818_v51  ;;  %v1076_v45 = vadd.f32 0.7978846, %v1044_v1  ;;  %v979_v27 = vmul.f32 %v2849_v11, %v2849_v11  ;;  %v1010_v22 = vmul.f32 0.5, %v2781_v20 }
 0x2df   : > { %v1165_v60 = vadd.f32 1.0, %v1895_v30  ;;  %1900 = vtanh.f32 %v1103_v16  ;;  %v1078_v29 = vadd.f32 0.7978846, %v1046_v2  ;;  %v1195_v53 = vmul.f32 %v1163_v25, %v2795_v62 }
 0x2e0   : > { %1902 = vtanh.f32 %v1105_v13  ;;  %v1108_v42 = vmul.f32 %v1076_v45, %v2825_v35  ;;  %v981_v56 = vmul.f32 %v2853_v54, %v2853_v54  ;;  %v1043_v18 = vmul.f32 0.035677407, %v979_v27 }
 0x2e1   : > { %v1897_v57 = vpop.eup %1896  ;;  %v1197_v37 = vmul.f32 %v1165_v60, %v2805_v28  ;;  %v1110_v26 = vmul.f32 %v1078_v29, %v2835_v39  ;;  %v909_v50 = vmul.f32 %v2648_v52, %v2787_v23  ;;  %v911_v62 = vmul.f32 %v2648_v52, %v2793_v15 }
 0x2e2   : > { %v1899_v20 = vpop.eup %1898  ;;  %v1168_v61 = vadd.f32 1.0, %v1897_v57  ;;  %1904 = vtanh.f32 %v1108_v42  ;;  %v1045_v49 = vmul.f32 0.035677407, %v981_v56  ;;  %v1075_v33 = vadd.f32 0.7978846, %v1043_v18 }
 0x2e3   : > { %v1221_v6 = vpack.c.bf16 %v1197_v37, %v1195_v53  ;;  %v1170_v5 = vadd.f32 1.0, %v1899_v20  ;;  %1906 = vtanh.f32 %v1110_v26  ;;  %v2871_v28 = vadd.f32 %v2656_v21, %v909_v50 }
 0x2e4   : > { %v1200_v4 = vmul.f32 %v1168_v61, %v1008_v63  ;;  %v1077_v3 = vadd.f32 0.7978846, %v1045_v49  ;;  %v2874_v17 = vadd.f32 %v2656_v21, %v911_v62  ;;  %v1107_v8 = vmul.f32 %v1075_v33, %v2849_v11 }
 0x2e5   : > { %1423 = vmatmul.mubr.bf16.gmra.mrb[12].mxu1 %v1221_v6  ;;  %v1202_v23 = vmul.f32 %v1170_v5, %v1010_v22  ;;  %v908_v7 = vmul.f32 %v2645_v44, %v2784_v40  ;;  %v910_v52 = vmul.f32 %v2645_v44, %v2790_v34  ;;  %v1007_v15 = vmul.f32 0.5, %v2815_v36 }
 0x2e6   : > { %v1109_v31 = vmul.f32 %v1077_v3, %v2853_v54  ;;  %v984_v12 = vmul.f32 %v2871_v28, %v2871_v28  ;;  %v986_v63 = vmul.f32 %v2874_v17, %v2874_v17  ;;  %v1009_v10 = vmul.f32 0.5, %v2818_v51 }
 0x2e7   : > { %v1224_v32 = vpack.c.bf16 %v1202_v23, %v1200_v4  ;;  %1908 = vtanh.f32 %v1107_v8  ;;  %v2889_v59 = vadd.f32 %v2651_v55, %v908_v7  ;;  %v2892_v34 = vadd.f32 %v2651_v55, %v910_v52 }
 0x2e8   : > { %1910 = vtanh.f32 %v1109_v31  ;;  %v1048_v40 = vmul.f32 0.035677407, %v984_v12  ;;  %v1050_v44 = vmul.f32 0.035677407, %v986_v63  ;;  %v1012_v14 = vmul.f32 0.5, %v2825_v35 }
 0x2e9   : > { %v1901_v36 = vpop.eup %1900  ;;  %1430 = vmatprep.mubr.bf16.mxu1 %v1224_v32  ;;  %v983_v46 = vmul.f32 %v2889_v59, %v2889_v59  ;;  %v2899_v51 = vadd.f32 %v2656_v21, %v2803_v24  ;;  %v2902_v47 = vadd.f32 %v2656_v21, %v915_v0  ;;  %v985_v9 = vmul.f32 %v2892_v34, %v2892_v34 }
 0x2ea   : > { %v1903_v19 = vpop.eup %1902  ;;  %v1167_v58 = vadd.f32 1.0, %v1901_v36  ;;  %v1080_v48 = vadd.f32 0.7978846, %v1048_v40  ;;  %v1082_v41 = vadd.f32 0.7978846, %v1050_v44  ;;  %v1014_v35 = vmul.f32 0.5, %v2835_v39 }
 0x2eb   : > { %v1169_v1 = vadd.f32 1.0, %v1903_v19  ;;  %v1047_v25 = vmul.f32 0.035677407, %v983_v46  ;;  %v988_v16 = vmul.f32 %v2899_v51, %v2899_v51  ;;  %v1049_v0 = vmul.f32 0.035677407, %v985_v9 }
 0x2ec   : > { %v1905_v2 = vpop.eup %1904  ;;  %v1199_v24 = vmul.f32 %v1167_v58, %v1007_v15  ;;  %v1112_v30 = vmul.f32 %v1080_v48, %v2871_v28  ;;  %v1114_v21 = vmul.f32 %v1082_v41, %v2874_v17  ;;  %v990_v22 = vmul.f32 %v2902_v47, %v2902_v47 }
 0x2ed   : > { %v1907_v13 = vpop.eup %1906  ;;  %v1201_v45 = vmul.f32 %v1169_v1, %v1009_v10  ;;  %v1172_v27 = vadd.f32 1.0, %v1905_v2  ;;  %v1079_v60 = vadd.f32 0.7978846, %v1047_v25  ;;  %v1011_v39 = vmul.f32 0.5, %v2849_v11 }
 0x2ee   : > { %v1174_v29 = vadd.f32 1.0, %v1907_v13  ;;  %1912 = vtanh.f32 %v1112_v30  ;;  %v1081_v53 = vadd.f32 0.7978846, %v1049_v0  ;;  %v1013_v56 = vmul.f32 0.5, %v2853_v54 }
 0x2ef   : > { %v1223_v42 = vpack.c.bf16 %v1201_v45, %v1199_v24  ;;  %1914 = vtanh.f32 %v1114_v21  ;;  %v1111_v57 = vmul.f32 %v1079_v60, %v2889_v59  ;;  %v1204_v37 = vmul.f32 %v1172_v27, %v1012_v14 }
 0x2f0   : > { %v1206_v26 = vmul.f32 %v1174_v29, %v1014_v35  ;;  %v1113_v18 = vmul.f32 %v1081_v53, %v2892_v34  ;;  %v1052_v50 = vmul.f32 0.035677407, %v988_v16  ;;  %v1054_v61 = vmul.f32 0.035677407, %v990_v22 }
 0x2f1   : > { %v1909_v20 = vpop.eup %1908  ;;  %1431 = vmatmul.mubr.bf16.gmra.mrb[16].mxu1 %v1223_v42  ;;  %1916 = vtanh.f32 %v1111_v57  ;;  %v955_v11 = vadd.f32 %v2651_v55, %v2800_v38  ;;  %v957_v49 = vadd.f32 %v2651_v55, %v2842_v43  ;;  %v1016_v36 = vmul.f32 0.5, %v2871_v28 }
 0x2f2   : > { %v1911_v62 = vpop.eup %1910  ;;  %v1226_v54 = vpack.c.bf16 %v1206_v26, %v1204_v37  ;;  %v1171_v6 = vadd.f32 1.0, %v1909_v20  ;;  %1918 = vtanh.f32 %v1113_v18  ;;  %v1084_v5 = vadd.f32 0.7978846, %v1052_v50 }
 0x2f3   : > { %v1173_v33 = vadd.f32 1.0, %v1911_v62  ;;  %v1086_v4 = vadd.f32 0.7978846, %v1054_v61  ;;  %v987_v3 = vmul.f32 %v955_v11, %v955_v11  ;;  %v989_v23 = vmul.f32 %v957_v49, %v957_v49 }
 0x2f4   : > { %1438 = vmatprep.mubr.bf16.mxu1 %v1226_v54  ;;  %v1203_v8 = vmul.f32 %v1171_v6, %v1011_v39  ;;  %v1116_v7 = vmul.f32 %v1084_v5, %v2899_v51  ;;  %v1018_v14 = vmul.f32 0.5, %v2874_v17  ;;  %v1015_v1 = vmul.f32 0.5, %v2889_v59 }
 0x2f5   : > { %v1205_v52 = vmul.f32 %v1173_v33, %v1013_v56  ;;  %v1118_v15 = vmul.f32 %v1086_v4, %v2902_v47  ;;  %v1051_v38 = vmul.f32 0.035677407, %v987_v3  ;;  %v1053_v31 = vmul.f32 0.035677407, %v989_v23 }
 0x2f6   : > { %1920 = vtanh.f32 %v1116_v7  ;;  %v1017_v35 = vmul.f32 0.5, %v2892_v34  ;;  %v1020_v0 = vmul.f32 0.5, %v2899_v51  ;;  %v1022_v13 = vmul.f32 0.5, %v2902_v47  ;;  %v2933_v47 = vld [vmem:[%s3026_s6] ss:$0 sm:$0xff] }
 0x2f7   : > { %v1225_v55 = vpack.c.bf16 %v1205_v52, %v1203_v8  ;;  %1922 = vtanh.f32 %v1118_v15  ;;  %v1083_v43 = vadd.f32 0.7978846, %v1051_v38  ;;  %v1085_v12 = vadd.f32 0.7978846, %v1053_v31 }
 0x2f8   : > { %v1913_v63 = vpop.eup %1912  ;;  %v1019_v39 = vmul.f32 0.5, %v955_v11  ;;  %v1021_v53 = vmul.f32 0.5, %v957_v49 }
 0x2f9   : > { %v1915_v32 = vpop.eup %1914  ;;  %1439 = vmatmul.mubr.bf16.gmra.mrb[20].mxu1 %v1225_v55  ;;  %v1176_v10 = vadd.f32 1.0, %v1913_v63  ;;  %v1115_v40 = vmul.f32 %v1083_v43, %v955_v11  ;;  %v1117_v44 = vmul.f32 %v1085_v12, %v957_v49 }
 0x2fa   : > { %v1178_v46 = vadd.f32 1.0, %v1915_v32 }
 0x2fb   : > { %v1917_v19 = vpop.eup %1916  ;;  %1924 = vtanh.f32 %v1115_v40  ;;  %v1208_v48 = vmul.f32 %v1176_v10, %v1016_v36 }
 0x2fc   : > { %v1919_v58 = vpop.eup %1918  ;;  %v1210_v41 = vmul.f32 %v1178_v46, %v1018_v14  ;;  %v1175_v9 = vadd.f32 1.0, %v1917_v19  ;;  %1926 = vtanh.f32 %v1117_v44 }
 0x2fd   : > { %v1177_v25 = vadd.f32 1.0, %v1919_v58 }
 0x2fe   : > { %v1228_v16 = vpack.c.bf16 %v1210_v41, %v1208_v48  ;;  %v1207_v2 = vmul.f32 %v1175_v9, %v1015_v1 }
 0x2ff   : > { %v1209_v24 = vmul.f32 %v1177_v25, %v1017_v35 }
 0x300   : > { %v1921_v30 = vpop.eup %1920  ;;  %1446 = vmatprep.mubr.bf16.mxu1 %v1228_v16 }
 0x301   : > { %v1923_v28 = vpop.eup %1922  ;;  %v1227_v17 = vpack.c.bf16 %v1209_v24, %v1207_v2  ;;  %v1180_v21 = vadd.f32 1.0, %v1921_v30 }
 0x302   : > { %v1182_v45 = vadd.f32 1.0, %v1923_v28 }
 0x303   : > { %1447 = vmatmul.mubr.bf16.gmra.mrb[24].mxu1 %v1227_v17  ;;  %v1212_v27 = vmul.f32 %v1180_v21, %v1020_v0 }
 0x304   : > { %v1214_v59 = vmul.f32 %v1182_v45, %v1022_v13 }
 0x305   : > { %v1925_v60 = vpop.eup %1924 }
 0x306   : > { %v1927_v34 = vpop.eup %1926  ;;  %v1230_v22 = vpack.c.bf16 %v1214_v59, %v1212_v27  ;;  %v1179_v29 = vadd.f32 1.0, %v1925_v60 }
 0x307   : > { %v1181_v42 = vadd.f32 1.0, %v1927_v34 }
 0x308   : > { %1454 = vmatprep.mubr.bf16.mxu1 %v1230_v22  ;;  %v1211_v56 = vmul.f32 %v1179_v29, %v1019_v39 }
 0x309   : > { %v1213_v57 = vmul.f32 %v1181_v42, %v1021_v53 }
 0x30b   : > { %v1229_v37 = vpack.c.bf16 %v1213_v57, %v1211_v56 }
 0x30d   : > { %1455 = vmatmul.mubr.bf16.gmra.mrb[28].mxu1 %v1229_v37 }
 0x38d   : > { %v1662_v51 = vpop.f32.mrb[0].mxu1 }
 0x38e   : > { %v1663_v26 = vpop.f32.mrb[1].mxu1 }
 0x38f   : > { %v1664_v18 = vadd.f32 %v1663_v26, %v1662_v51  ;;  %v1665_v50 = vpop.f32.mrb[2].mxu1 }
 0x390   : > { %v1666_v20 = vpop.f32.mrb[3].mxu1 }
 0x391   : > { %v1401_v61 = vadd.f32 %v1664_v18, %v2933_v47  ;;  %v1667_v11 = vadd.f32 %v1666_v20, %v1665_v50 }
 0x393   : > { %1463 = vst [vmem:[%s2936_s22] sm:$0xff] %v1401_v61  ;;  %v1404_v49 = vadd.f32 %v1667_v11, %v2933_v47 }
 0x395   : > { %1464 = vst [vmem:[%s2936_s22 + $0x8] sm:$0xff] %v1404_v49 }
 0x39b   : > { %v1668_v62 = vpop.f32.mrb[4].mxu1 }
 0x39c   : > { %v1669_v54 = vpop.f32.mrb[5].mxu1 }
 0x39d   : > { %v1670_v6 = vadd.f32 %v1669_v54, %v1668_v62  ;;  %v1671_v5 = vpop.f32.mrb[6].mxu1 }
 0x39e   : > { %v1672_v33 = vpop.f32.mrb[7].mxu1 }
 0x39f   : > { %v1409_v4 = vadd.f32 %v1670_v6, %v2933_v47  ;;  %v1673_v3 = vadd.f32 %v1672_v33, %v1671_v5 }
 0x3a1   : > { %1465 = vst [vmem:[%s2936_s22 + $0x10] sm:$0xff] %v1409_v4  ;;  %v1412_v23 = vadd.f32 %v1673_v3, %v2933_v47 }
 0x3a3   : > { %1466 = vst [vmem:[%s2936_s22 + $0x18] sm:$0xff] %v1412_v23 }
 0x3ac   : > { %v1674_v8 = vpop.f32.mrb[8].mxu1 }
 0x3ad   : > { %v1675_v7 = vpop.f32.mrb[9].mxu1 }
 0x3ae   : > { %v1676_v52 = vadd.f32 %v1675_v7, %v1674_v8  ;;  %v1677_v15 = vpop.f32.mrb[10].mxu1 }
 0x3af   : > { %v1678_v38 = vpop.f32.mrb[11].mxu1 }
 0x3b0   : > { %v1417_v31 = vadd.f32 %v1676_v52, %v2933_v47  ;;  %v1679_v55 = vadd.f32 %v1678_v38, %v1677_v15 }
 0x3b2   : > { %1467 = vst [vmem:[%s2936_s22 + $0x20] sm:$0xff] %v1417_v31  ;;  %v1420_v43 = vadd.f32 %v1679_v55, %v2933_v47 }
 0x3b4   : > { %1468 = vst [vmem:[%s2936_s22 + $0x28] sm:$0xff] %v1420_v43 }
 0x3b8   : > { %v1680_v12 = vpop.f32.mrb[12].mxu1 }
 0x3b9   : > { %v1681_v63 = vpop.f32.mrb[13].mxu1 }
 0x3ba   : > { %v1682_v32 = vadd.f32 %v1681_v63, %v1680_v12  ;;  %v1683_v10 = vpop.f32.mrb[14].mxu1 }
 0x3bb   : > { %v1684_v40 = vpop.f32.mrb[15].mxu1 }
 0x3bc   : > { %v1425_v44 = vadd.f32 %v1682_v32, %v2933_v47  ;;  %v1685_v36 = vadd.f32 %v1684_v40, %v1683_v10 }
 0x3be   : > { %1469 = vst [vmem:[%s2936_s22 + $0x30] sm:$0xff] %v1425_v44  ;;  %v1428_v14 = vadd.f32 %v1685_v36, %v2933_v47 }
 0x3c0   : > { %1470 = vst [vmem:[%s2936_s22 + $0x38] sm:$0xff] %v1428_v14 }
 0x3c4   : > { %v1686_v46 = vpop.f32.mrb[16].mxu1 }
 0x3c5   : > { %v1687_v19 = vpop.f32.mrb[17].mxu1 }
 0x3c6   : > { %v1688_v58 = vadd.f32 %v1687_v19, %v1686_v46  ;;  %v1689_v48 = vpop.f32.mrb[18].mxu1 }
 0x3c7   : > { %v1690_v41 = vpop.f32.mrb[19].mxu1 }
 0x3c8   : > { %v1433_v9 = vadd.f32 %v1688_v58, %v2933_v47  ;;  %v1691_v1 = vadd.f32 %v1690_v41, %v1689_v48 }
 0x3ca   : > { %1471 = vst [vmem:[%s2936_s22 + $0x40] sm:$0xff] %v1433_v9  ;;  %v1436_v35 = vadd.f32 %v1691_v1, %v2933_v47 }
 0x3cc   : > { %1472 = vst [vmem:[%s2936_s22 + $0x48] sm:$0xff] %v1436_v35  ;;  %v1692_v25 = vpop.f32.mrb[20].mxu1 }
 0x3cd   : > { %v1693_v16 = vpop.f32.mrb[21].mxu1 }
 0x3ce   : > { %v1694_v2 = vadd.f32 %v1693_v16, %v1692_v25  ;;  %v1695_v24 = vpop.f32.mrb[22].mxu1 }
 0x3cf   : > { %v1696_v30 = vpop.f32.mrb[23].mxu1 }
 0x3d0   : > { %v1441_v28 = vadd.f32 %v1694_v2, %v2933_v47  ;;  %v1697_v17 = vadd.f32 %v1696_v30, %v1695_v24 }
 0x3d2   : > { %1473 = vst [vmem:[%s2936_s22 + $0x50] sm:$0xff] %v1441_v28  ;;  %v1444_v21 = vadd.f32 %v1697_v17, %v2933_v47 }
 0x3d4   : > { %1474 = vst [vmem:[%s2936_s22 + $0x58] sm:$0xff] %v1444_v21 }
 0x3d6   : > { %v1698_v0 = vpop.f32.mrb[24].mxu1 }
 0x3d7   : > { %v1699_v13 = vpop.f32.mrb[25].mxu1 }
 0x3d8   : > { %v1700_v45 = vadd.f32 %v1699_v13, %v1698_v0  ;;  %v1701_v27 = vpop.f32.mrb[26].mxu1 }
 0x3d9   : > { %v1702_v59 = vpop.f32.mrb[27].mxu1 }
 0x3da   : > { %v1449_v60 = vadd.f32 %v1700_v45, %v2933_v47  ;;  %v1703_v34 = vadd.f32 %v1702_v59, %v1701_v27 }
 0x3dc   : > { %1475 = vst [vmem:[%s2936_s22 + $0x60] sm:$0xff] %v1449_v60  ;;  %v1452_v22 = vadd.f32 %v1703_v34, %v2933_v47 }
 0x3de   : > { %1476 = vst [vmem:[%s2936_s22 + $0x68] sm:$0xff] %v1452_v22 }
 0x3e0   : > { %v1704_v29 = vpop.f32.mrb[28].mxu1 }
 0x3e1   : > { %v1705_v39 = vpop.f32.mrb[29].mxu1 }
 0x3e2   : > { %v1706_v53 = vadd.f32 %v1705_v39, %v1704_v29  ;;  %v1707_v42 = vpop.f32.mrb[30].mxu1 }
 0x3e3   : > { %v1708_v56 = vpop.f32.mrb[31].mxu1 }
 0x3e4   : > { %v1457_v57 = vadd.f32 %v1706_v53, %v2933_v47  ;;  %v1709_v37 = vadd.f32 %v1708_v56, %v1707_v42 }
 0x3e6   : > { %1477 = vst [vmem:[%s2936_s22 + $0x70] sm:$0xff] %v1457_v57  ;;  %v1460_v51 = vadd.f32 %v1709_v37, %v2933_v47 }
 0x3e8   : > { %1478 = vst [vmem:[%s2936_s22 + $0x78] sm:$0xff] %v1460_v51 }
 0x3e9   : > { %2027 = shalt.err (!%p2024_p2)
}
 0x3ea   : > { %s2028_s16 = scalar_lea.hbm %s2971_s9, 2048  ;;  %s2032_s22 = scalar_lea.hbm %s3027_s7, 4096 }
 0x3eb   : > { %p2029_p13 = scmp.ne.s32.totalorder %s2971_s9, %s2028_s16  ;;  %p2033_p4 = scmp.lt.u32.totalorder %s2971_s9, %s3027_s7 }
 0x3ec   : > { %p2034_p7 = scmp.lt.u32.totalorder %s2032_s22, %s2028_s16  ;;  %p2036_p11 = scmp.lt.u32.totalorder %s2028_s16, %s2971_s9 }
 0x3ed   : > { %p2030_p6 = pnand %p2029_p13, %p3043_p0 }
 0x3ee   : > { %p2035_p8 = por %p2034_p7, %p2033_p4 }
 0x3ef   : > { %p2031_p10 = pneg %p2030_p6 }
 0x3f0   : > { %p2037_p1 = por %p2036_p11, %p2035_p8 }
 0x3f2   : > { %p2038_p3 = pnand %p2037_p1, %p2031_p10 }
 0x3f4   : > { %2041 = shalt.err (!%p2038_p3)
}
 0x3f5   : > { %s2095_s30 = smov 128   ;;  %s2096_s23 = smov 8  }
 0x3f6   : > { %1720 = dma.vmem_to_hbm [thread:$0]  (%p3043_p0), %s2973_s18, 2048, %s2971_s9, %s1480_s28, %s2095_s30, %s2095_s30, %s2096_s23  }
 0x3f7 PF: > { %s1508_s11 = sand.u32 1, %s2072_s24   ;;  %p3044_p5 = scmp.ne.s32.totalorder %s3033_s8, 0 }
 0x3f8   : > { %p3045_p9 = scmp.ge.s32.totalorder %s2084_s27, 2  ;;  %s1509_s10 = scalar_lea.sflag [#allocation4], %s1508_s11 }
 0x3fa   : > { %p1734_p12 = pnand %p3045_p9, %p3044_p5 }
 0x3fc   : > { %2067 = dma.done.wait (!%p1734_p12), %s1509_s10, 2048  }
 0x3fd   : > { %2069 = vsyncadd (!%p1734_p12), %s1509_s10, 4294965248  ;;  %p21_p2 = scmp.ge.s32.totalorder %s2250_s13, 4   ;;  %s3046_s24 = smov %s2076_s25 }
 0x3fe   : > { %s3047_s25 = smov %s2080_s26  ;;  %s3048_s26 = smov %s2259_s17 }
 0x3ff   : > { %s3049_s27 = smov %s2250_s13  ;;  %23 = sbr.rel (!%p21_p2) target bundleno = 6 (0x6), region = 101 }
 0x406   :  { %1514 = vsyncpa [#allocation3], 1 }
 0x407   :  { %1516 = vsyncpa [#allocation3 + $0x1], 1 }
 0x408   :  { %1517 = vsyncpa [#allocation6], 1 }
 0x409   :  { %1518 = vsyncpa [#allocation4], 1 }
 0x40a   :  { %1520 = vsyncpa [#allocation4 + $0x1], 1 }

</bundles_post_ra>
